<compile_context>
chip_gen: v6e
topology: v6e:2x2x1
jax: 0.10.0
libtpu: 0.0.40
codegen_flags: <defaults>
</compile_context>

<pallas_src>
import functools

import jax
import jax.numpy as jnp
from jax.experimental import pallas as pl
from jax.experimental.pallas import tpu as pltpu


def _generator_kernel(z_ref, valid_ref, wih0_ref, wih_ref, whh_ref,
                      wlin_ref, blin_ref, out_ref,
                      seq_ref, gx_ref,
                      *, num_layers, padding_value, seq_len, tb, hidden_dim):
    """GRU stack + length masking + linear + sigmoid for one batch block.

    Transposed (lane-dense) layout: column index = t * TB + b.

    z_ref    : (Zd, S*TB) f32   noise, features on sublanes
    valid_ref: (1,  S*TB) i32   1 where t < T[b], else 0
    wih0_ref : (3H, Zd)   f32   layer-0 input->gate weights (torch layout)
    wih_ref  : (max(L-1,1), 3H, H) f32  layers>=1 input->gate weights
    whh_ref  : (L, 3H, H) f32   hidden->gate weights (gate-concatenated)
    wlin_ref : (H, H) f32 (out,in), blin_ref: (H, 1) f32
    out_ref  : (H, S*TB) f32
    seq_ref  : (H,  S*TB) f32 scratch — current layer's output sequence
    gx_ref   : (3H, S*TB) f32 scratch — fused hoisted input->gate activations
    """
    S, TB, H = seq_len, tb, hidden_dim

    for layer in range(num_layers):
        # ---- hoisted input->gates for ALL timesteps: one fused matmul ----
        if layer == 0:
            x_all = z_ref[...]                          # (Zd, S*TB)
            w_cat = wih0_ref[...]                       # (3H, Zd)
        else:
            x_all = seq_ref[...]                        # previous layer output
            w_cat = wih_ref[layer - 1]                  # (3H, H)
        # bias_ih == 1.0 and bias_hh == 0.0 by module __init__ -> folded here.
        gx_ref[...] = jnp.dot(w_cat, x_all,
                              preferred_element_type=jnp.float32) + 1.0

        w_hh = whh_ref[layer]                           # (3H, H), gate-fused

        # ---- serial recurrence: one MXU matmul per step, static slices ----
        h = jnp.zeros((H, TB), jnp.float32)
        for t in range(S):
            col = t * TB                                # static, lane-aligned
            gx = gx_ref[:, pl.ds(col, TB)]              # (3H, TB)
            gh = jnp.dot(w_hh, h, preferred_element_type=jnp.float32)
            r = jax.nn.sigmoid(gx[0:H] + gh[0:H])
            zg = jax.nn.sigmoid(gx[H:2 * H] + gh[H:2 * H])
            n = jnp.tanh(gx[2 * H:3 * H] + r * gh[2 * H:3 * H])
            h = (1.0 - zg) * n + zg * h
            seq_ref[:, pl.ds(col, TB)] = h              # next layer's input
        del h

    # ---- pad_packed masking + Linear + Sigmoid, fused, lane-dense store ----
    valid = valid_ref[...] > 0                          # (1, S*TB) bool
    seq_ref[...] = jnp.where(valid, seq_ref[...], jnp.float32(padding_value))
    logits = (jnp.dot(wlin_ref[...], seq_ref[...],
                      preferred_element_type=jnp.float32) + blin_ref[...])
    out_ref[...] = jax.nn.sigmoid(logits)


def init_generator_params(key, Z_dim, hidden_dim, num_layers):
    """Deterministic init matching the PyTorch module's __init__.

    Weights kept in torch (out, in) layout with gate rows [r; z; n] — that is
    exactly the LHS matrix needed by the transposed (feature-on-sublane)
    kernel layout.  bias_ih == 1 and bias_hh == 0 are folded into the kernel.
    """
    H, L = hidden_dim, num_layers
    keys = jax.random.split(key, 2 * L + 1)

    def xavier(k, fan_out, fan_in):
        bound = (6.0 / (fan_in + fan_out)) ** 0.5
        return jax.random.uniform(k, (fan_out, fan_in), jnp.float32, -bound, bound)

    wih0 = xavier(keys[0], 3 * H, Z_dim)                 # torch weight_ih_l0
    wih_list, whh_list = [], []
    for l in range(L):
        if l > 0:
            wih_list.append(xavier(keys[2 * l], 3 * H, H))   # weight_ih_l{l}
        whh_list.append(xavier(keys[2 * l + 1], 3 * H, H))   # weight_hh_l{l}
    wih = (jnp.stack(wih_list) if L > 1
           else jnp.zeros((1, 3 * H, H), jnp.float32))   # dummy when L == 1
    whh = jnp.stack(whh_list)                            # (L, 3H, H)
    wlin = xavier(keys[-1], H, H)                        # Linear weight (out,in)
    blin = jnp.zeros((H, 1), jnp.float32)                # linear bias.fill_(0)
    return dict(wih0=wih0, wih=wih, whh=whh, wlin=wlin, blin=blin)


def generator_network_forward(Z, T, params, *, padding_value, max_seq_len,
                              batch_block=128):
    """Pallas forward of GeneratorNetwork.  Z: (B,S,Z_dim), T: (B,) -> (B,S,H)."""
    B, S, Zd = Z.shape
    assert S == max_seq_len
    H = params['wlin'].shape[0]
    L = params['whh'].shape[0]

    # Lane-dense layout: batch/time live on lanes.  Each grid block holds TB
    # batch rows (TB a multiple of 128 -> per-step slices are full lane tiles).
    TB = max(128, (int(batch_block) // 128) * 128)
    Bp = ((B + TB - 1) // TB) * TB
    NB = Bp // TB
    cols = NB * S * TB

    # ---- wrapper-side layout glue: column index = j*S*TB + t*TB + b ----
    Zt = jnp.transpose(Z.astype(jnp.float32), (1, 0, 2))            # (S, B, Zd)
    Zp = jnp.zeros((S, Bp, Zd), jnp.float32).at[:, :B, :].set(Zt)
    z_flat = (Zp.reshape(S, NB, TB, Zd).transpose(3, 1, 0, 2)
              .reshape(Zd, cols))

    Tp = jnp.zeros((Bp,), jnp.int32).at[:B].set(T.astype(jnp.int32))
    valid = (jnp.arange(S, dtype=jnp.int32)[:, None]
             < Tp[None, :]).astype(jnp.int32)                        # (S, Bp)
    v_flat = (valid.reshape(S, NB, TB).transpose(1, 0, 2)
              .reshape(1, cols))

    kernel = functools.partial(_generator_kernel, num_layers=L,
                               padding_value=float(padding_value),
                               seq_len=S, tb=TB, hidden_dim=H)

    # Explicit VMEM budget: scratch + double-buffered I/O blocks + weights,
    # capped at 64 MiB so it is valid on v7x as well as v5e/v6e.
    weight_elems = (params['wih0'].size + params['wih'].size
                    + params['whh'].size + params['wlin'].size
                    + params['blin'].size)
    est_bytes = 4 * (S * TB * (4 * H)                    # seq + gx scratch
                     + 2 * S * TB * (Zd + 1 + H)         # z / valid / out blocks
                     + 2 * weight_elems)
    vmem_limit = int(min(max(32 * 1024 * 1024, est_bytes + (2 << 20)),
                         64 * 1024 * 1024))

    out_flat = pl.pallas_call(
        kernel,
        out_shape=jax.ShapeDtypeStruct((H, cols), jnp.float32),
        grid=(NB,),
        in_specs=[
            pl.BlockSpec((Zd, S * TB), lambda j: (0, j)),                  # Z^T
            pl.BlockSpec((1, S * TB), lambda j: (0, j)),                   # validity
            pl.BlockSpec((3 * H, Zd), lambda j: (0, 0)),                   # W_ih l0
            pl.BlockSpec((max(L - 1, 1), 3 * H, H), lambda j: (0, 0, 0)),  # W_ih l>=1
            pl.BlockSpec((L, 3 * H, H), lambda j: (0, 0, 0)),              # W_hh
            pl.BlockSpec((H, H), lambda j: (0, 0)),                        # linear W
            pl.BlockSpec((H, 1), lambda j: (0, 0)),                        # linear b
        ],
        out_specs=pl.BlockSpec((H, S * TB), lambda j: (0, j)),
        scratch_shapes=[
            pltpu.VMEM((H, S * TB), jnp.float32),        # layer output sequence
            pltpu.VMEM((3 * H, S * TB), jnp.float32),    # fused input->gate acts
        ],
        compiler_params=pltpu.CompilerParams(
            dimension_semantics=("parallel",),
            vmem_limit_bytes=vmem_limit),
    )(z_flat, v_flat, params['wih0'], params['wih'], params['whh'],
      params['wlin'], params['blin'])

    out = (out_flat.reshape(H, NB, S, TB).transpose(2, 1, 3, 0)
           .reshape(S, Bp, H))
    return jnp.transpose(out[:, :B, :], (1, 0, 2))                  # (B, S, H)


def _reference_forward(Z, T, params, padding_value):
    """Pure-JAX reference with identical math (for correctness check)."""
    B, S, _ = Z.shape
    H = params['wlin'].shape[0]
    L = params['whh'].shape[0]
    x = Z.astype(jnp.float32)
    for l in range(L):
        W_ih = params['wih0'] if l == 0 else params['wih'][l - 1]   # (3H, in)
        W_hh = params['whh'][l]                                     # (3H, H)
        h = jnp.zeros((B, H), jnp.float32)
        outs = []
        for t in range(S):
            gi = x[:, t, :] @ W_ih.T + 1.0            # bias_ih == 1
            gh = h @ W_hh.T                           # bias_hh == 0
            r = jax.nn.sigmoid(gi[:, :H] + gh[:, :H])
            zg = jax.nn.sigmoid(gi[:, H:2 * H] + gh[:, H:2 * H])
            n = jnp.tanh(gi[:, 2 * H:] + r * gh[:, 2 * H:])
            h = (1.0 - zg) * n + zg * h
            outs.append(h)
        x = jnp.stack(outs, axis=1)
    mask = jnp.arange(S)[None, :, None] < T[:, None, None]
    h_all = jnp.where(mask, x, jnp.float32(padding_value))
    return jax.nn.sigmoid(h_all @ params['wlin'].T
                          + params['blin'].reshape(1, H))


if __name__ == "__main__":
    # Small shapes consistent with the module: B=4, max_seq_len=8, Z_dim=8,
    # hidden_dim=32, num_layers=2, padding_value=-1.0 (TimeGAN default).
    B, S, Zdim, H, L = 4, 8, 8, 32, 2
    padding_value = -1.0

    key = jax.random.PRNGKey(0)
    kp, kz, kt = jax.random.split(key, 3)
    params = init_generator_params(kp, Zdim, H, L)
    Z = jax.random.uniform(kz, (B, S, Zdim), jnp.float32)
    T = jax.random.randint(kt, (B,), 1, S + 1)   # valid lengths in [1, S]

    out = generator_network_forward(Z, T, params,
                                    padding_value=padding_value, max_seq_len=S)
    out = jax.block_until_ready(out)

    ref = _reference_forward(Z, T, params, padding_value)
    assert out.shape == (B, S, H)
    assert jnp.allclose(out, ref, atol=1e-4, rtol=1e-4), "mismatch vs reference"
    print("KERNEL_OK")
</pallas_src>

<mosaic_0001>
module attributes {stable_mosaic.version = 11 : i64} {
  func.func @_generator_kernel(%arg0: i32, %arg1: memref<8x1024xf32, #tpu.memory_space<vmem>>, %arg2: memref<1x1024xi32, #tpu.memory_space<vmem>>, %arg3: memref<96x8xf32, #tpu.memory_space<vmem>>, %arg4: memref<1x96x32xf32, #tpu.memory_space<vmem>>, %arg5: memref<2x96x32xf32, #tpu.memory_space<vmem>>, %arg6: memref<32x32xf32, #tpu.memory_space<vmem>>, %arg7: memref<32x1xf32, #tpu.memory_space<vmem>>, %arg8: memref<32x1024xf32, #tpu.memory_space<vmem>>, %arg9: memref<32x1024xf32, #tpu.memory_space<vmem>>, %arg10: memref<96x1024xf32, #tpu.memory_space<vmem>>) attributes {dimension_semantics = [#tpu.dimension_semantics<parallel>], iteration_bounds = array<i64: 1>, scalar_prefetch = 0 : i64, scratch_operands = 2 : i64, tpu.core_type = #tpu.core_type<tc>, window_params = [{transform_indices = @transform_0, window_bounds = array<i64: 8, 1024>}, {transform_indices = @transform_1, window_bounds = array<i64: 1, 1024>}, {pipeline_mode = #tpu.pipeline_mode<synchronous>, transform_indices = @transform_2, window_bounds = array<i64: 96, 8>}, {pipeline_mode = #tpu.pipeline_mode<synchronous>, transform_indices = @transform_3, window_bounds = array<i64: 1, 96, 32>}, {pipeline_mode = #tpu.pipeline_mode<synchronous>, transform_indices = @transform_4, window_bounds = array<i64: 2, 96, 32>}, {pipeline_mode = #tpu.pipeline_mode<synchronous>, transform_indices = @transform_5, window_bounds = array<i64: 32, 32>}, {pipeline_mode = #tpu.pipeline_mode<synchronous>, transform_indices = @transform_6, window_bounds = array<i64: 32, 1>}, {transform_indices = @transform_7, window_bounds = array<i64: 32, 1024>}]} {
    %c0 = arith.constant 0 : index
    %c0_0 = arith.constant 0 : index
    %0 = vector.load %arg1[%c0, %c0_0] : memref<8x1024xf32, #tpu.memory_space<vmem>>, vector<8x1024xf32>
    %c0_1 = arith.constant 0 : index
    %c0_2 = arith.constant 0 : index
    %1 = vector.load %arg3[%c0_1, %c0_2] : memref<96x8xf32, #tpu.memory_space<vmem>>, vector<96x8xf32>
    %cst = arith.constant dense<0.000000e+00> : vector<96x1024xf32>
    %2 = tpu.matmul %1, %0, %cst {dimension_numbers = #tpu.dot_dimension_numbers<[1], [0], [0], [1], [0, 0, 1, 1], [], []>} : vector<96x8xf32>, vector<8x1024xf32>, vector<96x1024xf32> -> vector<96x1024xf32>
    %cst_3 = arith.constant 1.000000e+00 : f32
    %3 = vector.broadcast %cst_3 : f32 to vector<96x1024xf32>
    %4 = arith.addf %2, %3 : vector<96x1024xf32>
    %c0_4 = arith.constant 0 : index
    %c0_5 = arith.constant 0 : index
    %5 = vector.load %arg10[%c0_4, %c0_5] : memref<96x1024xf32, #tpu.memory_space<vmem>>, vector<96x1024xf32>
    tpu.vector_store %arg10[%c0_4, %c0_5], %4 {strides = array<i32>} : memref<96x1024xf32, #tpu.memory_space<vmem>>, vector<96x1024xf32>,
    %c0_6 = arith.constant 0 : index
    %c0_7 = arith.constant 0 : index
    %c0_8 = arith.constant 0 : index
    %6 = vector.load %arg5[%c0_6, %c0_7, %c0_8] : memref<2x96x32xf32, #tpu.memory_space<vmem>>, vector<1x96x32xf32>
    %7 = vector.shape_cast %6 : vector<1x96x32xf32> to vector<96x32xf32>
    %cst_9 = arith.constant 0.000000e+00 : f32
    %8 = vector.broadcast %cst_9 : f32 to vector<32x128xf32>
    %c0_10 = arith.constant 0 : index
    %c0_11 = arith.constant 0 : index
    %9 = vector.load %arg10[%c0_10, %c0_11] : memref<96x1024xf32, #tpu.memory_space<vmem>>, vector<96x128xf32>
    %cst_12 = arith.constant dense<0.000000e+00> : vector<96x128xf32>
    %10 = tpu.matmul %7, %8, %cst_12 {dimension_numbers = #tpu.dot_dimension_numbers<[1], [0], [0], [1], [0, 0, 1, 1], [], []>} : vector<96x32xf32>, vector<32x128xf32>, vector<96x128xf32> -> vector<96x128xf32>
    %11 = vector.extract_strided_slice %9 {offsets = [0, 0], sizes = [32, 128], strides = [1, 1]} : vector<96x128xf32> to vector<32x128xf32>
    %12 = vector.extract_strided_slice %10 {offsets = [0, 0], sizes = [32, 128], strides = [1, 1]} : vector<96x128xf32> to vector<32x128xf32>
    %13 = arith.addf %11, %12 : vector<32x128xf32>
    %14 = arith.negf %13 : vector<32x128xf32>
    %15 = math.exp %14 : vector<32x128xf32>
    %cst_13 = arith.constant 1.000000e+00 : f32
    %16 = vector.broadcast %cst_13 : f32 to vector<32x128xf32>
    %17 = arith.addf %16, %15 : vector<32x128xf32>
    %18 = arith.divf %16, %17 : vector<32x128xf32>
    %19 = vector.extract_strided_slice %9 {offsets = [32, 0], sizes = [32, 128], strides = [1, 1]} : vector<96x128xf32> to vector<32x128xf32>
    %20 = vector.extract_strided_slice %10 {offsets = [32, 0], sizes = [32, 128], strides = [1, 1]} : vector<96x128xf32> to vector<32x128xf32>
    %21 = arith.addf %19, %20 : vector<32x128xf32>
    %22 = arith.negf %21 : vector<32x128xf32>
    %23 = math.exp %22 : vector<32x128xf32>
    %cst_14 = arith.constant 1.000000e+00 : f32
    %24 = vector.broadcast %cst_14 : f32 to vector<32x128xf32>
    %25 = arith.addf %24, %23 : vector<32x128xf32>
    %26 = arith.divf %24, %25 : vector<32x128xf32>
    %27 = vector.extract_strided_slice %9 {offsets = [64, 0], sizes = [32, 128], strides = [1, 1]} : vector<96x128xf32> to vector<32x128xf32>
    %28 = vector.extract_strided_slice %10 {offsets = [64, 0], sizes = [32, 128], strides = [1, 1]} : vector<96x128xf32> to vector<32x128xf32>
    %29 = arith.mulf %18, %28 : vector<32x128xf32>
    %30 = arith.addf %27, %29 : vector<32x128xf32>
    %31 = math.tanh %30 : vector<32x128xf32>
    %cst_15 = arith.constant 1.000000e+00 : f32
    %32 = vector.broadcast %cst_15 : f32 to vector<32x128xf32>
    %33 = arith.subf %32, %26 : vector<32x128xf32>
    %34 = arith.mulf %33, %31 : vector<32x128xf32>
    %35 = arith.mulf %26, %8 : vector<32x128xf32>
    %36 = arith.addf %34, %35 : vector<32x128xf32>
    %c0_16 = arith.constant 0 : index
    %c0_17 = arith.constant 0 : index
    %37 = vector.load %arg9[%c0_16, %c0_17] : memref<32x1024xf32, #tpu.memory_space<vmem>>, vector<32x128xf32>
    tpu.vector_store %arg9[%c0_16, %c0_17], %36 {strides = array<i32>} : memref<32x1024xf32, #tpu.memory_space<vmem>>, vector<32x128xf32>,
    %c0_18 = arith.constant 0 : index
    %c128 = arith.constant 128 : index
    %38 = vector.load %arg10[%c0_18, %c128] : memref<96x1024xf32, #tpu.memory_space<vmem>>, vector<96x128xf32>
    %cst_19 = arith.constant dense<0.000000e+00> : vector<96x128xf32>
    %39 = tpu.matmul %7, %36, %cst_19 {dimension_numbers = #tpu.dot_dimension_numbers<[1], [0], [0], [1], [0, 0, 1, 1], [], []>} : vector<96x32xf32>, vector<32x128xf32>, vector<96x128xf32> -> vector<96x128xf32>
    %40 = vector.extract_strided_slice %38 {offsets = [0, 0], sizes = [32, 128], strides = [1, 1]} : vector<96x128xf32> to vector<32x128xf32>
    %41 = vector.extract_strided_slice %39 {offsets = [0, 0], sizes = [32, 128], strides = [1, 1]} : vector<96x128xf32> to vector<32x128xf32>
    %42 = arith.addf %40, %41 : vector<32x128xf32>
    %43 = arith.negf %42 : vector<32x128xf32>
    %44 = math.exp %43 : vector<32x128xf32>
    %cst_20 = arith.constant 1.000000e+00 : f32
    %45 = vector.broadcast %cst_20 : f32 to vector<32x128xf32>
    %46 = arith.addf %45, %44 : vector<32x128xf32>
    %47 = arith.divf %45, %46 : vector<32x128xf32>
    %48 = vector.extract_strided_slice %38 {offsets = [32, 0], sizes = [32, 128], strides = [1, 1]} : vector<96x128xf32> to vector<32x128xf32>
    %49 = vector.extract_strided_slice %39 {offsets = [32, 0], sizes = [32, 128], strides = [1, 1]} : vector<96x128xf32> to vector<32x128xf32>
    %50 = arith.addf %48, %49 : vector<32x128xf32>
    %51 = arith.negf %50 : vector<32x128xf32>
    %52 = math.exp %51 : vector<32x128xf32>
    %cst_21 = arith.constant 1.000000e+00 : f32
    %53 = vector.broadcast %cst_21 : f32 to vector<32x128xf32>
    %54 = arith.addf %53, %52 : vector<32x128xf32>
    %55 = arith.divf %53, %54 : vector<32x128xf32>
    %56 = vector.extract_strided_slice %38 {offsets = [64, 0], sizes = [32, 128], strides = [1, 1]} : vector<96x128xf32> to vector<32x128xf32>
    %57 = vector.extract_strided_slice %39 {offsets = [64, 0], sizes = [32, 128], strides = [1, 1]} : vector<96x128xf32> to vector<32x128xf32>
    %58 = arith.mulf %47, %57 : vector<32x128xf32>
    %59 = arith.addf %56, %58 : vector<32x128xf32>
    %60 = math.tanh %59 : vector<32x128xf32>
    %cst_22 = arith.constant 1.000000e+00 : f32
    %61 = vector.broadcast %cst_22 : f32 to vector<32x128xf32>
    %62 = arith.subf %61, %55 : vector<32x128xf32>
    %63 = arith.mulf %62, %60 : vector<32x128xf32>
    %64 = arith.mulf %55, %36 : vector<32x128xf32>
    %65 = arith.addf %63, %64 : vector<32x128xf32>
    %c0_23 = arith.constant 0 : index
    %c128_24 = arith.constant 128 : index
    %66 = vector.load %arg9[%c0_23, %c128_24] : memref<32x1024xf32, #tpu.memory_space<vmem>>, vector<32x128xf32>
    tpu.vector_store %arg9[%c0_23, %c128_24], %65 {strides = array<i32>} : memref<32x1024xf32, #tpu.memory_space<vmem>>, vector<32x128xf32>,
    %c0_25 = arith.constant 0 : index
    %c256 = arith.constant 256 : index
    %67 = vector.load %arg10[%c0_25, %c256] : memref<96x1024xf32, #tpu.memory_space<vmem>>, vector<96x128xf32>
    %cst_26 = arith.constant dense<0.000000e+00> : vector<96x128xf32>
    %68 = tpu.matmul %7, %65, %cst_26 {dimension_numbers = #tpu.dot_dimension_numbers<[1], [0], [0], [1], [0, 0, 1, 1], [], []>} : vector<96x32xf32>, vector<32x128xf32>, vector<96x128xf32> -> vector<96x128xf32>
    %69 = vector.extract_strided_slice %67 {offsets = [0, 0], sizes = [32, 128], strides = [1, 1]} : vector<96x128xf32> to vector<32x128xf32>
    %70 = vector.extract_strided_slice %68 {offsets = [0, 0], sizes = [32, 128], strides = [1, 1]} : vector<96x128xf32> to vector<32x128xf32>
    %71 = arith.addf %69, %70 : vector<32x128xf32>
    %72 = arith.negf %71 : vector<32x128xf32>
    %73 = math.exp %72 : vector<32x128xf32>
    %cst_27 = arith.constant 1.000000e+00 : f32
    %74 = vector.broadcast %cst_27 : f32 to vector<32x128xf32>
    %75 = arith.addf %74, %73 : vector<32x128xf32>
    %76 = arith.divf %74, %75 : vector<32x128xf32>
    %77 = vector.extract_strided_slice %67 {offsets = [32, 0], sizes = [32, 128], strides = [1, 1]} : vector<96x128xf32> to vector<32x128xf32>
    %78 = vector.extract_strided_slice %68 {offsets = [32, 0], sizes = [32, 128], strides = [1, 1]} : vector<96x128xf32> to vector<32x128xf32>
    %79 = arith.addf %77, %78 : vector<32x128xf32>
    %80 = arith.negf %79 : vector<32x128xf32>
    %81 = math.exp %80 : vector<32x128xf32>
    %cst_28 = arith.constant 1.000000e+00 : f32
    %82 = vector.broadcast %cst_28 : f32 to vector<32x128xf32>
    %83 = arith.addf %82, %81 : vector<32x128xf32>
    %84 = arith.divf %82, %83 : vector<32x128xf32>
    %85 = vector.extract_strided_slice %67 {offsets = [64, 0], sizes = [32, 128], strides = [1, 1]} : vector<96x128xf32> to vector<32x128xf32>
    %86 = vector.extract_strided_slice %68 {offsets = [64, 0], sizes = [32, 128], strides = [1, 1]} : vector<96x128xf32> to vector<32x128xf32>
    %87 = arith.mulf %76, %86 : vector<32x128xf32>
    %88 = arith.addf %85, %87 : vector<32x128xf32>
    %89 = math.tanh %88 : vector<32x128xf32>
    %cst_29 = arith.constant 1.000000e+00 : f32
    %90 = vector.broadcast %cst_29 : f32 to vector<32x128xf32>
    %91 = arith.subf %90, %84 : vector<32x128xf32>
    %92 = arith.mulf %91, %89 : vector<32x128xf32>
    %93 = arith.mulf %84, %65 : vector<32x128xf32>
    %94 = arith.addf %92, %93 : vector<32x128xf32>
    %c0_30 = arith.constant 0 : index
    %c256_31 = arith.constant 256 : index
    %95 = vector.load %arg9[%c0_30, %c256_31] : memref<32x1024xf32, #tpu.memory_space<vmem>>, vector<32x128xf32>
    tpu.vector_store %arg9[%c0_30, %c256_31], %94 {strides = array<i32>} : memref<32x1024xf32, #tpu.memory_space<vmem>>, vector<32x128xf32>,
    %c0_32 = arith.constant 0 : index
    %c384 = arith.constant 384 : index
    %96 = vector.load %arg10[%c0_32, %c384] : memref<96x1024xf32, #tpu.memory_space<vmem>>, vector<96x128xf32>
    %cst_33 = arith.constant dense<0.000000e+00> : vector<96x128xf32>
    %97 = tpu.matmul %7, %94, %cst_33 {dimension_numbers = #tpu.dot_dimension_numbers<[1], [0], [0], [1], [0, 0, 1, 1], [], []>} : vector<96x32xf32>, vector<32x128xf32>, vector<96x128xf32> -> vector<96x128xf32>
    %98 = vector.extract_strided_slice %96 {offsets = [0, 0], sizes = [32, 128], strides = [1, 1]} : vector<96x128xf32> to vector<32x128xf32>
    %99 = vector.extract_strided_slice %97 {offsets = [0, 0], sizes = [32, 128], strides = [1, 1]} : vector<96x128xf32> to vector<32x128xf32>
    %100 = arith.addf %98, %99 : vector<32x128xf32>
    %101 = arith.negf %100 : vector<32x128xf32>
    %102 = math.exp %101 : vector<32x128xf32>
    %cst_34 = arith.constant 1.000000e+00 : f32
    %103 = vector.broadcast %cst_34 : f32 to vector<32x128xf32>
    %104 = arith.addf %103, %102 : vector<32x128xf32>
    %105 = arith.divf %103, %104 : vector<32x128xf32>
    %106 = vector.extract_strided_slice %96 {offsets = [32, 0], sizes = [32, 128], strides = [1, 1]} : vector<96x128xf32> to vector<32x128xf32>
    %107 = vector.extract_strided_slice %97 {offsets = [32, 0], sizes = [32, 128], strides = [1, 1]} : vector<96x128xf32> to vector<32x128xf32>
    %108 = arith.addf %106, %107 : vector<32x128xf32>
    %109 = arith.negf %108 : vector<32x128xf32>
    %110 = math.exp %109 : vector<32x128xf32>
    %cst_35 = arith.constant 1.000000e+00 : f32
    %111 = vector.broadcast %cst_35 : f32 to vector<32x128xf32>
    %112 = arith.addf %111, %110 : vector<32x128xf32>
    %113 = arith.divf %111, %112 : vector<32x128xf32>
    %114 = vector.extract_strided_slice %96 {offsets = [64, 0], sizes = [32, 128], strides = [1, 1]} : vector<96x128xf32> to vector<32x128xf32>
    %115 = vector.extract_strided_slice %97 {offsets = [64, 0], sizes = [32, 128], strides = [1, 1]} : vector<96x128xf32> to vector<32x128xf32>
    %116 = arith.mulf %105, %115 : vector<32x128xf32>
    %117 = arith.addf %114, %116 : vector<32x128xf32>
    %118 = math.tanh %117 : vector<32x128xf32>
    %cst_36 = arith.constant 1.000000e+00 : f32
    %119 = vector.broadcast %cst_36 : f32 to vector<32x128xf32>
    %120 = arith.subf %119, %113 : vector<32x128xf32>
    %121 = arith.mulf %120, %118 : vector<32x128xf32>
    %122 = arith.mulf %113, %94 : vector<32x128xf32>
    %123 = arith.addf %121, %122 : vector<32x128xf32>
    %c0_37 = arith.constant 0 : index
    %c384_38 = arith.constant 384 : index
    %124 = vector.load %arg9[%c0_37, %c384_38] : memref<32x1024xf32, #tpu.memory_space<vmem>>, vector<32x128xf32>
    tpu.vector_store %arg9[%c0_37, %c384_38], %123 {strides = array<i32>} : memref<32x1024xf32, #tpu.memory_space<vmem>>, vector<32x128xf32>,
    %c0_39 = arith.constant 0 : index
    %c512 = arith.constant 512 : index
    %125 = vector.load %arg10[%c0_39, %c512] : memref<96x1024xf32, #tpu.memory_space<vmem>>, vector<96x128xf32>
    %cst_40 = arith.constant dense<0.000000e+00> : vector<96x128xf32>
    %126 = tpu.matmul %7, %123, %cst_40 {dimension_numbers = #tpu.dot_dimension_numbers<[1], [0], [0], [1], [0, 0, 1, 1], [], []>} : vector<96x32xf32>, vector<32x128xf32>, vector<96x128xf32> -> vector<96x128xf32>
    %127 = vector.extract_strided_slice %125 {offsets = [0, 0], sizes = [32, 128], strides = [1, 1]} : vector<96x128xf32> to vector<32x128xf32>
    %128 = vector.extract_strided_slice %126 {offsets = [0, 0], sizes = [32, 128], strides = [1, 1]} : vector<96x128xf32> to vector<32x128xf32>
    %129 = arith.addf %127, %128 : vector<32x128xf32>
    %130 = arith.negf %129 : vector<32x128xf32>
    %131 = math.exp %130 : vector<32x128xf32>
    %cst_41 = arith.constant 1.000000e+00 : f32
    %132 = vector.broadcast %cst_41 : f32 to vector<32x128xf32>
    %133 = arith.addf %132, %131 : vector<32x128xf32>
    %134 = arith.divf %132, %133 : vector<32x128xf32>
    %135 = vector.extract_strided_slice %125 {offsets = [32, 0], sizes = [32, 128], strides = [1, 1]} : vector<96x128xf32> to vector<32x128xf32>
    %136 = vector.extract_strided_slice %126 {offsets = [32, 0], sizes = [32, 128], strides = [1, 1]} : vector<96x128xf32> to vector<32x128xf32>
    %137 = arith.addf %135, %136 : vector<32x128xf32>
    %138 = arith.negf %137 : vector<32x128xf32>
    %139 = math.exp %138 : vector<32x128xf32>
    %cst_42 = arith.constant 1.000000e+00 : f32
    %140 = vector.broadcast %cst_42 : f32 to vector<32x128xf32>
    %141 = arith.addf %140, %139 : vector<32x128xf32>
    %142 = arith.divf %140, %141 : vector<32x128xf32>
    %143 = vector.extract_strided_slice %125 {offsets = [64, 0], sizes = [32, 128], strides = [1, 1]} : vector<96x128xf32> to vector<32x128xf32>
    %144 = vector.extract_strided_slice %126 {offsets = [64, 0], sizes = [32, 128], strides = [1, 1]} : vector<96x128xf32> to vector<32x128xf32>
    %145 = arith.mulf %134, %144 : vector<32x128xf32>
    %146 = arith.addf %143, %145 : vector<32x128xf32>
    %147 = math.tanh %146 : vector<32x128xf32>
    %cst_43 = arith.constant 1.000000e+00 : f32
    %148 = vector.broadcast %cst_43 : f32 to vector<32x128xf32>
    %149 = arith.subf %148, %142 : vector<32x128xf32>
    %150 = arith.mulf %149, %147 : vector<32x128xf32>
    %151 = arith.mulf %142, %123 : vector<32x128xf32>
    %152 = arith.addf %150, %151 : vector<32x128xf32>
    %c0_44 = arith.constant 0 : index
    %c512_45 = arith.constant 512 : index
    %153 = vector.load %arg9[%c0_44, %c512_45] : memref<32x1024xf32, #tpu.memory_space<vmem>>, vector<32x128xf32>
    tpu.vector_store %arg9[%c0_44, %c512_45], %152 {strides = array<i32>} : memref<32x1024xf32, #tpu.memory_space<vmem>>, vector<32x128xf32>,
    %c0_46 = arith.constant 0 : index
    %c640 = arith.constant 640 : index
    %154 = vector.load %arg10[%c0_46, %c640] : memref<96x1024xf32, #tpu.memory_space<vmem>>, vector<96x128xf32>
    %cst_47 = arith.constant dense<0.000000e+00> : vector<96x128xf32>
    %155 = tpu.matmul %7, %152, %cst_47 {dimension_numbers = #tpu.dot_dimension_numbers<[1], [0], [0], [1], [0, 0, 1, 1], [], []>} : vector<96x32xf32>, vector<32x128xf32>, vector<96x128xf32> -> vector<96x128xf32>
    %156 = vector.extract_strided_slice %154 {offsets = [0, 0], sizes = [32, 128], strides = [1, 1]} : vector<96x128xf32> to vector<32x128xf32>
    %157 = vector.extract_strided_slice %155 {offsets = [0, 0], sizes = [32, 128], strides = [1, 1]} : vector<96x128xf32> to vector<32x128xf32>
    %158 = arith.addf %156, %157 : vector<32x128xf32>
    %159 = arith.negf %158 : vector<32x128xf32>
    %160 = math.exp %159 : vector<32x128xf32>
    %cst_48 = arith.constant 1.000000e+00 : f32
    %161 = vector.broadcast %cst_48 : f32 to vector<32x128xf32>
    %162 = arith.addf %161, %160 : vector<32x128xf32>
    %163 = arith.divf %161, %162 : vector<32x128xf32>
    %164 = vector.extract_strided_slice %154 {offsets = [32, 0], sizes = [32, 128], strides = [1, 1]} : vector<96x128xf32> to vector<32x128xf32>
    %165 = vector.extract_strided_slice %155 {offsets = [32, 0], sizes = [32, 128], strides = [1, 1]} : vector<96x128xf32> to vector<32x128xf32>
    %166 = arith.addf %164, %165 : vector<32x128xf32>
    %167 = arith.negf %166 : vector<32x128xf32>
    %168 = math.exp %167 : vector<32x128xf32>
    %cst_49 = arith.constant 1.000000e+00 : f32
    %169 = vector.broadcast %cst_49 : f32 to vector<32x128xf32>
    %170 = arith.addf %169, %168 : vector<32x128xf32>
    %171 = arith.divf %169, %170 : vector<32x128xf32>
    %172 = vector.extract_strided_slice %154 {offsets = [64, 0], sizes = [32, 128], strides = [1, 1]} : vector<96x128xf32> to vector<32x128xf32>
    %173 = vector.extract_strided_slice %155 {offsets = [64, 0], sizes = [32, 128], strides = [1, 1]} : vector<96x128xf32> to vector<32x128xf32>
    %174 = arith.mulf %163, %173 : vector<32x128xf32>
    %175 = arith.addf %172, %174 : vector<32x128xf32>
    %176 = math.tanh %175 : vector<32x128xf32>
    %cst_50 = arith.constant 1.000000e+00 : f32
    %177 = vector.broadcast %cst_50 : f32 to vector<32x128xf32>
    %178 = arith.subf %177, %171 : vector<32x128xf32>
    %179 = arith.mulf %178, %176 : vector<32x128xf32>
    %180 = arith.mulf %171, %152 : vector<32x128xf32>
    %181 = arith.addf %179, %180 : vector<32x128xf32>
    %c0_51 = arith.constant 0 : index
    %c640_52 = arith.constant 640 : index
    %182 = vector.load %arg9[%c0_51, %c640_52] : memref<32x1024xf32, #tpu.memory_space<vmem>>, vector<32x128xf32>
    tpu.vector_store %arg9[%c0_51, %c640_52], %181 {strides = array<i32>} : memref<32x1024xf32, #tpu.memory_space<vmem>>, vector<32x128xf32>,
    %c0_53 = arith.constant 0 : index
    %c768 = arith.constant 768 : index
    %183 = vector.load %arg10[%c0_53, %c768] : memref<96x1024xf32, #tpu.memory_space<vmem>>, vector<96x128xf32>
    %cst_54 = arith.constant dense<0.000000e+00> : vector<96x128xf32>
    %184 = tpu.matmul %7, %181, %cst_54 {dimension_numbers = #tpu.dot_dimension_numbers<[1], [0], [0], [1], [0, 0, 1, 1], [], []>} : vector<96x32xf32>, vector<32x128xf32>, vector<96x128xf32> -> vector<96x128xf32>
    %185 = vector.extract_strided_slice %183 {offsets = [0, 0], sizes = [32, 128], strides = [1, 1]} : vector<96x128xf32> to vector<32x128xf32>
    %186 = vector.extract_strided_slice %184 {offsets = [0, 0], sizes = [32, 128], strides = [1, 1]} : vector<96x128xf32> to vector<32x128xf32>
    %187 = arith.addf %185, %186 : vector<32x128xf32>
    %188 = arith.negf %187 : vector<32x128xf32>
    %189 = math.exp %188 : vector<32x128xf32>
    %cst_55 = arith.constant 1.000000e+00 : f32
    %190 = vector.broadcast %cst_55 : f32 to vector<32x128xf32>
    %191 = arith.addf %190, %189 : vector<32x128xf32>
    %192 = arith.divf %190, %191 : vector<32x128xf32>
    %193 = vector.extract_strided_slice %183 {offsets = [32, 0], sizes = [32, 128], strides = [1, 1]} : vector<96x128xf32> to vector<32x128xf32>
    %194 = vector.extract_strided_slice %184 {offsets = [32, 0], sizes = [32, 128], strides = [1, 1]} : vector<96x128xf32> to vector<32x128xf32>
    %195 = arith.addf %193, %194 : vector<32x128xf32>
    %196 = arith.negf %195 : vector<32x128xf32>
    %197 = math.exp %196 : vector<32x128xf32>
    %cst_56 = arith.constant 1.000000e+00 : f32
    %198 = vector.broadcast %cst_56 : f32 to vector<32x128xf32>
    %199 = arith.addf %198, %197 : vector<32x128xf32>
    %200 = arith.divf %198, %199 : vector<32x128xf32>
    %201 = vector.extract_strided_slice %183 {offsets = [64, 0], sizes = [32, 128], strides = [1, 1]} : vector<96x128xf32> to vector<32x128xf32>
    %202 = vector.extract_strided_slice %184 {offsets = [64, 0], sizes = [32, 128], strides = [1, 1]} : vector<96x128xf32> to vector<32x128xf32>
    %203 = arith.mulf %192, %202 : vector<32x128xf32>
    %204 = arith.addf %201, %203 : vector<32x128xf32>
    %205 = math.tanh %204 : vector<32x128xf32>
    %cst_57 = arith.constant 1.000000e+00 : f32
    %206 = vector.broadcast %cst_57 : f32 to vector<32x128xf32>
    %207 = arith.subf %206, %200 : vector<32x128xf32>
    %208 = arith.mulf %207, %205 : vector<32x128xf32>
    %209 = arith.mulf %200, %181 : vector<32x128xf32>
    %210 = arith.addf %208, %209 : vector<32x128xf32>
    %c0_58 = arith.constant 0 : index
    %c768_59 = arith.constant 768 : index
    %211 = vector.load %arg9[%c0_58, %c768_59] : memref<32x1024xf32, #tpu.memory_space<vmem>>, vector<32x128xf32>
    tpu.vector_store %arg9[%c0_58, %c768_59], %210 {strides = array<i32>} : memref<32x1024xf32, #tpu.memory_space<vmem>>, vector<32x128xf32>,
    %c0_60 = arith.constant 0 : index
    %c896 = arith.constant 896 : index
    %212 = vector.load %arg10[%c0_60, %c896] : memref<96x1024xf32, #tpu.memory_space<vmem>>, vector<96x128xf32>
    %cst_61 = arith.constant dense<0.000000e+00> : vector<96x128xf32>
    %213 = tpu.matmul %7, %210, %cst_61 {dimension_numbers = #tpu.dot_dimension_numbers<[1], [0], [0], [1], [0, 0, 1, 1], [], []>} : vector<96x32xf32>, vector<32x128xf32>, vector<96x128xf32> -> vector<96x128xf32>
    %214 = vector.extract_strided_slice %212 {offsets = [0, 0], sizes = [32, 128], strides = [1, 1]} : vector<96x128xf32> to vector<32x128xf32>
    %215 = vector.extract_strided_slice %213 {offsets = [0, 0], sizes = [32, 128], strides = [1, 1]} : vector<96x128xf32> to vector<32x128xf32>
    %216 = arith.addf %214, %215 : vector<32x128xf32>
    %217 = arith.negf %216 : vector<32x128xf32>
    %218 = math.exp %217 : vector<32x128xf32>
    %cst_62 = arith.constant 1.000000e+00 : f32
    %219 = vector.broadcast %cst_62 : f32 to vector<32x128xf32>
    %220 = arith.addf %219, %218 : vector<32x128xf32>
    %221 = arith.divf %219, %220 : vector<32x128xf32>
    %222 = vector.extract_strided_slice %212 {offsets = [32, 0], sizes = [32, 128], strides = [1, 1]} : vector<96x128xf32> to vector<32x128xf32>
    %223 = vector.extract_strided_slice %213 {offsets = [32, 0], sizes = [32, 128], strides = [1, 1]} : vector<96x128xf32> to vector<32x128xf32>
    %224 = arith.addf %222, %223 : vector<32x128xf32>
    %225 = arith.negf %224 : vector<32x128xf32>
    %226 = math.exp %225 : vector<32x128xf32>
    %cst_63 = arith.constant 1.000000e+00 : f32
    %227 = vector.broadcast %cst_63 : f32 to vector<32x128xf32>
    %228 = arith.addf %227, %226 : vector<32x128xf32>
    %229 = arith.divf %227, %228 : vector<32x128xf32>
    %230 = vector.extract_strided_slice %212 {offsets = [64, 0], sizes = [32, 128], strides = [1, 1]} : vector<96x128xf32> to vector<32x128xf32>
    %231 = vector.extract_strided_slice %213 {offsets = [64, 0], sizes = [32, 128], strides = [1, 1]} : vector<96x128xf32> to vector<32x128xf32>
    %232 = arith.mulf %221, %231 : vector<32x128xf32>
    %233 = arith.addf %230, %232 : vector<32x128xf32>
    %234 = math.tanh %233 : vector<32x128xf32>
    %cst_64 = arith.constant 1.000000e+00 : f32
    %235 = vector.broadcast %cst_64 : f32 to vector<32x128xf32>
    %236 = arith.subf %235, %229 : vector<32x128xf32>
    %237 = arith.mulf %236, %234 : vector<32x128xf32>
    %238 = arith.mulf %229, %210 : vector<32x128xf32>
    %239 = arith.addf %237, %238 : vector<32x128xf32>
    %c0_65 = arith.constant 0 : index
    %c896_66 = arith.constant 896 : index
    %240 = vector.load %arg9[%c0_65, %c896_66] : memref<32x1024xf32, #tpu.memory_space<vmem>>, vector<32x128xf32>
    tpu.vector_store %arg9[%c0_65, %c896_66], %239 {strides = array<i32>} : memref<32x1024xf32, #tpu.memory_space<vmem>>, vector<32x128xf32>,
    %c0_67 = arith.constant 0 : index
    %c0_68 = arith.constant 0 : index
    %241 = vector.load %arg9[%c0_67, %c0_68] : memref<32x1024xf32, #tpu.memory_space<vmem>>, vector<32x1024xf32>
    %c0_69 = arith.constant 0 : index
    %c0_70 = arith.constant 0 : index
    %c0_71 = arith.constant 0 : index
    %242 = vector.load %arg4[%c0_69, %c0_70, %c0_71] : memref<1x96x32xf32, #tpu.memory_space<vmem>>, vector<1x96x32xf32>
    %243 = vector.shape_cast %242 : vector<1x96x32xf32> to vector<96x32xf32>
    %cst_72 = arith.constant dense<0.000000e+00> : vector<96x1024xf32>
    %244 = tpu.matmul %243, %241, %cst_72 {dimension_numbers = #tpu.dot_dimension_numbers<[1], [0], [0], [1], [0, 0, 1, 1], [], []>} : vector<96x32xf32>, vector<32x1024xf32>, vector<96x1024xf32> -> vector<96x1024xf32>
    %cst_73 = arith.constant 1.000000e+00 : f32
    %245 = vector.broadcast %cst_73 : f32 to vector<96x1024xf32>
    %246 = arith.addf %244, %245 : vector<96x1024xf32>
    %c0_74 = arith.constant 0 : index
    %c0_75 = arith.constant 0 : index
    %247 = vector.load %arg10[%c0_74, %c0_75] : memref<96x1024xf32, #tpu.memory_space<vmem>>, vector<96x1024xf32>
    tpu.vector_store %arg10[%c0_74, %c0_75], %246 {strides = array<i32>} : memref<96x1024xf32, #tpu.memory_space<vmem>>, vector<96x1024xf32>,
    %c1 = arith.constant 1 : index
    %c0_76 = arith.constant 0 : index
    %c0_77 = arith.constant 0 : index
    %248 = vector.load %arg5[%c1, %c0_76, %c0_77] : memref<2x96x32xf32, #tpu.memory_space<vmem>>, vector<1x96x32xf32>
    %249 = vector.shape_cast %248 : vector<1x96x32xf32> to vector<96x32xf32>
    %cst_78 = arith.constant 0.000000e+00 : f32
    %250 = vector.broadcast %cst_78 : f32 to vector<32x128xf32>
    %c0_79 = arith.constant 0 : index
    %c0_80 = arith.constant 0 : index
    %251 = vector.load %arg10[%c0_79, %c0_80] : memref<96x1024xf32, #tpu.memory_space<vmem>>, vector<96x128xf32>
    %cst_81 = arith.constant dense<0.000000e+00> : vector<96x128xf32>
    %252 = tpu.matmul %249, %250, %cst_81 {dimension_numbers = #tpu.dot_dimension_numbers<[1], [0], [0], [1], [0, 0, 1, 1], [], []>} : vector<96x32xf32>, vector<32x128xf32>, vector<96x128xf32> -> vector<96x128xf32>
    %253 = vector.extract_strided_slice %251 {offsets = [0, 0], sizes = [32, 128], strides = [1, 1]} : vector<96x128xf32> to vector<32x128xf32>
    %254 = vector.extract_strided_slice %252 {offsets = [0, 0], sizes = [32, 128], strides = [1, 1]} : vector<96x128xf32> to vector<32x128xf32>
    %255 = arith.addf %253, %254 : vector<32x128xf32>
    %256 = arith.negf %255 : vector<32x128xf32>
    %257 = math.exp %256 : vector<32x128xf32>
    %cst_82 = arith.constant 1.000000e+00 : f32
    %258 = vector.broadcast %cst_82 : f32 to vector<32x128xf32>
    %259 = arith.addf %258, %257 : vector<32x128xf32>
    %260 = arith.divf %258, %259 : vector<32x128xf32>
    %261 = vector.extract_strided_slice %251 {offsets = [32, 0], sizes = [32, 128], strides = [1, 1]} : vector<96x128xf32> to vector<32x128xf32>
    %262 = vector.extract_strided_slice %252 {offsets = [32, 0], sizes = [32, 128], strides = [1, 1]} : vector<96x128xf32> to vector<32x128xf32>
    %263 = arith.addf %261, %262 : vector<32x128xf32>
    %264 = arith.negf %263 : vector<32x128xf32>
    %265 = math.exp %264 : vector<32x128xf32>
    %cst_83 = arith.constant 1.000000e+00 : f32
    %266 = vector.broadcast %cst_83 : f32 to vector<32x128xf32>
    %267 = arith.addf %266, %265 : vector<32x128xf32>
    %268 = arith.divf %266, %267 : vector<32x128xf32>
    %269 = vector.extract_strided_slice %251 {offsets = [64, 0], sizes = [32, 128], strides = [1, 1]} : vector<96x128xf32> to vector<32x128xf32>
    %270 = vector.extract_strided_slice %252 {offsets = [64, 0], sizes = [32, 128], strides = [1, 1]} : vector<96x128xf32> to vector<32x128xf32>
    %271 = arith.mulf %260, %270 : vector<32x128xf32>
    %272 = arith.addf %269, %271 : vector<32x128xf32>
    %273 = math.tanh %272 : vector<32x128xf32>
    %cst_84 = arith.constant 1.000000e+00 : f32
    %274 = vector.broadcast %cst_84 : f32 to vector<32x128xf32>
    %275 = arith.subf %274, %268 : vector<32x128xf32>
    %276 = arith.mulf %275, %273 : vector<32x128xf32>
    %277 = arith.mulf %268, %250 : vector<32x128xf32>
    %278 = arith.addf %276, %277 : vector<32x128xf32>
    %c0_85 = arith.constant 0 : index
    %c0_86 = arith.constant 0 : index
    %279 = vector.load %arg9[%c0_85, %c0_86] : memref<32x1024xf32, #tpu.memory_space<vmem>>, vector<32x128xf32>
    tpu.vector_store %arg9[%c0_85, %c0_86], %278 {strides = array<i32>} : memref<32x1024xf32, #tpu.memory_space<vmem>>, vector<32x128xf32>,
    %c0_87 = arith.constant 0 : index
    %c128_88 = arith.constant 128 : index
    %280 = vector.load %arg10[%c0_87, %c128_88] : memref<96x1024xf32, #tpu.memory_space<vmem>>, vector<96x128xf32>
    %cst_89 = arith.constant dense<0.000000e+00> : vector<96x128xf32>
    %281 = tpu.matmul %249, %278, %cst_89 {dimension_numbers = #tpu.dot_dimension_numbers<[1], [0], [0], [1], [0, 0, 1, 1], [], []>} : vector<96x32xf32>, vector<32x128xf32>, vector<96x128xf32> -> vector<96x128xf32>
    %282 = vector.extract_strided_slice %280 {offsets = [0, 0], sizes = [32, 128], strides = [1, 1]} : vector<96x128xf32> to vector<32x128xf32>
    %283 = vector.extract_strided_slice %281 {offsets = [0, 0], sizes = [32, 128], strides = [1, 1]} : vector<96x128xf32> to vector<32x128xf32>
    %284 = arith.addf %282, %283 : vector<32x128xf32>
    %285 = arith.negf %284 : vector<32x128xf32>
    %286 = math.exp %285 : vector<32x128xf32>
    %cst_90 = arith.constant 1.000000e+00 : f32
    %287 = vector.broadcast %cst_90 : f32 to vector<32x128xf32>
    %288 = arith.addf %287, %286 : vector<32x128xf32>
    %289 = arith.divf %287, %288 : vector<32x128xf32>
    %290 = vector.extract_strided_slice %280 {offsets = [32, 0], sizes = [32, 128], strides = [1, 1]} : vector<96x128xf32> to vector<32x128xf32>
    %291 = vector.extract_strided_slice %281 {offsets = [32, 0], sizes = [32, 128], strides = [1, 1]} : vector<96x128xf32> to vector<32x128xf32>
    %292 = arith.addf %290, %291 : vector<32x128xf32>
    %293 = arith.negf %292 : vector<32x128xf32>
    %294 = math.exp %293 : vector<32x128xf32>
    %cst_91 = arith.constant 1.000000e+00 : f32
    %295 = vector.broadcast %cst_91 : f32 to vector<32x128xf32>
    %296 = arith.addf %295, %294 : vector<32x128xf32>
    %297 = arith.divf %295, %296 : vector<32x128xf32>
    %298 = vector.extract_strided_slice %280 {offsets = [64, 0], sizes = [32, 128], strides = [1, 1]} : vector<96x128xf32> to vector<32x128xf32>
    %299 = vector.extract_strided_slice %281 {offsets = [64, 0], sizes = [32, 128], strides = [1, 1]} : vector<96x128xf32> to vector<32x128xf32>
    %300 = arith.mulf %289, %299 : vector<32x128xf32>
    %301 = arith.addf %298, %300 : vector<32x128xf32>
    %302 = math.tanh %301 : vector<32x128xf32>
    %cst_92 = arith.constant 1.000000e+00 : f32
    %303 = vector.broadcast %cst_92 : f32 to vector<32x128xf32>
    %304 = arith.subf %303, %297 : vector<32x128xf32>
    %305 = arith.mulf %304, %302 : vector<32x128xf32>
    %306 = arith.mulf %297, %278 : vector<32x128xf32>
    %307 = arith.addf %305, %306 : vector<32x128xf32>
    %c0_93 = arith.constant 0 : index
    %c128_94 = arith.constant 128 : index
    %308 = vector.load %arg9[%c0_93, %c128_94] : memref<32x1024xf32, #tpu.memory_space<vmem>>, vector<32x128xf32>
    tpu.vector_store %arg9[%c0_93, %c128_94], %307 {strides = array<i32>} : memref<32x1024xf32, #tpu.memory_space<vmem>>, vector<32x128xf32>,
    %c0_95 = arith.constant 0 : index
    %c256_96 = arith.constant 256 : index
    %309 = vector.load %arg10[%c0_95, %c256_96] : memref<96x1024xf32, #tpu.memory_space<vmem>>, vector<96x128xf32>
    %cst_97 = arith.constant dense<0.000000e+00> : vector<96x128xf32>
    %310 = tpu.matmul %249, %307, %cst_97 {dimension_numbers = #tpu.dot_dimension_numbers<[1], [0], [0], [1], [0, 0, 1, 1], [], []>} : vector<96x32xf32>, vector<32x128xf32>, vector<96x128xf32> -> vector<96x128xf32>
    %311 = vector.extract_strided_slice %309 {offsets = [0, 0], sizes = [32, 128], strides = [1, 1]} : vector<96x128xf32> to vector<32x128xf32>
    %312 = vector.extract_strided_slice %310 {offsets = [0, 0], sizes = [32, 128], strides = [1, 1]} : vector<96x128xf32> to vector<32x128xf32>
    %313 = arith.addf %311, %312 : vector<32x128xf32>
    %314 = arith.negf %313 : vector<32x128xf32>
    %315 = math.exp %314 : vector<32x128xf32>
    %cst_98 = arith.constant 1.000000e+00 : f32
    %316 = vector.broadcast %cst_98 : f32 to vector<32x128xf32>
    %317 = arith.addf %316, %315 : vector<32x128xf32>
    %318 = arith.divf %316, %317 : vector<32x128xf32>
    %319 = vector.extract_strided_slice %309 {offsets = [32, 0], sizes = [32, 128], strides = [1, 1]} : vector<96x128xf32> to vector<32x128xf32>
    %320 = vector.extract_strided_slice %310 {offsets = [32, 0], sizes = [32, 128], strides = [1, 1]} : vector<96x128xf32> to vector<32x128xf32>
    %321 = arith.addf %319, %320 : vector<32x128xf32>
    %322 = arith.negf %321 : vector<32x128xf32>
    %323 = math.exp %322 : vector<32x128xf32>
    %cst_99 = arith.constant 1.000000e+00 : f32
    %324 = vector.broadcast %cst_99 : f32 to vector<32x128xf32>
    %325 = arith.addf %324, %323 : vector<32x128xf32>
    %326 = arith.divf %324, %325 : vector<32x128xf32>
    %327 = vector.extract_strided_slice %309 {offsets = [64, 0], sizes = [32, 128], strides = [1, 1]} : vector<96x128xf32> to vector<32x128xf32>
    %328 = vector.extract_strided_slice %310 {offsets = [64, 0], sizes = [32, 128], strides = [1, 1]} : vector<96x128xf32> to vector<32x128xf32>
    %329 = arith.mulf %318, %328 : vector<32x128xf32>
    %330 = arith.addf %327, %329 : vector<32x128xf32>
    %331 = math.tanh %330 : vector<32x128xf32>
    %cst_100 = arith.constant 1.000000e+00 : f32
    %332 = vector.broadcast %cst_100 : f32 to vector<32x128xf32>
    %333 = arith.subf %332, %326 : vector<32x128xf32>
    %334 = arith.mulf %333, %331 : vector<32x128xf32>
    %335 = arith.mulf %326, %307 : vector<32x128xf32>
    %336 = arith.addf %334, %335 : vector<32x128xf32>
    %c0_101 = arith.constant 0 : index
    %c256_102 = arith.constant 256 : index
    %337 = vector.load %arg9[%c0_101, %c256_102] : memref<32x1024xf32, #tpu.memory_space<vmem>>, vector<32x128xf32>
    tpu.vector_store %arg9[%c0_101, %c256_102], %336 {strides = array<i32>} : memref<32x1024xf32, #tpu.memory_space<vmem>>, vector<32x128xf32>,
    %c0_103 = arith.constant 0 : index
    %c384_104 = arith.constant 384 : index
    %338 = vector.load %arg10[%c0_103, %c384_104] : memref<96x1024xf32, #tpu.memory_space<vmem>>, vector<96x128xf32>
    %cst_105 = arith.constant dense<0.000000e+00> : vector<96x128xf32>
    %339 = tpu.matmul %249, %336, %cst_105 {dimension_numbers = #tpu.dot_dimension_numbers<[1], [0], [0], [1], [0, 0, 1, 1], [], []>} : vector<96x32xf32>, vector<32x128xf32>, vector<96x128xf32> -> vector<96x128xf32>
    %340 = vector.extract_strided_slice %338 {offsets = [0, 0], sizes = [32, 128], strides = [1, 1]} : vector<96x128xf32> to vector<32x128xf32>
    %341 = vector.extract_strided_slice %339 {offsets = [0, 0], sizes = [32, 128], strides = [1, 1]} : vector<96x128xf32> to vector<32x128xf32>
    %342 = arith.addf %340, %341 : vector<32x128xf32>
    %343 = arith.negf %342 : vector<32x128xf32>
    %344 = math.exp %343 : vector<32x128xf32>
    %cst_106 = arith.constant 1.000000e+00 : f32
    %345 = vector.broadcast %cst_106 : f32 to vector<32x128xf32>
    %346 = arith.addf %345, %344 : vector<32x128xf32>
    %347 = arith.divf %345, %346 : vector<32x128xf32>
    %348 = vector.extract_strided_slice %338 {offsets = [32, 0], sizes = [32, 128], strides = [1, 1]} : vector<96x128xf32> to vector<32x128xf32>
    %349 = vector.extract_strided_slice %339 {offsets = [32, 0], sizes = [32, 128], strides = [1, 1]} : vector<96x128xf32> to vector<32x128xf32>
    %350 = arith.addf %348, %349 : vector<32x128xf32>
    %351 = arith.negf %350 : vector<32x128xf32>
    %352 = math.exp %351 : vector<32x128xf32>
    %cst_107 = arith.constant 1.000000e+00 : f32
    %353 = vector.broadcast %cst_107 : f32 to vector<32x128xf32>
    %354 = arith.addf %353, %352 : vector<32x128xf32>
    %355 = arith.divf %353, %354 : vector<32x128xf32>
    %356 = vector.extract_strided_slice %338 {offsets = [64, 0], sizes = [32, 128], strides = [1, 1]} : vector<96x128xf32> to vector<32x128xf32>
    %357 = vector.extract_strided_slice %339 {offsets = [64, 0], sizes = [32, 128], strides = [1, 1]} : vector<96x128xf32> to vector<32x128xf32>
    %358 = arith.mulf %347, %357 : vector<32x128xf32>
    %359 = arith.addf %356, %358 : vector<32x128xf32>
    %360 = math.tanh %359 : vector<32x128xf32>
    %cst_108 = arith.constant 1.000000e+00 : f32
    %361 = vector.broadcast %cst_108 : f32 to vector<32x128xf32>
    %362 = arith.subf %361, %355 : vector<32x128xf32>
    %363 = arith.mulf %362, %360 : vector<32x128xf32>
    %364 = arith.mulf %355, %336 : vector<32x128xf32>
    %365 = arith.addf %363, %364 : vector<32x128xf32>
    %c0_109 = arith.constant 0 : index
    %c384_110 = arith.constant 384 : index
    %366 = vector.load %arg9[%c0_109, %c384_110] : memref<32x1024xf32, #tpu.memory_space<vmem>>, vector<32x128xf32>
    tpu.vector_store %arg9[%c0_109, %c384_110], %365 {strides = array<i32>} : memref<32x1024xf32, #tpu.memory_space<vmem>>, vector<32x128xf32>,
    %c0_111 = arith.constant 0 : index
    %c512_112 = arith.constant 512 : index
    %367 = vector.load %arg10[%c0_111, %c512_112] : memref<96x1024xf32, #tpu.memory_space<vmem>>, vector<96x128xf32>
    %cst_113 = arith.constant dense<0.000000e+00> : vector<96x128xf32>
    %368 = tpu.matmul %249, %365, %cst_113 {dimension_numbers = #tpu.dot_dimension_numbers<[1], [0], [0], [1], [0, 0, 1, 1], [], []>} : vector<96x32xf32>, vector<32x128xf32>, vector<96x128xf32> -> vector<96x128xf32>
    %369 = vector.extract_strided_slice %367 {offsets = [0, 0], sizes = [32, 128], strides = [1, 1]} : vector<96x128xf32> to vector<32x128xf32>
    %370 = vector.extract_strided_slice %368 {offsets = [0, 0], sizes = [32, 128], strides = [1, 1]} : vector<96x128xf32> to vector<32x128xf32>
    %371 = arith.addf %369, %370 : vector<32x128xf32>
    %372 = arith.negf %371 : vector<32x128xf32>
    %373 = math.exp %372 : vector<32x128xf32>
    %cst_114 = arith.constant 1.000000e+00 : f32
    %374 = vector.broadcast %cst_114 : f32 to vector<32x128xf32>
    %375 = arith.addf %374, %373 : vector<32x128xf32>
    %376 = arith.divf %374, %375 : vector<32x128xf32>
    %377 = vector.extract_strided_slice %367 {offsets = [32, 0], sizes = [32, 128], strides = [1, 1]} : vector<96x128xf32> to vector<32x128xf32>
    %378 = vector.extract_strided_slice %368 {offsets = [32, 0], sizes = [32, 128], strides = [1, 1]} : vector<96x128xf32> to vector<32x128xf32>
    %379 = arith.addf %377, %378 : vector<32x128xf32>
    %380 = arith.negf %379 : vector<32x128xf32>
    %381 = math.exp %380 : vector<32x128xf32>
    %cst_115 = arith.constant 1.000000e+00 : f32
    %382 = vector.broadcast %cst_115 : f32 to vector<32x128xf32>
    %383 = arith.addf %382, %381 : vector<32x128xf32>
    %384 = arith.divf %382, %383 : vector<32x128xf32>
    %385 = vector.extract_strided_slice %367 {offsets = [64, 0], sizes = [32, 128], strides = [1, 1]} : vector<96x128xf32> to vector<32x128xf32>
    %386 = vector.extract_strided_slice %368 {offsets = [64, 0], sizes = [32, 128], strides = [1, 1]} : vector<96x128xf32> to vector<32x128xf32>
    %387 = arith.mulf %376, %386 : vector<32x128xf32>
    %388 = arith.addf %385, %387 : vector<32x128xf32>
    %389 = math.tanh %388 : vector<32x128xf32>
    %cst_116 = arith.constant 1.000000e+00 : f32
    %390 = vector.broadcast %cst_116 : f32 to vector<32x128xf32>
    %391 = arith.subf %390, %384 : vector<32x128xf32>
    %392 = arith.mulf %391, %389 : vector<32x128xf32>
    %393 = arith.mulf %384, %365 : vector<32x128xf32>
    %394 = arith.addf %392, %393 : vector<32x128xf32>
    %c0_117 = arith.constant 0 : index
    %c512_118 = arith.constant 512 : index
    %395 = vector.load %arg9[%c0_117, %c512_118] : memref<32x1024xf32, #tpu.memory_space<vmem>>, vector<32x128xf32>
    tpu.vector_store %arg9[%c0_117, %c512_118], %394 {strides = array<i32>} : memref<32x1024xf32, #tpu.memory_space<vmem>>, vector<32x128xf32>,
    %c0_119 = arith.constant 0 : index
    %c640_120 = arith.constant 640 : index
    %396 = vector.load %arg10[%c0_119, %c640_120] : memref<96x1024xf32, #tpu.memory_space<vmem>>, vector<96x128xf32>
    %cst_121 = arith.constant dense<0.000000e+00> : vector<96x128xf32>
    %397 = tpu.matmul %249, %394, %cst_121 {dimension_numbers = #tpu.dot_dimension_numbers<[1], [0], [0], [1], [0, 0, 1, 1], [], []>} : vector<96x32xf32>, vector<32x128xf32>, vector<96x128xf32> -> vector<96x128xf32>
    %398 = vector.extract_strided_slice %396 {offsets = [0, 0], sizes = [32, 128], strides = [1, 1]} : vector<96x128xf32> to vector<32x128xf32>
    %399 = vector.extract_strided_slice %397 {offsets = [0, 0], sizes = [32, 128], strides = [1, 1]} : vector<96x128xf32> to vector<32x128xf32>
    %400 = arith.addf %398, %399 : vector<32x128xf32>
    %401 = arith.negf %400 : vector<32x128xf32>
    %402 = math.exp %401 : vector<32x128xf32>
    %cst_122 = arith.constant 1.000000e+00 : f32
    %403 = vector.broadcast %cst_122 : f32 to vector<32x128xf32>
    %404 = arith.addf %403, %402 : vector<32x128xf32>
    %405 = arith.divf %403, %404 : vector<32x128xf32>
    %406 = vector.extract_strided_slice %396 {offsets = [32, 0], sizes = [32, 128], strides = [1, 1]} : vector<96x128xf32> to vector<32x128xf32>
    %407 = vector.extract_strided_slice %397 {offsets = [32, 0], sizes = [32, 128], strides = [1, 1]} : vector<96x128xf32> to vector<32x128xf32>
    %408 = arith.addf %406, %407 : vector<32x128xf32>
    %409 = arith.negf %408 : vector<32x128xf32>
    %410 = math.exp %409 : vector<32x128xf32>
    %cst_123 = arith.constant 1.000000e+00 : f32
    %411 = vector.broadcast %cst_123 : f32 to vector<32x128xf32>
    %412 = arith.addf %411, %410 : vector<32x128xf32>
    %413 = arith.divf %411, %412 : vector<32x128xf32>
    %414 = vector.extract_strided_slice %396 {offsets = [64, 0], sizes = [32, 128], strides = [1, 1]} : vector<96x128xf32> to vector<32x128xf32>
    %415 = vector.extract_strided_slice %397 {offsets = [64, 0], sizes = [32, 128], strides = [1, 1]} : vector<96x128xf32> to vector<32x128xf32>
    %416 = arith.mulf %405, %415 : vector<32x128xf32>
    %417 = arith.addf %414, %416 : vector<32x128xf32>
    %418 = math.tanh %417 : vector<32x128xf32>
    %cst_124 = arith.constant 1.000000e+00 : f32
    %419 = vector.broadcast %cst_124 : f32 to vector<32x128xf32>
    %420 = arith.subf %419, %413 : vector<32x128xf32>
    %421 = arith.mulf %420, %418 : vector<32x128xf32>
    %422 = arith.mulf %413, %394 : vector<32x128xf32>
    %423 = arith.addf %421, %422 : vector<32x128xf32>
    %c0_125 = arith.constant 0 : index
    %c640_126 = arith.constant 640 : index
    %424 = vector.load %arg9[%c0_125, %c640_126] : memref<32x1024xf32, #tpu.memory_space<vmem>>, vector<32x128xf32>
    tpu.vector_store %arg9[%c0_125, %c640_126], %423 {strides = array<i32>} : memref<32x1024xf32, #tpu.memory_space<vmem>>, vector<32x128xf32>,
    %c0_127 = arith.constant 0 : index
    %c768_128 = arith.constant 768 : index
    %425 = vector.load %arg10[%c0_127, %c768_128] : memref<96x1024xf32, #tpu.memory_space<vmem>>, vector<96x128xf32>
    %cst_129 = arith.constant dense<0.000000e+00> : vector<96x128xf32>
    %426 = tpu.matmul %249, %423, %cst_129 {dimension_numbers = #tpu.dot_dimension_numbers<[1], [0], [0], [1], [0, 0, 1, 1], [], []>} : vector<96x32xf32>, vector<32x128xf32>, vector<96x128xf32> -> vector<96x128xf32>
    %427 = vector.extract_strided_slice %425 {offsets = [0, 0], sizes = [32, 128], strides = [1, 1]} : vector<96x128xf32> to vector<32x128xf32>
    %428 = vector.extract_strided_slice %426 {offsets = [0, 0], sizes = [32, 128], strides = [1, 1]} : vector<96x128xf32> to vector<32x128xf32>
    %429 = arith.addf %427, %428 : vector<32x128xf32>
    %430 = arith.negf %429 : vector<32x128xf32>
    %431 = math.exp %430 : vector<32x128xf32>
    %cst_130 = arith.constant 1.000000e+00 : f32
    %432 = vector.broadcast %cst_130 : f32 to vector<32x128xf32>
    %433 = arith.addf %432, %431 : vector<32x128xf32>
    %434 = arith.divf %432, %433 : vector<32x128xf32>
    %435 = vector.extract_strided_slice %425 {offsets = [32, 0], sizes = [32, 128], strides = [1, 1]} : vector<96x128xf32> to vector<32x128xf32>
    %436 = vector.extract_strided_slice %426 {offsets = [32, 0], sizes = [32, 128], strides = [1, 1]} : vector<96x128xf32> to vector<32x128xf32>
    %437 = arith.addf %435, %436 : vector<32x128xf32>
    %438 = arith.negf %437 : vector<32x128xf32>
    %439 = math.exp %438 : vector<32x128xf32>
    %cst_131 = arith.constant 1.000000e+00 : f32
    %440 = vector.broadcast %cst_131 : f32 to vector<32x128xf32>
    %441 = arith.addf %440, %439 : vector<32x128xf32>
    %442 = arith.divf %440, %441 : vector<32x128xf32>
    %443 = vector.extract_strided_slice %425 {offsets = [64, 0], sizes = [32, 128], strides = [1, 1]} : vector<96x128xf32> to vector<32x128xf32>
    %444 = vector.extract_strided_slice %426 {offsets = [64, 0], sizes = [32, 128], strides = [1, 1]} : vector<96x128xf32> to vector<32x128xf32>
    %445 = arith.mulf %434, %444 : vector<32x128xf32>
    %446 = arith.addf %443, %445 : vector<32x128xf32>
    %447 = math.tanh %446 : vector<32x128xf32>
    %cst_132 = arith.constant 1.000000e+00 : f32
    %448 = vector.broadcast %cst_132 : f32 to vector<32x128xf32>
    %449 = arith.subf %448, %442 : vector<32x128xf32>
    %450 = arith.mulf %449, %447 : vector<32x128xf32>
    %451 = arith.mulf %442, %423 : vector<32x128xf32>
    %452 = arith.addf %450, %451 : vector<32x128xf32>
    %c0_133 = arith.constant 0 : index
    %c768_134 = arith.constant 768 : index
    %453 = vector.load %arg9[%c0_133, %c768_134] : memref<32x1024xf32, #tpu.memory_space<vmem>>, vector<32x128xf32>
    tpu.vector_store %arg9[%c0_133, %c768_134], %452 {strides = array<i32>} : memref<32x1024xf32, #tpu.memory_space<vmem>>, vector<32x128xf32>,
    %c0_135 = arith.constant 0 : index
    %c896_136 = arith.constant 896 : index
    %454 = vector.load %arg10[%c0_135, %c896_136] : memref<96x1024xf32, #tpu.memory_space<vmem>>, vector<96x128xf32>
    %cst_137 = arith.constant dense<0.000000e+00> : vector<96x128xf32>
    %455 = tpu.matmul %249, %452, %cst_137 {dimension_numbers = #tpu.dot_dimension_numbers<[1], [0], [0], [1], [0, 0, 1, 1], [], []>} : vector<96x32xf32>, vector<32x128xf32>, vector<96x128xf32> -> vector<96x128xf32>
    %456 = vector.extract_strided_slice %454 {offsets = [0, 0], sizes = [32, 128], strides = [1, 1]} : vector<96x128xf32> to vector<32x128xf32>
    %457 = vector.extract_strided_slice %455 {offsets = [0, 0], sizes = [32, 128], strides = [1, 1]} : vector<96x128xf32> to vector<32x128xf32>
    %458 = arith.addf %456, %457 : vector<32x128xf32>
    %459 = arith.negf %458 : vector<32x128xf32>
    %460 = math.exp %459 : vector<32x128xf32>
    %cst_138 = arith.constant 1.000000e+00 : f32
    %461 = vector.broadcast %cst_138 : f32 to vector<32x128xf32>
    %462 = arith.addf %461, %460 : vector<32x128xf32>
    %463 = arith.divf %461, %462 : vector<32x128xf32>
    %464 = vector.extract_strided_slice %454 {offsets = [32, 0], sizes = [32, 128], strides = [1, 1]} : vector<96x128xf32> to vector<32x128xf32>
    %465 = vector.extract_strided_slice %455 {offsets = [32, 0], sizes = [32, 128], strides = [1, 1]} : vector<96x128xf32> to vector<32x128xf32>
    %466 = arith.addf %464, %465 : vector<32x128xf32>
    %467 = arith.negf %466 : vector<32x128xf32>
    %468 = math.exp %467 : vector<32x128xf32>
    %cst_139 = arith.constant 1.000000e+00 : f32
    %469 = vector.broadcast %cst_139 : f32 to vector<32x128xf32>
    %470 = arith.addf %469, %468 : vector<32x128xf32>
    %471 = arith.divf %469, %470 : vector<32x128xf32>
    %472 = vector.extract_strided_slice %454 {offsets = [64, 0], sizes = [32, 128], strides = [1, 1]} : vector<96x128xf32> to vector<32x128xf32>
    %473 = vector.extract_strided_slice %455 {offsets = [64, 0], sizes = [32, 128], strides = [1, 1]} : vector<96x128xf32> to vector<32x128xf32>
    %474 = arith.mulf %463, %473 : vector<32x128xf32>
    %475 = arith.addf %472, %474 : vector<32x128xf32>
    %476 = math.tanh %475 : vector<32x128xf32>
    %cst_140 = arith.constant 1.000000e+00 : f32
    %477 = vector.broadcast %cst_140 : f32 to vector<32x128xf32>
    %478 = arith.subf %477, %471 : vector<32x128xf32>
    %479 = arith.mulf %478, %476 : vector<32x128xf32>
    %480 = arith.mulf %471, %452 : vector<32x128xf32>
    %481 = arith.addf %479, %480 : vector<32x128xf32>
    %c0_141 = arith.constant 0 : index
    %c896_142 = arith.constant 896 : index
    %482 = vector.load %arg9[%c0_141, %c896_142] : memref<32x1024xf32, #tpu.memory_space<vmem>>, vector<32x128xf32>
    tpu.vector_store %arg9[%c0_141, %c896_142], %481 {strides = array<i32>} : memref<32x1024xf32, #tpu.memory_space<vmem>>, vector<32x128xf32>,
    %c0_143 = arith.constant 0 : index
    %c0_144 = arith.constant 0 : index
    %483 = vector.load %arg2[%c0_143, %c0_144] : memref<1x1024xi32, #tpu.memory_space<vmem>>, vector<1x1024xi32>
    %c0_i32 = arith.constant 0 : i32
    %484 = vector.broadcast %c0_i32 : i32 to vector<1x1024xi32>
    %485 = arith.cmpi sgt, %483, %484 : vector<1x1024xi32>
    %c0_145 = arith.constant 0 : index
    %c0_146 = arith.constant 0 : index
    %486 = vector.load %arg9[%c0_145, %c0_146] : memref<32x1024xf32, #tpu.memory_space<vmem>>, vector<32x1024xf32>
    %cst_147 = arith.constant -1.000000e+00 : f32
    %487 = vector.shape_cast %485 : vector<1x1024xi1> to vector<1x1024xi1>
    %488 = vector.broadcast %487 : vector<1x1024xi1> to vector<32x1024xi1>
    %489 = vector.broadcast %cst_147 : f32 to vector<32x1024xf32>
    %490 = arith.select %488, %486, %489 : vector<32x1024xi1>, vector<32x1024xf32>
    %c0_148 = arith.constant 0 : index
    %c0_149 = arith.constant 0 : index
    %491 = vector.load %arg9[%c0_148, %c0_149] : memref<32x1024xf32, #tpu.memory_space<vmem>>, vector<32x1024xf32>
    tpu.vector_store %arg9[%c0_148, %c0_149], %490 {strides = array<i32>} : memref<32x1024xf32, #tpu.memory_space<vmem>>, vector<32x1024xf32>,
    %c0_150 = arith.constant 0 : index
    %c0_151 = arith.constant 0 : index
    %492 = vector.load %arg6[%c0_150, %c0_151] : memref<32x32xf32, #tpu.memory_space<vmem>>, vector<32x32xf32>
    %c0_152 = arith.constant 0 : index
    %c0_153 = arith.constant 0 : index
    %493 = vector.load %arg9[%c0_152, %c0_153] : memref<32x1024xf32, #tpu.memory_space<vmem>>, vector<32x1024xf32>
    %cst_154 = arith.constant dense<0.000000e+00> : vector<32x1024xf32>
    %494 = tpu.matmul %492, %493, %cst_154 {dimension_numbers = #tpu.dot_dimension_numbers<[1], [0], [0], [1], [0, 0, 1, 1], [], []>} : vector<32x32xf32>, vector<32x1024xf32>, vector<32x1024xf32> -> vector<32x1024xf32>
    %c0_155 = arith.constant 0 : index
    %c0_156 = arith.constant 0 : index
    %495 = vector.load %arg7[%c0_155, %c0_156] : memref<32x1xf32, #tpu.memory_space<vmem>>, vector<32x1xf32>
    %496 = vector.broadcast %495 : vector<32x1xf32> to vector<32x1024xf32>
    %497 = arith.addf %494, %496 : vector<32x1024xf32>
    %498 = arith.negf %497 : vector<32x1024xf32>
    %499 = math.exp %498 : vector<32x1024xf32>
    %cst_157 = arith.constant 1.000000e+00 : f32
    %500 = vector.broadcast %cst_157 : f32 to vector<32x1024xf32>
    %501 = arith.addf %500, %499 : vector<32x1024xf32>
    %502 = arith.divf %500, %501 : vector<32x1024xf32>
    %c0_158 = arith.constant 0 : index
    %c0_159 = arith.constant 0 : index
    %503 = vector.load %arg8[%c0_158, %c0_159] : memref<32x1024xf32, #tpu.memory_space<vmem>>, vector<32x1024xf32>
    tpu.vector_store %arg8[%c0_158, %c0_159], %502 {strides = array<i32>} : memref<32x1024xf32, #tpu.memory_space<vmem>>, vector<32x1024xf32>,
    return
  }
  func.func @transform_0(%arg0: i32) -> (i32, i32) {
    %c0_i32 = arith.constant 0 : i32
    %c0_i32_0 = arith.constant 0 : i32
    return %c0_i32, %arg0 : i32, i32
  }
  func.func @transform_1(%arg0: i32) -> (i32, i32) {
    %c0_i32 = arith.constant 0 : i32
    %c0_i32_0 = arith.constant 0 : i32
    return %c0_i32, %arg0 : i32, i32
  }
  func.func @transform_2(%arg0: i32) -> (i32, i32) {
    %c0_i32 = arith.constant 0 : i32
    %c0_i32_0 = arith.constant 0 : i32
    %c0_i32_1 = arith.constant 0 : i32
    return %c0_i32, %c0_i32_0 : i32, i32
  }
  func.func @transform_3(%arg0: i32) -> (i32, i32, i32) {
    %c0_i32 = arith.constant 0 : i32
    %c0_i32_0 = arith.constant 0 : i32
    %c0_i32_1 = arith.constant 0 : i32
    %c0_i32_2 = arith.constant 0 : i32
    return %c0_i32, %c0_i32_0, %c0_i32_1 : i32, i32, i32
  }
  func.func @transform_4(%arg0: i32) -> (i32, i32, i32) {
    %c0_i32 = arith.constant 0 : i32
    %c0_i32_0 = arith.constant 0 : i32
    %c0_i32_1 = arith.constant 0 : i32
    %c0_i32_2 = arith.constant 0 : i32
    return %c0_i32, %c0_i32_0, %c0_i32_1 : i32, i32, i32
  }
  func.func @transform_5(%arg0: i32) -> (i32, i32) {
    %c0_i32 = arith.constant 0 : i32
    %c0_i32_0 = arith.constant 0 : i32
    %c0_i32_1 = arith.constant 0 : i32
    return %c0_i32, %c0_i32_0 : i32, i32
  }
  func.func @transform_6(%arg0: i32) -> (i32, i32) {
    %c0_i32 = arith.constant 0 : i32
    %c0_i32_0 = arith.constant 0 : i32
    %c0_i32_1 = arith.constant 0 : i32
    return %c0_i32, %c0_i32_0 : i32, i32
  }
  func.func @transform_7(%arg0: i32) -> (i32, i32) {
    %c0_i32 = arith.constant 0 : i32
    %c0_i32_0 = arith.constant 0 : i32
    return %c0_i32, %arg0 : i32, i32
  }
}

</mosaic_0001>

<bundles_post_ra>
// kernel: tpu_custom_call.1
= control target key start
LH: loop header
LB: loop body
LE: loop exit
PB: predicated region body
PF: predicated region fallthrough
CT: control target
= control target key end

     0   :  { %vm47_vm0 = vcmask 64512   ;;  %v10228_v3 = vmov 0.0   ;;  %s10220_s0 = inlined_call_operand.vmem [shape: f32[8,1024], index: 0, kind: input, shape index: {}]   ;;  %s10221_s1 = inlined_call_operand.vmem [shape: s32[1,1024], index: 1, kind: input, shape index: {}]   ;;  %s10222_s2 = inlined_call_operand.vmem [shape: f32[96,8], index: 2, kind: input, shape index: {}]   ;;  %s10223_s3 = inlined_call_operand.vmem [shape: f32[1,96,32], index: 3, kind: input, shape index: {}]   ;;  %s10224_s4 = inlined_call_operand.vmem [shape: f32[2,96,32], index: 4, kind: input, shape index: {}]   ;;  %s10225_s5 = inlined_call_operand.vmem [shape: f32[32,32], index: 5, kind: input, shape index: {}]   ;;  %s10226_s6 = inlined_call_operand.vmem [shape: f32[32,1], index: 6, kind: input, shape index: {}]   ;;  %s10227_s7 = inlined_call_operand.hbm [shape: f32[32,1024], index: 7, kind: output, shape index: {}]  }
   0x1   :  { %v28_v0 = vld [vmem:[%s10220_s0 + $0x8] sm:$0xff]  ;;  %v27_v1 = vld [vmem:[%s10220_s0] sm:$0xff]  ;;  %148 = vmatprep.mubr.f32.mxu0 %v10228_v3  ;;  %285 = vmatprep.mubr.f32.mxu1 %v10228_v3  ;;  %v8022_v7 = vld [vmem:[%s10222_s2 + $0x10] sm:$0xff] }
   0x2   :  { %v7997_v2 = vld [vmem:[%s10222_s2] sm:$0xff]  ;;  %114 = vmatprep.subr.mxu0 %v28_v0  ;;  %v8007_v4 = vld [vmem:[%s10222_s2 + $0x8] sm:$0xff] }
   0x3   :  { %115 = vmatpush1.msra.mxu0 %v27_v1  ;;  %v32_v5 = vld [vmem:[%s10220_s0 + $0x28] sm:$0xff]  ;;  %v31_v6 = vld [vmem:[%s10220_s0 + $0x20] sm:$0xff] }
   0x4   :  { %5957 = vmatmul.mubr.msk.f32.vlgmr.msra.gmra.mxu0 %vm47_vm0, %v7997_v2  ;;  %388 = vmatprep.subr.mxu0 %v32_v5 }
   0x5   :  { %154 = vmatprep.mubr.f32.mxu0 %v10228_v3  ;;  %389 = vmatpush1.msra.mxu0 %v31_v6 }
   0x6   :  { %6683 = vmatprep.subr.mxu0 %v10228_v3 }
   0x8   :  { %5958 = vmatmul.mubr.msk.f32.gmra.mxu0 %vm47_vm0, %v8007_v4 }
   0x9   :  { %160 = vmatprep.mubr.f32.mxu0 %v10228_v3 }
   0xa   :  { %12 = vsyncpa [#allocation5], 0  ;;  %v8030_v8 = vld [vmem:[%s10222_s2 + $0x18] sm:$0xff]  ;;  %v8038_v9 = vld [vmem:[%s10222_s2 + $0x20] sm:$0xff]  ;;  %vm752_vm1 = vcmask 261120  }
   0xb   :  { %v8046_v10 = vld [vmem:[%s10222_s2 + $0x28] sm:$0xff]  ;;  %v8054_v11 = vld [vmem:[%s10222_s2 + $0x30] sm:$0xff]  ;;  %v8062_v12 = vld [vmem:[%s10222_s2 + $0x38] sm:$0xff] }
   0xc   :  { %5959 = vmatmul.mubr.msk.f32.gmra.mxu0 %vm47_vm0, %v8022_v7  ;;  %v8070_v13 = vld [vmem:[%s10222_s2 + $0x40] sm:$0xff]  ;;  %v8078_v14 = vld [vmem:[%s10222_s2 + $0x48] sm:$0xff]  ;;  %v8086_v15 = vld [vmem:[%s10222_s2 + $0x50] sm:$0xff] }
   0xd   :  { %166 = vmatprep.mubr.f32.mxu0 %v10228_v3  ;;  %v8094_v16 = vld [vmem:[%s10222_s2 + $0x58] sm:$0xff]  ;;  %v8136_v17 = vld [vmem:[%s10224_s4] sm:$0xff]  ;;  %v8145_v18 = vld [vmem:[%s10224_s4 + $0x8] sm:$0xff] }
   0xe   :  { %v8150_v19 = vld [vmem:[%s10224_s4 + $0x10] sm:$0xff]  ;;  %v8159_v20 = vld [vmem:[%s10224_s4 + $0x18] sm:$0xff]  ;;  %v8164_v21 = vld [vmem:[%s10224_s4 + $0x20] sm:$0xff] }
   0xf   :  { %v8173_v22 = vld [vmem:[%s10224_s4 + $0x28] sm:$0xff]  ;;  %v8178_v23 = vld [vmem:[%s10224_s4 + $0x30] sm:$0xff]  ;;  %v8187_v24 = vld [vmem:[%s10224_s4 + $0x38] sm:$0xff] }
  0x10   :  { %5960 = vmatmul.mubr.msk.f32.gmra.mxu0 %vm47_vm0, %v8030_v8  ;;  %v8192_v25 = vld [vmem:[%s10224_s4 + $0x40] sm:$0xff]  ;;  %v8201_v26 = vld [vmem:[%s10224_s4 + $0x48] sm:$0xff]  ;;  %v8206_v27 = vld [vmem:[%s10224_s4 + $0x50] sm:$0xff] }
  0x11   :  { %172 = vmatprep.mubr.f32.mxu0 %v10228_v3  ;;  %v8215_v28 = vld [vmem:[%s10224_s4 + $0x58] sm:$0xff]  ;;  %v29_v30 = vld [vmem:[%s10220_s0 + $0x10] sm:$0xff] }
  0x12   :  { %v30_v29 = vld [vmem:[%s10220_s0 + $0x18] sm:$0xff]  ;;  %v33_v32 = vld [vmem:[%s10220_s0 + $0x30] sm:$0xff] }
  0x13   :  { %251 = vmatprep.subr.mxu1 %v30_v29  ;;  %v34_v31 = vld [vmem:[%s10220_s0 + $0x38] sm:$0xff] }
  0x14   :  { %5961 = vmatmul.mubr.msk.f32.gmra.mxu0 %vm47_vm0, %v8038_v9  ;;  %252 = vmatpush1.msra.mxu1 %v29_v30 }
  0x15   :  { %178 = vmatprep.mubr.f32.mxu0 %v10228_v3  ;;  %5969 = vmatmul.mubr.msk.f32.vlgmr.msra.gmra.mxu1 %vm47_vm0, %v7997_v2 }
  0x16   :  { %291 = vmatprep.mubr.f32.mxu1 %v10228_v3  ;;  %525 = vmatprep.subr.mxu1 %v34_v31 }
  0x17   :  { %526 = vmatpush1.msra.mxu1 %v33_v32 }
  0x18   :  { %5962 = vmatmul.mubr.msk.f32.gmra.mxu0 %vm47_vm0, %v8046_v10 }
  0x19   :  { %184 = vmatprep.mubr.f32.mxu0 %v10228_v3  ;;  %5970 = vmatmul.mubr.msk.f32.gmra.mxu1 %vm47_vm0, %v8007_v4 }
  0x1a   :  { %297 = vmatprep.mubr.f32.mxu1 %v10228_v3 }
  0x1c   :  { %5963 = vmatmul.mubr.msk.f32.gmra.mxu0 %vm47_vm0, %v8054_v11 }
  0x1d   :  { %190 = vmatprep.mubr.f32.mxu0 %v10228_v3  ;;  %5971 = vmatmul.mubr.msk.f32.gmra.mxu1 %vm47_vm0, %v8022_v7 }
  0x1e   :  { %303 = vmatprep.mubr.f32.mxu1 %v10228_v3 }
  0x20   :  { %5964 = vmatmul.mubr.msk.f32.gmra.mxu0 %vm47_vm0, %v8062_v12 }
  0x21   :  { %196 = vmatprep.mubr.f32.mxu0 %v10228_v3  ;;  %5972 = vmatmul.mubr.msk.f32.gmra.mxu1 %vm47_vm0, %v8030_v8 }
  0x22   :  { %309 = vmatprep.mubr.f32.mxu1 %v10228_v3 }
  0x24   :  { %5965 = vmatmul.mubr.msk.f32.gmra.mxu0 %vm47_vm0, %v8070_v13 }
  0x25   :  { %202 = vmatprep.mubr.f32.mxu0 %v10228_v3  ;;  %5973 = vmatmul.mubr.msk.f32.gmra.mxu1 %vm47_vm0, %v8038_v9 }
  0x26   :  { %315 = vmatprep.mubr.f32.mxu1 %v10228_v3 }
  0x28   :  { %5966 = vmatmul.mubr.msk.f32.gmra.mxu0 %vm47_vm0, %v8078_v14 }
  0x29   :  { %208 = vmatprep.mubr.f32.mxu0 %v10228_v3  ;;  %5974 = vmatmul.mubr.msk.f32.gmra.mxu1 %vm47_vm0, %v8046_v10 }
  0x2a   :  { %321 = vmatprep.mubr.f32.mxu1 %v10228_v3 }
  0x2c   :  { %5967 = vmatmul.mubr.msk.f32.gmra.mxu0 %vm47_vm0, %v8086_v15 }
  0x2d   :  { %214 = vmatprep.mubr.f32.mxu0 %v10228_v3  ;;  %5975 = vmatmul.mubr.msk.f32.gmra.mxu1 %vm47_vm0, %v8054_v11 }
  0x2e   :  { %327 = vmatprep.mubr.f32.mxu1 %v10228_v3 }
  0x30   :  { %5968 = vmatmul.mubr.msk.f32.gmra.mxu0 %vm47_vm0, %v8094_v16 }
  0x31   :  { %422 = vmatprep.mubr.f32.mxu0 %v10228_v3  ;;  %5976 = vmatmul.mubr.msk.f32.gmra.mxu1 %vm47_vm0, %v8062_v12 }
  0x32   :  { %333 = vmatprep.mubr.f32.mxu1 %v10228_v3 }
  0x34   :  { %5981 = vmatmul.mubr.msk.f32.vlgmr.msra.gmra.mxu0 %vm47_vm0, %v7997_v2 }
  0x35   :  { %428 = vmatprep.mubr.f32.mxu0 %v10228_v3  ;;  %6684 = vmatpush3.msra.mxu0 %v10228_v3 }
  0x36   :  { %5977 = vmatmul.mubr.msk.f32.gmra.mxu1 %vm47_vm0, %v8070_v13 }
  0x37   :  { %339 = vmatprep.mubr.f32.mxu1 %v10228_v3 }
  0x38   :  { %5982 = vmatmul.mubr.msk.f32.gmra.mxu0 %vm47_vm0, %v8007_v4 }
  0x39   :  { %434 = vmatprep.mubr.f32.mxu0 %v10228_v3 }
  0x3a   :  { %5978 = vmatmul.mubr.msk.f32.gmra.mxu1 %vm47_vm0, %v8078_v14 }
  0x3b   :  { %345 = vmatprep.mubr.f32.mxu1 %v10228_v3 }
  0x3c   :  { %5983 = vmatmul.mubr.msk.f32.gmra.mxu0 %vm47_vm0, %v8022_v7 }
  0x3d   :  { %440 = vmatprep.mubr.f32.mxu0 %v10228_v3 }
  0x3e   :  { %5979 = vmatmul.mubr.msk.f32.gmra.mxu1 %vm47_vm0, %v8086_v15 }
  0x3f   :  { %351 = vmatprep.mubr.f32.mxu1 %v10228_v3 }
  0x40   :  { %5984 = vmatmul.mubr.msk.f32.gmra.mxu0 %vm47_vm0, %v8030_v8 }
  0x41   :  { %446 = vmatprep.mubr.f32.mxu0 %v10228_v3 }
  0x42   :  { %5980 = vmatmul.mubr.msk.f32.gmra.mxu1 %vm47_vm0, %v8094_v16 }
  0x43   :  { %559 = vmatprep.mubr.f32.mxu1 %v10228_v3 }
  0x44   :  { %5985 = vmatmul.mubr.msk.f32.gmra.mxu0 %vm47_vm0, %v8038_v9 }
  0x45   :  { %452 = vmatprep.mubr.f32.mxu0 %v10228_v3 }
  0x46   :  { %5993 = vmatmul.mubr.msk.f32.vlgmr.msra.gmra.mxu1 %vm47_vm0, %v7997_v2 }
  0x47   :  { %565 = vmatprep.mubr.f32.mxu1 %v10228_v3 }
  0x48   :  { %5986 = vmatmul.mubr.msk.f32.gmra.mxu0 %vm47_vm0, %v8046_v10 }
  0x49   :  { %458 = vmatprep.mubr.f32.mxu0 %v10228_v3 }
  0x4a   :  { %5994 = vmatmul.mubr.msk.f32.gmra.mxu1 %vm47_vm0, %v8007_v4 }
  0x4b   :  { %571 = vmatprep.mubr.f32.mxu1 %v10228_v3 }
  0x4c   :  { %5987 = vmatmul.mubr.msk.f32.gmra.mxu0 %vm47_vm0, %v8054_v11 }
  0x4d   :  { %464 = vmatprep.mubr.f32.mxu0 %v10228_v3 }
  0x4e   :  { %5995 = vmatmul.mubr.msk.f32.gmra.mxu1 %vm47_vm0, %v8022_v7 }
  0x4f   :  { %577 = vmatprep.mubr.f32.mxu1 %v10228_v3 }
  0x50   :  { %5988 = vmatmul.mubr.msk.f32.gmra.mxu0 %vm47_vm0, %v8062_v12 }
  0x51   :  { %470 = vmatprep.mubr.f32.mxu0 %v10228_v3 }
  0x52   :  { %5996 = vmatmul.mubr.msk.f32.gmra.mxu1 %vm47_vm0, %v8030_v8 }
  0x53   :  { %583 = vmatprep.mubr.f32.mxu1 %v10228_v3 }
  0x54   :  { %5989 = vmatmul.mubr.msk.f32.gmra.mxu0 %vm47_vm0, %v8070_v13 }
  0x55   :  { %476 = vmatprep.mubr.f32.mxu0 %v10228_v3 }
  0x56   :  { %5997 = vmatmul.mubr.msk.f32.gmra.mxu1 %vm47_vm0, %v8038_v9 }
  0x57   :  { %589 = vmatprep.mubr.f32.mxu1 %v10228_v3 }
  0x58   :  { %5990 = vmatmul.mubr.msk.f32.gmra.mxu0 %vm47_vm0, %v8078_v14 }
  0x59   :  { %482 = vmatprep.mubr.f32.mxu0 %v10228_v3 }
  0x5a   :  { %5998 = vmatmul.mubr.msk.f32.gmra.mxu1 %vm47_vm0, %v8046_v10 }
  0x5b   :  { %595 = vmatprep.mubr.f32.mxu1 %v10228_v3 }
  0x5c   :  { %5991 = vmatmul.mubr.msk.f32.gmra.mxu0 %vm47_vm0, %v8086_v15 }
  0x5d   :  { %488 = vmatprep.mubr.f32.mxu0 %v10228_v3 }
  0x5e   :  { %5999 = vmatmul.mubr.msk.f32.gmra.mxu1 %vm47_vm0, %v8054_v11 }
  0x5f   :  { %601 = vmatprep.mubr.f32.mxu1 %v10228_v3 }
  0x60   :  { %5992 = vmatmul.mubr.msk.f32.gmra.mxu0 %vm47_vm0, %v8094_v16 }
  0x61   :  { %6685 = vmatprep.mubr.msk.f32.mxu0 %vm752_vm1, %v8136_v17 }
  0x62   :  { %6000 = vmatmul.mubr.msk.f32.gmra.mxu1 %vm47_vm0, %v8062_v12 }
  0x63   :  { %607 = vmatprep.mubr.f32.mxu1 %v10228_v3 }
  0x64   :  { %6686 = vmatmul.mubr.msk.f32.vlgmr.msra.gmra.mxu0 %vm752_vm1, %v8145_v18 }
  0x65   :  { %6688 = vmatprep.mubr.msk.f32.mxu0 %vm752_vm1, %v8150_v19 }
  0x66   :  { %6001 = vmatmul.mubr.msk.f32.gmra.mxu1 %vm47_vm0, %v8070_v13 }
  0x67   :  { %613 = vmatprep.mubr.f32.mxu1 %v10228_v3 }
  0x68   :  { %6689 = vmatmul.mubr.msk.f32.gmra.mxu0 %vm752_vm1, %v8159_v20 }
  0x69   :  { %6691 = vmatprep.mubr.msk.f32.mxu0 %vm752_vm1, %v8164_v21 }
  0x6a   :  { %6002 = vmatmul.mubr.msk.f32.gmra.mxu1 %vm47_vm0, %v8078_v14 }
  0x6b   :  { %619 = vmatprep.mubr.f32.mxu1 %v10228_v3 }
  0x6c   :  { %6692 = vmatmul.mubr.msk.f32.gmra.mxu0 %vm752_vm1, %v8173_v22 }
  0x6d   :  { %6694 = vmatprep.mubr.msk.f32.mxu0 %vm752_vm1, %v8178_v23 }
  0x6e   :  { %6003 = vmatmul.mubr.msk.f32.gmra.mxu1 %vm47_vm0, %v8086_v15 }
  0x6f   :  { %625 = vmatprep.mubr.f32.mxu1 %v10228_v3 }
  0x70   :  { %6695 = vmatmul.mubr.msk.f32.gmra.mxu0 %vm752_vm1, %v8187_v24 }
  0x71   :  { %6697 = vmatprep.mubr.msk.f32.mxu0 %vm752_vm1, %v8192_v25 }
  0x72   :  { %6004 = vmatmul.mubr.msk.f32.gmra.mxu1 %vm47_vm0, %v8094_v16 }
  0x73   :  { %6711 = vmatprep.mubr.msk.f32.mxu1 %vm752_vm1, %v8136_v17 }
  0x74   :  { %6698 = vmatmul.mubr.msk.f32.gmra.mxu0 %vm752_vm1, %v8201_v26 }
  0x75   :  { %6700 = vmatprep.mubr.msk.f32.mxu0 %vm752_vm1, %v8206_v27 }
  0x78   :  { %6701 = vmatmul.mubr.msk.f32.gmra.mxu0 %vm752_vm1, %v8215_v28 }
  0x79   :  { %6737 = vmatprep.mubr.msk.f32.mxu0 %vm752_vm1, %v8136_v17 }
  0xc4   :  { %v8280_v33 = vpop.f32.mrf.mxu0 }
  0xc5   :  { %v151_v32 = vadd.f32 1.0, %v8280_v33 }
  0xc6   :  { %v8283_v34 = vpop.f32.mrf.mxu0 }
  0xc8   :  { %v156_v35 = vpop.f32.mrf.mxu0 }
  0xc9   :  { %v157_v30 = vadd.f32 1.0, %v156_v35 }
  0xca   :  { %v8288_v36 = vpop.f32.mrf.mxu0 }
  0xcc   :  { %v8292_v37 = vpop.f32.mrf.mxu0 }
  0xce   :  { %v8295_v38 = vpop.f32.mrf.mxu0 }
  0xd0   :  { %v168_v39 = vpop.f32.mrf.mxu0 }
  0xd2   :  { %v8300_v40 = vpop.f32.mrf.mxu0 }
  0xd4   :  { %v8304_v41 = vpop.f32.mrf.mxu0 }
  0xd6   :  { %v8307_v42 = vpop.f32.mrf.mxu0 }
  0xd8   :  { %v180_v43 = vpop.f32.mrf.mxu0 }
  0xda   :  { %v8312_v44 = vpop.f32.mrf.mxu0 }
  0xdc   :  { %v8316_v45 = vpop.f32.mrf.mxu0 }
  0xde   :  { %v8319_v46 = vpop.f32.mrf.mxu0 }
  0xe0   :  { %v192_v47 = vpop.f32.mrf.mxu0 }
  0xe2   :  { %v8324_v48 = vpop.f32.mrf.mxu0 }
  0xe4   :  { %v8328_v49 = vpop.f32.mrf.mxu0 }
  0xe6   :  { %v8332_v50 = vpop.f32.mrf.mxu0 }
  0xe8   :  { %v8334_v51 = vpop.f32.mrf.mxu0 }
  0xea   :  { %v8336_v52 = vpop.f32.mrf.mxu0 }
  0xec   :  { %v8338_v53 = vpop.f32.mrf.mxu0 }
  0xee   :  { %v8340_v54 = vpop.f32.mrf.mxu0 }
  0xf0   :  { %v8342_v55 = vpop.f32.mrf.mxu0 }
  0xf2   :  { %v8344_v56 = vpop.f32.mrf.mxu0 }
  0xf4   :  { %v8346_v57 = vpop.f32.mrf.mxu0 }
  0xf5   :  { %10237 = vst [vmem:[#allocation7_spill] sm:$0xff] %v8346_v57 }
  0xf6   :  { %v8348_v58 = vpop.f32.mrf.mxu0 }
  0xf7   :  { %10238 = vst [vmem:[#allocation8_spill] sm:$0xff] %v8348_v58  ;;  %v181_v58 = vadd.f32 1.0, %v180_v43 }
  0xf8   :  { %v8350_v59 = vpop.f32.mrf.mxu0 }
  0xf9   :  { %10239 = vst [vmem:[#allocation9_spill] sm:$0xff] %v8350_v59 }
  0xfa   :  { %v8352_v60 = vpop.f32.mrf.mxu0 }
  0xfb   :  { %10240 = vst [vmem:[#allocation10_spill] sm:$0xff] %v8352_v60 }
  0xfc   :  { %v8354_v61 = vpop.f32.mrf.mxu0 }
  0xfd   :  { %10241 = vst [vmem:[#allocation11_spill] sm:$0xff] %v8354_v61 }
  0xfe   :  { %v8356_v62 = vpop.f32.mrf.mxu0 }
  0xff   :  { %10242 = vst [vmem:[#allocation12_spill] sm:$0xff] %v8356_v62 }
 0x100   :  { %v8358_v63 = vpop.f32.mrf.mxu0 }
 0x101   :  { %10243 = vst [vmem:[#allocation13_spill] sm:$0xff] %v8358_v63 }
 0x102   :  { %v8360_v0 = vpop.f32.mrf.mxu0 }
 0x103   :  { %10244 = vst [vmem:[#allocation14_spill] sm:$0xff] %v8360_v0 }
 0x104   :  { %v8362_v1 = vpop.f32.mrf.mxu0 }
 0x105   :  { %10245 = vst [vmem:[#allocation15_spill] sm:$0xff] %v8362_v1 }
 0x106   :  { %v8364_v2 = vpop.f32.mrf.mxu0 }
 0x107   :  { %10246 = vst [vmem:[#allocation16_spill] sm:$0xff] %v8364_v2 }
 0x108   :  { %v8366_v4 = vpop.f32.mrf.mxu0 }
 0x109   :  { %10247 = vst [vmem:[#allocation17_spill] sm:$0xff] %v8366_v4 }
 0x10a   :  { %v8368_v5 = vpop.f32.mrf.mxu0 }
 0x10b   :  { %10248 = vst [vmem:[#allocation18_spill] sm:$0xff] %v8368_v5 }
 0x10c   :  { %v8370_v6 = vpop.f32.mrf.mxu0 }
 0x10d   :  { %10249 = vst [vmem:[#allocation19_spill] sm:$0xff] %v8370_v6 }
 0x10e   :  { %v8372_v7 = vpop.f32.mrf.mxu0 }
 0x10f   :  { %10250 = vst [vmem:[#allocation20_spill] sm:$0xff] %v8372_v7 }
 0x110   :  { %v8374_v8 = vpop.f32.mrf.mxu0 }
 0x111   :  { %10251 = vst [vmem:[#allocation21_spill] sm:$0xff] %v8374_v8 }
 0x112   :  { %v8376_v9 = vpop.f32.mrf.mxu0 }
 0x113   :  { %10252 = vst [vmem:[#allocation22_spill] sm:$0xff] %v8376_v9  ;;  %v169_v9 = vadd.f32 1.0, %v168_v39 }
 0x114   :  { %v8378_v10 = vpop.f32.mrf.mxu0 }
 0x115   :  { %10253 = vst [vmem:[#allocation23_spill] sm:$0xff] %v8378_v10 }
 0x116   :  { %v8380_v11 = vpop.f32.mrf.mxu0 }
 0x117   :  { %10254 = vst [vmem:[#allocation24_spill] sm:$0xff] %v8380_v11 }
 0x118   :  { %v8382_v12 = vpop.f32.mrf.mxu0 }
 0x119   :  { %10255 = vst [vmem:[#allocation25_spill] sm:$0xff] %v8382_v12 }
 0x11a   :  { %v8384_v13 = vpop.f32.mrf.mxu0 }
 0x11b   :  { %10256 = vst [vmem:[#allocation26_spill] sm:$0xff] %v8384_v13  ;;  %v163_v13 = vadd.f32 1.0, %v8292_v37 }
 0x11c   :  { %v8386_v14 = vpop.f32.mrf.mxu0 }
 0x11d   :  { %10257 = vst [vmem:[#allocation27_spill] sm:$0xff] %v8386_v14  ;;  %v175_v14 = vadd.f32 1.0, %v8304_v41 }
 0x11e   :  { %v8388_v15 = vpop.f32.mrf.mxu0 }
 0x11f   :  { %10258 = vst [vmem:[#allocation28_spill] sm:$0xff] %v8388_v15 }
 0x120   :  { %v8390_v16 = vpop.f32.mrf.mxu0 }
 0x121   :  { %10259 = vst [vmem:[#allocation29_spill] sm:$0xff] %v8390_v16 }
 0x122   :  { %v8392_v29 = vpop.f32.mrf.mxu0 }
 0x123   :  { %10260 = vst [vmem:[#allocation30_spill] sm:$0xff] %v8392_v29 }
 0x124   :  { %v6687_v31 = vpop.f32.mrf.mxu0 }
 0x125   :  { %v915_v3 = vadd.f32 %v6687_v31, %v157_v30 }
 0x126   :  { %v855_v7 = vpop.f32.mrf.mxu0 }
 0x127   :  { %v6018_v11 = vmul.f32 -1.442695, %v915_v3  ;;  %v914_v2 = vadd.f32 %v855_v7, %v151_v32  ;;  %v193_v3 = vadd.f32 1.0, %v192_v47 }
 0x128   :  { %v6690_v5 = vpop.f32.mrf.mxu0 }
 0x129   :  { %7094 = vpow2.f32 %v6018_v11  ;;  %v6017_v62 = vmul.f32 -1.442695, %v914_v2  ;;  %v917_v0 = vadd.f32 %v6690_v5, %v169_v9  ;;  %v187_v2 = vadd.f32 1.0, %v8316_v45 }
 0x12a   :  { %v865_v15 = vpop.f32.mrf.mxu0 }
 0x12b   :  { %7096 = vpow2.f32 %v6017_v62  ;;  %v6020_v60 = vmul.f32 -1.442695, %v917_v0  ;;  %v916_v29 = vadd.f32 %v865_v15, %v163_v13 }
 0x12c   :  { %v6693_v35 = vpop.f32.mrf.mxu0 }
 0x12d   :  { %7098 = vpow2.f32 %v6020_v60  ;;  %v6019_v33 = vmul.f32 -1.442695, %v916_v29  ;;  %v943_v30 = vadd.f32 %v6693_v35, %v181_v58 }
 0x12e   :  { %v875_v39 = vpop.f32.mrf.mxu0 }
 0x12f   :  { %7100 = vpow2.f32 %v6019_v33  ;;  %v6022_v7 = vmul.f32 -1.442695, %v943_v30  ;;  %v942_v31 = vadd.f32 %v875_v39, %v175_v14 }
 0x130   :  { %v6696_v37 = vpop.f32.mrf.mxu0 }
 0x131   :  { %v6021_v5 = vmul.f32 -1.442695, %v942_v31  ;;  %v945_v9 = vadd.f32 %v6696_v37, %v193_v3  ;;  %7102 = vpow2.f32 %v6022_v7 }
 0x132   :  { %v885_v43 = vpop.f32.mrf.mxu0 }
 0x133   :  { %v6024_v62 = vmul.f32 -1.442695, %v945_v9  ;;  %v944_v0 = vadd.f32 %v885_v43, %v187_v2  ;;  %7104 = vpow2.f32 %v6021_v5  ;;  %v205_v2 = vadd.f32 1.0, %v8334_v51 }
 0x134   :  { %v6699_v32 = vpop.f32.mrf.mxu0 }
 0x135   :  { %v6023_v11 = vmul.f32 -1.442695, %v944_v0  ;;  %7106 = vpow2.f32 %v6024_v62  ;;  %v199_v0 = vadd.f32 1.0, %v8328_v49 }
 0x136   :  { %v7095_v41 = vpop.eup %7094  ;;  %v895_v39 = vpop.f32.mrf.mxu0 }
 0x137   :  { %v931_v60 = vadd.f32 1.0, %v7095_v41  ;;  %7108 = vpow2.f32 %v6023_v11 }
 0x138   :  { %v7097_v58 = vpop.eup %7096  ;;  %v6702_v62 = vpop.f32.mrf.mxu0 }
 0x139   :  { %7110 = vrcp.f32 %v931_v60  ;;  %v930_v47 = vadd.f32 1.0, %v7097_v58  ;;  %v217_v58 = vadd.f32 1.0, %v8342_v55 }
 0x13a   :  { %v7099_v13 = vpop.eup %7098  ;;  %v905_v51 = vpop.f32.mrf.mxu0 }
 0x13b   :  { %7112 = vrcp.f32 %v930_v47  ;;  %v933_v14 = vadd.f32 1.0, %v7099_v13 }
 0x13c   :  { %v7101_v15 = vpop.eup %7100 }
 0x13d   :  { %7114 = vrcp.f32 %v933_v14  ;;  %v932_v45 = vadd.f32 1.0, %v7101_v15  ;;  %v211_v15 = vadd.f32 1.0, %v8338_v53 }
 0x13e   :  { %v7103_v29 = vpop.eup %7102 }
 0x13f   :  { %7116 = vrcp.f32 %v932_v45  ;;  %v959_v30 = vadd.f32 1.0, %v7103_v29 }
 0x140   :  { %v7105_v35 = vpop.eup %7104 }
 0x141   :  { %v958_v7 = vadd.f32 1.0, %v7105_v35  ;;  %7118 = vrcp.f32 %v959_v30 }
 0x142   :  { %v7107_v33 = vpop.eup %7106 }
 0x143   :  { %v961_v37 = vadd.f32 1.0, %v7107_v33  ;;  %7120 = vrcp.f32 %v958_v7 }
 0x144   :  { %v7109_v3 = vpop.eup %7108 }
 0x145   :  { %v960_v43 = vadd.f32 1.0, %v7109_v3  ;;  %7122 = vrcp.f32 %v961_v37 }
 0x146   :  { %v7111_v31 = vpop.eup %7110 }
 0x147   :  { %v971_v5 = vmul.f32 %v7111_v31, %v6699_v32 }
 0x148   :  { %v7113_v9 = vpop.eup %7112 }
 0x149   :  { %v975_v11 = vadd.f32 %v971_v5, %v205_v2  ;;  %v970_v41 = vmul.f32 %v7113_v9, %v895_v39 }
 0x14a   :  { %v7115_v60 = vpop.eup %7114 }
 0x14b   :  { %7124 = vtanh.f32 %v975_v11  ;;  %v974_v47 = vadd.f32 %v970_v41, %v199_v0  ;;  %v973_v13 = vmul.f32 %v7115_v60, %v6702_v62 }
 0x14c   :  { %v7117_v14 = vpop.eup %7116  ;;  %7126 = vrcp.f32 %v960_v43 }
 0x14d   :  { %7128 = vtanh.f32 %v974_v47  ;;  %v977_v45 = vadd.f32 %v973_v13, %v217_v58  ;;  %v972_v29 = vmul.f32 %v7117_v14, %v905_v51  ;;  %v8422_v51 = vpop.f32.mrf.mxu1 }
 0x14e   :  { %v7119_v32 = vpop.eup %7118 }
 0x14f   :  { %7130 = vtanh.f32 %v977_v45  ;;  %v976_v49 = vadd.f32 %v972_v29, %v211_v15  ;;  %v983_v30 = vsub.f32 1.0, %v7119_v32  ;;  %v991_v7 = vmul.f32 0.0, %v7119_v32  ;;  %v8428_v15 = vpop.f32.mrf.mxu1 }
 0x150   :  { %v7121_v35 = vpop.eup %7120 }
 0x151   :  { %7132 = vtanh.f32 %v976_v49  ;;  %v982_v31 = vsub.f32 1.0, %v7121_v35  ;;  %v990_v9 = vmul.f32 0.0, %v7121_v35  ;;  %v8434_v45 = vpop.f32.mrf.mxu1 }
 0x152   :  { %v7123_v33 = vpop.eup %7122 }
 0x153   :  { %v985_v2 = vsub.f32 1.0, %v7123_v33  ;;  %v993_v0 = vmul.f32 0.0, %v7123_v33  ;;  %v8440_v29 = vpop.f32.mrf.mxu1 }
 0x155   :  { %v8446_v49 = vpop.f32.mrf.mxu1 }
 0x157   :  { %v8452_v32 = vpop.f32.mrf.mxu1 }
 0x158   :  { %v7125_v39 = vpop.eup %7124 }
 0x159   :  { %v7127_v55 = vpop.eup %7126  ;;  %v987_v3 = vmul.f32 %v7125_v39, %v983_v30  ;;  %v8454_v35 = vpop.f32.mrf.mxu1 }
 0x15a   :  { %v7129_v37 = vpop.eup %7128  ;;  %v984_v11 = vsub.f32 1.0, %v7127_v55  ;;  %v992_v13 = vmul.f32 0.0, %v7127_v55 }
 0x15b   :  { %v8402_v5 = vadd.f32 %v991_v7, %v987_v3  ;;  %v986_v53 = vmul.f32 %v7129_v37, %v982_v31  ;;  %v8456_v33 = vpop.f32.mrf.mxu1 }
 0x15c   :  { %v7131_v43 = vpop.eup %7130 }
 0x15d   :  { %v989_v62 = vmul.f32 %v7131_v43, %v985_v2  ;;  %v8404_v41 = vadd.f32 %v990_v9, %v986_v53  ;;  %v8458_v30 = vpop.f32.mrf.mxu1 }
 0x15e   :  { %v7133_v60 = vpop.eup %7132 }
 0x15f   :  { %v8406_v58 = vadd.f32 %v993_v0, %v989_v62  ;;  %v988_v47 = vmul.f32 %v7133_v60, %v984_v11  ;;  %v8460_v39 = vpop.f32.mrf.mxu1 }
 0x161   :  { %6703 = vmatprep.subr.mxu1 %v8406_v58  ;;  %v8409_v14 = vadd.f32 %v992_v13, %v988_v47  ;;  %v8462_v55 = vpop.f32.mrf.mxu1 }
 0x162   :  { %6704 = vmatpush3.msra.mxu1 %v8406_v58 }
 0x163   :  { %6705 = vmatprep.subr.mxu1 %v8409_v14  ;;  %v8464_v3 = vpop.f32.mrf.mxu1 }
 0x164   :  { %6706 = vmatpush3.msra.mxu1 %v8409_v14 }
 0x165   :  { %6707 = vmatprep.subr.mxu1 %v8402_v5  ;;  %v8466_v7 = vpop.f32.mrf.mxu1 }
 0x166   :  { %6708 = vmatpush3.msra.mxu1 %v8402_v5 }
 0x167   :  { %6709 = vmatprep.subr.mxu1 %v8404_v41  ;;  %v8468_v31 = vpop.f32.mrf.mxu1 }
 0x168   :  { %6710 = vmatpush3.msra.mxu1 %v8404_v41 }
 0x169   :  { %6712 = vmatmul.mubr.msk.f32.vlgmr.msra.gmra.mxu1 %vm752_vm1, %v8145_v18  ;;  %v8470_v37 = vpop.f32.mrf.mxu1 }
 0x16a   :  { %6714 = vmatprep.mubr.msk.f32.mxu1 %vm752_vm1, %v8150_v19 }
 0x16b   :  { %v8472_v2 = vpop.f32.mrf.mxu1 }
 0x16d   :  { %6715 = vmatmul.mubr.msk.f32.gmra.mxu1 %vm752_vm1, %v8159_v20  ;;  %v8474_v53 = vpop.f32.mrf.mxu1 }
 0x16e   :  { %6717 = vmatprep.mubr.msk.f32.mxu1 %vm752_vm1, %v8164_v21 }
 0x16f   :  { %v8476_v9 = vpop.f32.mrf.mxu1 }
 0x170   :  { %10261 = vst [vmem:[#allocation31_spill] sm:$0xff] %v8476_v9 }
 0x171   :  { %6718 = vmatmul.mubr.msk.f32.gmra.mxu1 %vm752_vm1, %v8173_v22  ;;  %v8478_v43 = vpop.f32.mrf.mxu1 }
 0x172   :  { %6720 = vmatprep.mubr.msk.f32.mxu1 %vm752_vm1, %v8178_v23 }
 0x173   :  { %v8480_v62 = vpop.f32.mrf.mxu1 }
 0x174   :  { %10262 = vst [vmem:[#allocation32_spill] sm:$0xff] %v8480_v62 }
 0x175   :  { %6721 = vmatmul.mubr.msk.f32.gmra.mxu1 %vm752_vm1, %v8187_v24  ;;  %v8482_v0 = vpop.f32.mrf.mxu1 }
 0x176   :  { %6723 = vmatprep.mubr.msk.f32.mxu1 %vm752_vm1, %v8192_v25 }
 0x177   :  { %v8484_v11 = vpop.f32.mrf.mxu1 }
 0x178   :  { %10263 = vst [vmem:[#allocation33_spill] sm:$0xff] %v8484_v11 }
 0x179   :  { %6724 = vmatmul.mubr.msk.f32.gmra.mxu1 %vm752_vm1, %v8201_v26  ;;  %v8486_v60 = vpop.f32.mrf.mxu1 }
 0x17a   :  { %6726 = vmatprep.mubr.msk.f32.mxu1 %vm752_vm1, %v8206_v27 }
 0x17b   :  { %v8488_v47 = vpop.f32.mrf.mxu1 }
 0x17c   :  { %10264 = vst [vmem:[#allocation34_spill] sm:$0xff] %v8488_v47 }
 0x17d   :  { %6727 = vmatmul.mubr.msk.f32.gmra.mxu1 %vm752_vm1, %v8215_v28  ;;  %v8490_v13 = vpop.f32.mrf.mxu1 }
 0x17e   :  { %6763 = vmatprep.mubr.msk.f32.mxu1 %vm752_vm1, %v8136_v17  ;;  %10265 = vst [vmem:[#allocation35_spill] sm:$0xff] %v8490_v13 }
 0x17f   :  { %v8492_v16 = vpop.f32.mrf.mxu1 }
 0x180   :  { %10266 = vst [vmem:[#allocation36_spill] sm:$0xff] %v8492_v16 }
 0x181   :  { %v8494_v10 = vpop.f32.mrf.mxu1 }
 0x182   :  { %10267 = vst [vmem:[#allocation37_spill] sm:$0xff] %v8494_v10 }
 0x183   :  { %v8496_v12 = vpop.f32.mrf.mxu1 }
 0x184   :  { %10268 = vst [vmem:[#allocation38_spill] sm:$0xff] %v8496_v12 }
 0x185   :  { %v8498_v6 = vpop.f32.mrf.mxu1 }
 0x186   :  { %10269 = vst [vmem:[#allocation39_spill] sm:$0xff] %v8498_v6 }
 0x187   :  { %v8500_v8 = vpop.f32.mrf.mxu1 }
 0x188   :  { %10270 = vst [vmem:[#allocation40_spill] sm:$0xff] %v8500_v8 }
 0x189   :  { %v8502_v1 = vpop.f32.mrf.mxu1 }
 0x18a   :  { %10271 = vst [vmem:[#allocation41_spill] sm:$0xff] %v8502_v1 }
 0x18b   :  { %v8504_v4 = vpop.f32.mrf.mxu1 }
 0x18c   :  { %10272 = vst [vmem:[#allocation42_spill] sm:$0xff] %v8504_v4 }
 0x18d   :  { %v8506_v61 = vpop.f32.mrf.mxu1 }
 0x18e   :  { %10273 = vst [vmem:[#allocation43_spill] sm:$0xff] %v8506_v61 }
 0x18f   :  { %v8508_v63 = vpop.f32.mrf.mxu1 }
 0x190   :  { %10274 = vst [vmem:[#allocation44_spill] sm:$0xff] %v8508_v63 }
 0x191   :  { %v8510_v57 = vpop.f32.mrf.mxu1 }
 0x192   :  { %10275 = vst [vmem:[#allocation45_spill] sm:$0xff] %v8510_v57 }
 0x193   :  { %v8512_v13 = vpop.f32.mrf.mxu1 }
 0x194   :  { %10276 = vst [vmem:[#allocation46_spill] sm:$0xff] %v8512_v13 }
 0x195   :  { %v8514_v16 = vpop.f32.mrf.mxu1 }
 0x196   :  { %10277 = vst [vmem:[#allocation47_spill] sm:$0xff] %v8514_v16 }
 0x197   :  { %v8516_v10 = vpop.f32.mrf.mxu1 }
 0x198   :  { %10278 = vst [vmem:[#allocation48_spill] sm:$0xff] %v8516_v10  ;;  %v159_v10 = vadd.f32 1.0, %v8288_v36 }
 0x199   :  { %v8518_v12 = vpop.f32.mrf.mxu1 }
 0x19a   :  { %10279 = vst [vmem:[#allocation49_spill] sm:$0xff] %v8518_v12 }
 0x19b   :  { %v8520_v6 = vpop.f32.mrf.mxu1 }
 0x19c   :  { %10280 = vst [vmem:[#allocation50_spill] sm:$0xff] %v8520_v6  ;;  %v153_v6 = vadd.f32 1.0, %v8283_v34  ;;  %v177_v34 = vadd.f32 1.0, %v8307_v42 }
 0x19d   :  { %v8522_v8 = vpop.f32.mrf.mxu1 }
 0x19e   :  { %10281 = vst [vmem:[#allocation51_spill] sm:$0xff] %v8522_v8 }
 0x19f   :  { %v8524_v1 = vpop.f32.mrf.mxu1 }
 0x1a0   :  { %10282 = vst [vmem:[#allocation52_spill] sm:$0xff] %v8524_v1  ;;  %v171_v1 = vadd.f32 1.0, %v8300_v40 }
 0x1a1   :  { %v8526_v4 = vpop.f32.mrf.mxu1 }
 0x1a2   :  { %10283 = vst [vmem:[#allocation53_spill] sm:$0xff] %v8526_v4 }
 0x1a3   :  { %v8528_v61 = vpop.f32.mrf.mxu1 }
 0x1a4   :  { %10284 = vst [vmem:[#allocation54_spill] sm:$0xff] %v8528_v61 }
 0x1a5   :  { %v8530_v63 = vpop.f32.mrf.mxu1 }
 0x1a6   :  { %10285 = vst [vmem:[#allocation55_spill] sm:$0xff] %v8530_v63  ;;  %v165_v63 = vadd.f32 1.0, %v8295_v38 }
 0x1a7   :  { %v8532_v57 = vpop.f32.mrf.mxu1 }
 0x1a8   :  { %10286 = vst [vmem:[#allocation56_spill] sm:$0xff] %v8532_v57 }
 0x1a9   :  { %v8534_v13 = vpop.f32.mrf.mxu1 }
 0x1aa   :  { %10287 = vst [vmem:[#allocation57_spill] sm:$0xff] %v8534_v13 }
 0x1ab   :  { %v8536_v16 = vpop.f32.mrf.mxu1 }
 0x1ac   :  { %10288 = vst [vmem:[#allocation58_spill] sm:$0xff] %v8536_v16  ;;  %v183_v16 = vadd.f32 1.0, %v8312_v44 }
 0x229   :  { %v6713_v12 = vpop.f32.mrf.mxu1 }
 0x22a   :  { %v1140_v8 = vadd.f32 %v6713_v12, %v159_v10 }
 0x22b   :  { %v1080_v59 = vpop.f32.mrf.mxu1 }
 0x22c   :  { %v6038_v4 = vmul.f32 -1.442695, %v1140_v8  ;;  %v1139_v11 = vadd.f32 %v1080_v59, %v153_v6  ;;  %v195_v59 = vadd.f32 1.0, %v8324_v48 }
 0x22d   :  { %v6716_v61 = vpop.f32.mrf.mxu1 }
 0x22e   :  { %7134 = vpow2.f32 %v6038_v4  ;;  %v6037_v57 = vmul.f32 -1.442695, %v1139_v11  ;;  %v1142_v47 = vadd.f32 %v6716_v61, %v171_v1  ;;  %v189_v61 = vadd.f32 1.0, %v8319_v46 }
 0x22f   :  { %v1090_v13 = vpop.f32.mrf.mxu1 }
 0x230   :  { %7136 = vpow2.f32 %v6037_v57  ;;  %v6040_v36 = vmul.f32 -1.442695, %v1142_v47  ;;  %v1141_v9 = vadd.f32 %v1090_v13, %v165_v63 }
 0x231   :  { %v6719_v62 = vpop.f32.mrf.mxu1 }
 0x232   :  { %7138 = vpow2.f32 %v6040_v36  ;;  %v6039_v10 = vmul.f32 -1.442695, %v1141_v9  ;;  %v1168_v40 = vadd.f32 %v6719_v62, %v183_v16 }
 0x233   :  { %v1100_v8 = vpop.f32.mrf.mxu1 }
 0x234   :  { %7140 = vpow2.f32 %v6039_v10  ;;  %v1167_v38 = vadd.f32 %v1100_v8, %v177_v34  ;;  %v6042_v1 = vmul.f32 -1.442695, %v1168_v40 }
 0x235   :  { %v6722_v4 = vpop.f32.mrf.mxu1 }
 0x236   :  { %v1170_v6 = vadd.f32 %v6722_v4, %v195_v59  ;;  %v6041_v44 = vmul.f32 -1.442695, %v1167_v38  ;;  %7142 = vpow2.f32 %v6042_v1 }
 0x237   :  { %v1110_v57 = vpop.f32.mrf.mxu1 }
 0x238   :  { %v6044_v12 = vmul.f32 -1.442695, %v1170_v6  ;;  %v1169_v63 = vadd.f32 %v1110_v57, %v189_v61  ;;  %7144 = vpow2.f32 %v6041_v44  ;;  %v207_v44 = vadd.f32 1.0, %v8336_v52 }
 0x239   :  { %v6725_v36 = vpop.f32.mrf.mxu1 }
 0x23a   :  { %v6043_v11 = vmul.f32 -1.442695, %v1169_v63  ;;  %7146 = vpow2.f32 %v6044_v12 }
 0x23b   :  { %v7135_v42 = vpop.eup %7134  ;;  %v1120_v8 = vpop.f32.mrf.mxu1 }
 0x23c   :  { %v1156_v9 = vadd.f32 1.0, %v7135_v42  ;;  %7148 = vpow2.f32 %v6043_v11 }
 0x23d   :  { %v7137_v16 = vpop.eup %7136  ;;  %v6728_v12 = vpop.f32.mrf.mxu1 }
 0x23e   :  { %7150 = vrcp.f32 %v1156_v9  ;;  %v1155_v48 = vadd.f32 1.0, %v7137_v16  ;;  %v201_v9 = vadd.f32 1.0, %v8332_v50 }
 0x23f   :  { %v7139_v62 = vpop.eup %7138 }
 0x240   :  { %7152 = vrcp.f32 %v1155_v48  ;;  %v1158_v47 = vadd.f32 1.0, %v7139_v62  ;;  %v219_v48 = vadd.f32 1.0, %v8344_v56 }
 0x241   :  { %v7141_v46 = vpop.eup %7140 }
 0x242   :  { %7154 = vrcp.f32 %v1158_v47  ;;  %v1157_v13 = vadd.f32 1.0, %v7141_v46 }
 0x243   :  { %v7143_v34 = vpop.eup %7142 }
 0x244   :  { %7156 = vrcp.f32 %v1157_v13  ;;  %v1184_v4 = vadd.f32 1.0, %v7143_v34  ;;  %v1130_v13 = vpop.f32.mrf.mxu1 }
 0x245   :  { %v7145_v10 = vpop.eup %7144 }
 0x246   :  { %v1183_v57 = vadd.f32 1.0, %v7145_v10  ;;  %7158 = vrcp.f32 %v1184_v4 }
 0x247   :  { %v7147_v40 = vpop.eup %7146 }
 0x248   :  { %v1186_v61 = vadd.f32 1.0, %v7147_v40 }
 0x249   :  { %v7149_v59 = vpop.eup %7148 }
 0x24a   :  { %v1185_v63 = vadd.f32 1.0, %v7149_v59  ;;  %7160 = vrcp.f32 %v1186_v61 }
 0x24b   :  { %v7151_v38 = vpop.eup %7150  ;;  %7162 = vrcp.f32 %v1183_v57 }
 0x24c   :  { %v1196_v1 = vmul.f32 %v7151_v38, %v6725_v36  ;;  %v213_v36 = vadd.f32 1.0, %v8340_v54  ;;  %7164 = vrcp.f32 %v1185_v63 }
 0x24d   :  { %v7153_v6 = vpop.eup %7152 }
 0x24e   :  { %v1195_v11 = vmul.f32 %v7153_v6, %v1120_v8  ;;  %v1200_v16 = vadd.f32 %v1196_v1, %v207_v44 }
 0x24f   :  { %v7155_v42 = vpop.eup %7154 }
 0x250   :  { %v1198_v62 = vmul.f32 %v7155_v42, %v6728_v12  ;;  %v1199_v46 = vadd.f32 %v1195_v11, %v201_v9  ;;  %7166 = vtanh.f32 %v1200_v16 }
 0x251   :  { %v7157_v47 = vpop.eup %7156 }
 0x252   :  { %v1202_v52 = vadd.f32 %v1198_v62, %v219_v48  ;;  %v1197_v34 = vmul.f32 %v7157_v47, %v1130_v13 }
 0x253   :  { %v7159_v50 = vpop.eup %7158 }
 0x254   :  { %7168 = vtanh.f32 %v1202_v52  ;;  %v1201_v10 = vadd.f32 %v1197_v34, %v213_v36  ;;  %v1208_v44 = vsub.f32 1.0, %v7159_v50  ;;  %v1216_v48 = vmul.f32 %v7159_v50, %v8402_v5 }
 0x255   :  { %7170 = vtanh.f32 %v1199_v46 }
 0x256   :  { %7172 = vtanh.f32 %v1201_v10 }
 0x257   :  { %v7161_v40 = vpop.eup %7160 }
 0x258   :  { %v7163_v8 = vpop.eup %7162  ;;  %v1210_v38 = vsub.f32 1.0, %v7161_v40  ;;  %v1218_v6 = vmul.f32 %v7161_v40, %v8406_v58 }
 0x259   :  { %v7165_v56 = vpop.eup %7164  ;;  %v1207_v12 = vsub.f32 1.0, %v7163_v8  ;;  %v1215_v46 = vmul.f32 %v7163_v8, %v8404_v41  ;;  %v330_v8 = vadd.f32 1.0, %v8470_v37 }
 0x25a   :  { %v1209_v54 = vsub.f32 1.0, %v7165_v56  ;;  %v1217_v42 = vmul.f32 %v7165_v56, %v8409_v14 }
 0x25d   :  { %v7167_v59 = vpop.eup %7166 }
 0x25e   :  { %v1212_v9 = vmul.f32 %v7167_v59, %v1208_v44 }
 0x260   :  { %v8560_v47 = vadd.f32 %v1216_v48, %v1212_v9 }
 0x261   :  { %v7169_v4 = vpop.eup %7168 }
 0x262   :  { %v7171_v61 = vpop.eup %7170  ;;  %v1214_v1 = vmul.f32 %v7169_v4, %v1210_v38  ;;  %v324_v38 = vadd.f32 1.0, %v8466_v7 }
 0x263   :  { %v7173_v57 = vpop.eup %7172  ;;  %v1211_v62 = vmul.f32 %v7171_v61, %v1207_v12 }
 0x264   :  { %v8551_v63 = vadd.f32 %v1218_v6, %v1214_v1  ;;  %v1213_v11 = vmul.f32 %v7173_v57, %v1209_v54 }
 0x265   :  { %v8565_v13 = vadd.f32 %v1215_v46, %v1211_v62 }
 0x266   :  { %6729 = vmatprep.subr.mxu0 %v8551_v63  ;;  %v8555_v16 = vadd.f32 %v1217_v42, %v1213_v11 }
 0x267   :  { %6730 = vmatpush3.msra.mxu0 %v8551_v63 }
 0x268   :  { %6731 = vmatprep.subr.mxu0 %v8555_v16 }
 0x269   :  { %6732 = vmatpush3.msra.mxu0 %v8555_v16 }
 0x26a   :  { %6733 = vmatprep.subr.mxu0 %v8560_v47 }
 0x26b   :  { %6734 = vmatpush3.msra.mxu0 %v8560_v47 }
 0x26c   :  { %6735 = vmatprep.subr.mxu0 %v8565_v13 }
 0x26d   :  { %6736 = vmatpush3.msra.mxu0 %v8565_v13 }
 0x26e   :  { %6738 = vmatmul.mubr.msk.f32.vlgmr.msra.gmra.mxu0 %vm752_vm1, %v8145_v18  ;;  %v294_v18 = vadd.f32 1.0, %v8434_v45 }
 0x26f   :  { %6740 = vmatprep.mubr.msk.f32.mxu0 %vm752_vm1, %v8150_v19 }
 0x272   :  { %6741 = vmatmul.mubr.msk.f32.gmra.mxu0 %vm752_vm1, %v8159_v20  ;;  %v288_v20 = vadd.f32 1.0, %v8422_v51  ;;  %v312_v51 = vadd.f32 1.0, %v8458_v30 }
 0x273   :  { %6743 = vmatprep.mubr.msk.f32.mxu0 %vm752_vm1, %v8164_v21 }
 0x276   :  { %6744 = vmatmul.mubr.msk.f32.gmra.mxu0 %vm752_vm1, %v8173_v22 }
 0x277   :  { %6746 = vmatprep.mubr.msk.f32.mxu0 %vm752_vm1, %v8178_v23  ;;  %v306_v23 = vadd.f32 1.0, %v8454_v35 }
 0x27a   :  { %6747 = vmatmul.mubr.msk.f32.gmra.mxu0 %vm752_vm1, %v8187_v24 }
 0x27b   :  { %6749 = vmatprep.mubr.msk.f32.mxu0 %vm752_vm1, %v8192_v25 }
 0x27e   :  { %6750 = vmatmul.mubr.msk.f32.gmra.mxu0 %vm752_vm1, %v8201_v26 }
 0x27f   :  { %6752 = vmatprep.mubr.msk.f32.mxu0 %vm752_vm1, %v8206_v27  ;;  %v300_v27 = vadd.f32 1.0, %v8446_v49 }
 0x282   :  { %6753 = vmatmul.mubr.msk.f32.gmra.mxu0 %vm752_vm1, %v8215_v28 }
 0x283   :  { %6789 = vmatprep.mubr.msk.f32.mxu0 %vm752_vm1, %v8136_v17  ;;  %v318_v17 = vadd.f32 1.0, %v8462_v55 }
 0x32e   :  { %v6739_v19 = vpop.f32.mrf.mxu0 }
 0x32f   :  { %v1365_v21 = vadd.f32 %v6739_v19, %v294_v18 }
 0x330   :  { %v1305_v22 = vpop.f32.mrf.mxu0 }
 0x331   :  { %v6058_v24 = vmul.f32 -1.442695, %v1365_v21  ;;  %v1364_v25 = vadd.f32 %v1305_v22, %v288_v20 }
 0x332   :  { %v6742_v26 = vpop.f32.mrf.mxu0 }
 0x333   :  { %7174 = vpow2.f32 %v6058_v24  ;;  %v6057_v36 = vmul.f32 -1.442695, %v1364_v25  ;;  %v1367_v28 = vadd.f32 %v6742_v26, %v306_v23  ;;  %v342_v24 = vadd.f32 1.0, %v8478_v43 }
 0x334   :  { %v1315_v52 = vpop.f32.mrf.mxu0 }
 0x335   :  { %7176 = vpow2.f32 %v6057_v36  ;;  %v6060_v45 = vmul.f32 -1.442695, %v1367_v28  ;;  %v1366_v34 = vadd.f32 %v1315_v52, %v300_v27  ;;  %v336_v28 = vadd.f32 1.0, %v8474_v53 }
 0x336   :  { %v6745_v10 = vpop.f32.mrf.mxu0 }
 0x337   :  { %7178 = vpow2.f32 %v6060_v45  ;;  %v6059_v50 = vmul.f32 -1.442695, %v1366_v34  ;;  %v1393_v35 = vadd.f32 %v6745_v10, %v318_v17  ;;  %v354_v34 = vadd.f32 1.0, %v8486_v60 }
 0x338   :  { %v1325_v40 = vpop.f32.mrf.mxu0 }
 0x339   :  { %7180 = vpow2.f32 %v6059_v50  ;;  %v6062_v49 = vmul.f32 -1.442695, %v1393_v35  ;;  %v1392_v56 = vadd.f32 %v1325_v40, %v312_v51  ;;  %v348_v35 = vadd.f32 1.0, %v8482_v0 }
 0x33a   :  { %v6748_v59 = vpop.f32.mrf.mxu0 }
 0x33b   :  { %v6061_v4 = vmul.f32 -1.442695, %v1392_v56  ;;  %v1395_v55 = vadd.f32 %v6748_v59, %v330_v8  ;;  %7182 = vpow2.f32 %v6062_v49 }
 0x33c   :  { %v1335_v61 = vpop.f32.mrf.mxu0 }
 0x33d   :  { %v6064_v1 = vmul.f32 -1.442695, %v1395_v55  ;;  %v1394_v6 = vadd.f32 %v1335_v61, %v324_v38  ;;  %7184 = vpow2.f32 %v6061_v4 }
 0x33e   :  { %v6751_v48 = vpop.f32.mrf.mxu0 }
 0x33f   :  { %v6063_v30 = vmul.f32 -1.442695, %v1394_v6  ;;  %7186 = vpow2.f32 %v6064_v1 }
 0x340   :  { %v7175_v54 = vpop.eup %7174  ;;  %v1345_v19 = vpop.f32.mrf.mxu0 }
 0x341   :  { %v1381_v44 = vadd.f32 1.0, %v7175_v54  ;;  %7188 = vpow2.f32 %v6063_v30 }
 0x342   :  { %v7177_v57 = vpop.eup %7176  ;;  %v6754_v36 = vpop.f32.mrf.mxu0 }
 0x343   :  { %7190 = vrcp.f32 %v1381_v44  ;;  %v1380_v37 = vadd.f32 1.0, %v7177_v57 }
 0x344   :  { %v7179_v12 = vpop.eup %7178  ;;  %v1355_v43 = vpop.f32.mrf.mxu0 }
 0x345   :  { %7192 = vrcp.f32 %v1380_v37  ;;  %v1383_v11 = vadd.f32 1.0, %v7179_v12 }
 0x346   :  { %v7181_v42 = vpop.eup %7180 }
 0x347   :  { %7194 = vrcp.f32 %v1383_v11  ;;  %v1382_v7 = vadd.f32 1.0, %v7181_v42 }
 0x348   :  { %v7183_v9 = vpop.eup %7182 }
 0x349   :  { %7196 = vrcp.f32 %v1382_v7  ;;  %v1409_v18 = vadd.f32 1.0, %v7183_v9 }
 0x34a   :  { %v7185_v62 = vpop.eup %7184 }
 0x34b   :  { %v1408_v21 = vadd.f32 1.0, %v7185_v62  ;;  %7198 = vrcp.f32 %v1409_v18  ;;  %v8629_v18 = vld [vmem:[%s10224_s4 + $0x8] sm:$0xff] }
 0x34c   :  { %v7187_v46 = vpop.eup %7186 }
 0x34d   :  { %v1411_v23 = vadd.f32 1.0, %v7187_v46  ;;  %7200 = vrcp.f32 %v1408_v21  ;;  %v8650_v21 = vld [vmem:[%s10224_s4 + $0x20] sm:$0xff] }
 0x34e   :  { %v7189_v20 = vpop.eup %7188 }
 0x34f   :  { %v1410_v27 = vadd.f32 1.0, %v7189_v20  ;;  %7202 = vrcp.f32 %v1411_v23  ;;  %v8643_v20 = vld [vmem:[%s10224_s4 + $0x18] sm:$0xff]  ;;  %v8664_v23 = vld [vmem:[%s10224_s4 + $0x30] sm:$0xff] }
 0x350   :  { %v7191_v22 = vpop.eup %7190 }
 0x351   :  { %v1421_v25 = vmul.f32 %v7191_v22, %v6751_v48  ;;  %v8657_v22 = vld [vmem:[%s10224_s4 + $0x28] sm:$0xff] }
 0x352   :  { %v7193_v26 = vpop.eup %7192 }
 0x353   :  { %v1425_v52 = vadd.f32 %v1421_v25, %v342_v24  ;;  %v1420_v17 = vmul.f32 %v7193_v26, %v1345_v19  ;;  %v8636_v19 = vld [vmem:[%s10224_s4 + $0x10] sm:$0xff]  ;;  %v8671_v24 = vld [vmem:[%s10224_s4 + $0x38] sm:$0xff]  ;;  %v8678_v25 = vld [vmem:[%s10224_s4 + $0x40] sm:$0xff] }
 0x354   :  { %v7195_v45 = vpop.eup %7194  ;;  %v8685_v26 = vld [vmem:[%s10224_s4 + $0x48] sm:$0xff] }
 0x355   :  { %7204 = vtanh.f32 %v1425_v52  ;;  %v1424_v10 = vadd.f32 %v1420_v17, %v336_v28  ;;  %v1423_v51 = vmul.f32 %v7195_v45, %v6754_v36  ;;  %v8699_v36 = vld [vmem:[%s10224_s4 + $0x58] sm:$0xff]  ;;  %v8706_v28 = vld [vmem:[%s10224_s4] sm:$0xff]  ;;  %v296_v52 = vadd.f32 1.0, %v8440_v29 }
 0x356   :  { %v7197_v50 = vpop.eup %7196  ;;  %7206 = vrcp.f32 %v1410_v27  ;;  %v8692_v27 = vld [vmem:[%s10224_s4 + $0x50] sm:$0xff]  ;;  %v290_v45 = vadd.f32 1.0, %v8428_v15  ;;  %v314_v15 = vadd.f32 1.0, %v8460_v39 }
 0x357   :  { %7208 = vtanh.f32 %v1424_v10  ;;  %v1427_v40 = vadd.f32 %v1423_v51, %v354_v34  ;;  %v1422_v8 = vmul.f32 %v7197_v50, %v1355_v43  ;;  %v308_v51 = vadd.f32 1.0, %v8456_v33 }
 0x358   :  { %v7199_v49 = vpop.eup %7198 }
 0x359   :  { %7210 = vtanh.f32 %v1427_v40  ;;  %v1426_v53 = vadd.f32 %v1422_v8, %v348_v35  ;;  %v1433_v38 = vsub.f32 1.0, %v7199_v49  ;;  %v1441_v61 = vmul.f32 %v7199_v49, %v8560_v47 }
 0x35a   :  { %v7201_v56 = vpop.eup %7200  ;;  %v302_v40 = vadd.f32 1.0, %v8452_v32 }
 0x35b   :  { %7212 = vtanh.f32 %v1426_v53  ;;  %v1432_v1 = vsub.f32 1.0, %v7201_v56  ;;  %v1440_v44 = vmul.f32 %v7201_v56, %v8565_v13  ;;  %v320_v56 = vadd.f32 1.0, %v8464_v3 }
 0x35c   :  { %v7203_v59 = vpop.eup %7202 }
 0x35d   :  { %v1435_v30 = vsub.f32 1.0, %v7203_v59  ;;  %v1443_v12 = vmul.f32 %v7203_v59, %v8551_v63 }
 0x362   :  { %v7205_v4 = vpop.eup %7204 }
 0x363   :  { %v7207_v60 = vpop.eup %7206  ;;  %v1437_v55 = vmul.f32 %v7205_v4, %v1433_v38 }
 0x364   :  { %v7209_v6 = vpop.eup %7208  ;;  %v1434_v11 = vsub.f32 1.0, %v7207_v60  ;;  %v1442_v62 = vmul.f32 %v7207_v60, %v8555_v16 }
 0x365   :  { %v8607_v54 = vadd.f32 %v1441_v61, %v1437_v55  ;;  %v1436_v0 = vmul.f32 %v7209_v6, %v1432_v1  ;;  %v332_v55 = vadd.f32 1.0, %v8472_v2  ;;  %v326_v1 = vadd.f32 1.0, %v8468_v31 }
 0x366   :  { %v7211_v57 = vpop.eup %7210 }
 0x367   :  { %v1439_v37 = vmul.f32 %v7211_v57, %v1435_v30  ;;  %v8611_v42 = vadd.f32 %v1440_v44, %v1436_v0 }
 0x368   :  { %v7213_v7 = vpop.eup %7212 }
 0x369   :  { %v8613_v9 = vadd.f32 %v1443_v12, %v1439_v37  ;;  %v1438_v48 = vmul.f32 %v7213_v7, %v1434_v11 }
 0x36b   :  { %6755 = vmatprep.subr.mxu1 %v8613_v9  ;;  %v8617_v46 = vadd.f32 %v1442_v62, %v1438_v48 }
 0x36c   :  { %6756 = vmatpush3.msra.mxu1 %v8613_v9 }
 0x36d   :  { %6757 = vmatprep.subr.mxu1 %v8617_v46 }
 0x36e   :  { %6758 = vmatpush3.msra.mxu1 %v8617_v46 }
 0x36f   :  { %6759 = vmatprep.subr.mxu1 %v8607_v54 }
 0x370   :  { %6760 = vmatpush3.msra.mxu1 %v8607_v54 }
 0x371   :  { %6761 = vmatprep.subr.mxu1 %v8611_v42 }
 0x372   :  { %6762 = vmatpush3.msra.mxu1 %v8611_v42 }
 0x373   :  { %6764 = vmatmul.mubr.msk.f32.vlgmr.msra.gmra.mxu1 %vm752_vm1, %v8629_v18 }
 0x374   :  { %6766 = vmatprep.mubr.msk.f32.mxu1 %vm752_vm1, %v8636_v19 }
 0x377   :  { %6767 = vmatmul.mubr.msk.f32.gmra.mxu1 %vm752_vm1, %v8643_v20 }
 0x378   :  { %6769 = vmatprep.mubr.msk.f32.mxu1 %vm752_vm1, %v8650_v21 }
 0x37b   :  { %6770 = vmatmul.mubr.msk.f32.gmra.mxu1 %vm752_vm1, %v8657_v22 }
 0x37c   :  { %6772 = vmatprep.mubr.msk.f32.mxu1 %vm752_vm1, %v8664_v23 }
 0x37f   :  { %6773 = vmatmul.mubr.msk.f32.gmra.mxu1 %vm752_vm1, %v8671_v24 }
 0x380   :  { %6775 = vmatprep.mubr.msk.f32.mxu1 %vm752_vm1, %v8678_v25 }
 0x383   :  { %6776 = vmatmul.mubr.msk.f32.gmra.mxu1 %vm752_vm1, %v8685_v26 }
 0x384   :  { %6778 = vmatprep.mubr.msk.f32.mxu1 %vm752_vm1, %v8692_v27 }
 0x387   :  { %6779 = vmatmul.mubr.msk.f32.gmra.mxu1 %vm752_vm1, %v8699_v36 }
 0x388   :  { %6815 = vmatprep.mubr.msk.f32.mxu1 %vm752_vm1, %v8706_v28 }
 0x433   :  { %v6765_v17 = vpop.f32.mrf.mxu1 }
 0x434   :  { %v1590_v34 = vadd.f32 %v6765_v17, %v296_v52 }
 0x435   :  { %v1530_v10 = vpop.f32.mrf.mxu1 }
 0x436   :  { %v6078_v50 = vmul.f32 -1.442695, %v1590_v34  ;;  %v1589_v43 = vadd.f32 %v1530_v10, %v290_v45 }
 0x437   :  { %v6768_v35 = vpop.f32.mrf.mxu1 }
 0x438   :  { %7214 = vpow2.f32 %v6078_v50  ;;  %v6077_v8 = vmul.f32 -1.442695, %v1589_v43  ;;  %v1592_v53 = vadd.f32 %v6768_v35, %v308_v51 }
 0x439   :  { %v1540_v49 = vpop.f32.mrf.mxu1 }
 0x43a   :  { %7216 = vpow2.f32 %v6077_v8  ;;  %v6080_v29 = vmul.f32 -1.442695, %v1592_v53  ;;  %v1591_v59 = vadd.f32 %v1540_v49, %v302_v40  ;;  %v10289_v53 = vld [vmem:[#allocation32_spill] sm:$0xff] }
 0x43b   :  { %v6771_v38 = vpop.f32.mrf.mxu1  ;;  %v344_v49 = vadd.f32 1.0, %v10289_v53 }
 0x43c   :  { %7218 = vpow2.f32 %v6080_v29  ;;  %v6079_v4 = vmul.f32 -1.442695, %v1591_v59  ;;  %v1618_v33 = vadd.f32 %v6771_v38, %v320_v56 }
 0x43d   :  { %v1550_v60 = vpop.f32.mrf.mxu1 }
 0x43e   :  { %7220 = vpow2.f32 %v6079_v4  ;;  %v1617_v32 = vadd.f32 %v1550_v60, %v314_v15  ;;  %v6082_v6 = vmul.f32 -1.442695, %v1618_v33  ;;  %v10290_v4 = vld [vmem:[#allocation31_spill] sm:$0xff] }
 0x43f   :  { %v6774_v61 = vpop.f32.mrf.mxu1  ;;  %v338_v33 = vadd.f32 1.0, %v10290_v4 }
 0x440   :  { %v1620_v30 = vadd.f32 %v6774_v61, %v332_v55  ;;  %v6081_v3 = vmul.f32 -1.442695, %v1617_v32  ;;  %7222 = vpow2.f32 %v6082_v6  ;;  %v10291_v55 = vld [vmem:[#allocation34_spill] sm:$0xff] }
 0x441   :  { %v1560_v0 = vpop.f32.mrf.mxu1  ;;  %v356_v32 = vadd.f32 1.0, %v10291_v55 }
 0x442   :  { %v6084_v44 = vmul.f32 -1.442695, %v1620_v30  ;;  %v1619_v57 = vadd.f32 %v1560_v0, %v326_v1  ;;  %7224 = vpow2.f32 %v6081_v3  ;;  %v10292_v3 = vld [vmem:[#allocation33_spill] sm:$0xff] }
 0x443   :  { %v6777_v52 = vpop.f32.mrf.mxu1  ;;  %v350_v0 = vadd.f32 1.0, %v10292_v3 }
 0x444   :  { %v6083_v37 = vmul.f32 -1.442695, %v1619_v57  ;;  %7226 = vpow2.f32 %v6084_v44 }
 0x445   :  { %v7215_v39 = vpop.eup %7214  ;;  %v1570_v10 = vpop.f32.mrf.mxu1 }
 0x446   :  { %v1606_v12 = vadd.f32 1.0, %v7215_v39  ;;  %7228 = vpow2.f32 %v6083_v37 }
 0x447   :  { %v7217_v11 = vpop.eup %7216  ;;  %v6780_v29 = vpop.f32.mrf.mxu1 }
 0x448   :  { %7230 = vrcp.f32 %v1606_v12  ;;  %v1605_v2 = vadd.f32 1.0, %v7217_v11 }
 0x449   :  { %v7219_v7 = vpop.eup %7218  ;;  %v1580_v30 = vpop.f32.mrf.mxu1 }
 0x44a   :  { %7232 = vrcp.f32 %v1605_v2  ;;  %v1608_v48 = vadd.f32 1.0, %v7219_v7 }
 0x44b   :  { %v7221_v31 = vpop.eup %7220 }
 0x44c   :  { %7234 = vrcp.f32 %v1608_v48  ;;  %v1607_v62 = vadd.f32 1.0, %v7221_v31 }
 0x44d   :  { %v7223_v17 = vpop.eup %7222 }
 0x44e   :  { %7236 = vrcp.f32 %v1607_v62  ;;  %v1634_v43 = vadd.f32 1.0, %v7223_v17 }
 0x44f   :  { %v7225_v45 = vpop.eup %7224 }
 0x450   :  { %v1633_v56 = vadd.f32 1.0, %v7225_v45  ;;  %7238 = vrcp.f32 %v1634_v43 }
 0x451   :  { %v7227_v34 = vpop.eup %7226 }
 0x452   :  { %v1636_v35 = vadd.f32 1.0, %v7227_v34 }
 0x453   :  { %v7229_v51 = vpop.eup %7228 }
 0x454   :  { %v1635_v59 = vadd.f32 1.0, %v7229_v51  ;;  %7240 = vrcp.f32 %v1636_v35 }
 0x455   :  { %v7231_v50 = vpop.eup %7230  ;;  %7242 = vrcp.f32 %v1633_v56 }
 0x456   :  { %v1646_v40 = vmul.f32 %v7231_v50, %v6777_v52  ;;  %7244 = vrcp.f32 %v1635_v59 }
 0x457   :  { %v7233_v8 = vpop.eup %7232 }
 0x458   :  { %v1645_v38 = vmul.f32 %v7233_v8, %v1570_v10  ;;  %v1650_v60 = vadd.f32 %v1646_v40, %v344_v49 }
 0x459   :  { %v7235_v15 = vpop.eup %7234 }
 0x45a   :  { %v1648_v61 = vmul.f32 %v7235_v15, %v6780_v29  ;;  %v1649_v6 = vadd.f32 %v1645_v38, %v338_v33  ;;  %7246 = vtanh.f32 %v1650_v60  ;;  %v10293_v38 = vld [vmem:[#allocation9_spill] sm:$0xff]  ;;  %v10294_v33 = vld [vmem:[#allocation7_spill] sm:$0xff] }
 0x45b   :  { %v7237_v1 = vpop.eup %7236  ;;  %v431_v15 = vadd.f32 1.0, %v10293_v38  ;;  %v425_v60 = vadd.f32 1.0, %v10294_v33 }
 0x45c   :  { %v1652_v44 = vadd.f32 %v1648_v61, %v356_v32  ;;  %v1647_v57 = vmul.f32 %v7237_v1, %v1580_v30  ;;  %v10295_v61 = vld [vmem:[#allocation13_spill] sm:$0xff] }
 0x45d   :  { %v7239_v39 = vpop.eup %7238  ;;  %v443_v1 = vadd.f32 1.0, %v10295_v61 }
 0x45e   :  { %7248 = vtanh.f32 %v1652_v44  ;;  %v1651_v37 = vadd.f32 %v1647_v57, %v350_v0  ;;  %v1658_v34 = vsub.f32 1.0, %v7239_v39  ;;  %v1666_v53 = vmul.f32 %v7239_v39, %v8607_v54  ;;  %v10296_v0 = vld [vmem:[#allocation11_spill] sm:$0xff] }
 0x45f   :  { %7250 = vtanh.f32 %v1649_v6  ;;  %v437_v44 = vadd.f32 1.0, %v10296_v0 }
 0x460   :  { %7252 = vtanh.f32 %v1651_v37 }
 0x461   :  { %v7241_v12 = vpop.eup %7240 }
 0x462   :  { %v7243_v11 = vpop.eup %7242  ;;  %v1660_v48 = vsub.f32 1.0, %v7241_v12  ;;  %v1668_v17 = vmul.f32 %v7241_v12, %v8613_v9  ;;  %v10297_v12 = vld [vmem:[#allocation17_spill] sm:$0xff] }
 0x463   :  { %v7245_v2 = vpop.eup %7244  ;;  %v1657_v51 = vsub.f32 1.0, %v7243_v11  ;;  %v1665_v29 = vmul.f32 %v7243_v11, %v8611_v42  ;;  %v455_v11 = vadd.f32 1.0, %v10297_v12 }
 0x464   :  { %v1659_v45 = vsub.f32 1.0, %v7245_v2  ;;  %v1667_v35 = vmul.f32 %v7245_v2, %v8617_v46 }
 0x467   :  { %v7247_v7 = vpop.eup %7246 }
 0x468   :  { %v1662_v40 = vmul.f32 %v7247_v7, %v1658_v34  ;;  %v10299_v34 = vld [vmem:[#allocation21_spill] sm:$0xff] }
 0x46a   :  { %v8732_v56 = vadd.f32 %v1666_v53, %v1662_v40  ;;  %v10300_v40 = vld [vmem:[#allocation19_spill] sm:$0xff] }
 0x46b   :  { %v7249_v31 = vpop.eup %7248  ;;  %v461_v53 = vadd.f32 1.0, %v10300_v40 }
 0x46c   :  { %v7251_v62 = vpop.eup %7250  ;;  %v1664_v52 = vmul.f32 %v7249_v31, %v1660_v48  ;;  %v10298_v31 = vld [vmem:[#allocation15_spill] sm:$0xff] }
 0x46d   :  { %v7253_v10 = vpop.eup %7252  ;;  %v1661_v49 = vmul.f32 %v7251_v62, %v1657_v51  ;;  %v449_v62 = vadd.f32 1.0, %v10298_v31  ;;  %v10301_v31 = vld [vmem:[#allocation25_spill] sm:$0xff] }
 0x46e   :  { %v8723_v50 = vadd.f32 %v1668_v17, %v1664_v52  ;;  %v1663_v43 = vmul.f32 %v7253_v10, %v1659_v45  ;;  %v467_v10 = vadd.f32 1.0, %v10299_v34 }
 0x46f   :  { %v8737_v59 = vadd.f32 %v1665_v29, %v1661_v49 }
 0x470   :  { %6781 = vmatprep.subr.mxu0 %v8723_v50  ;;  %v8727_v8 = vadd.f32 %v1667_v35, %v1663_v43 }
 0x471   :  { %6782 = vmatpush3.msra.mxu0 %v8723_v50 }
 0x472   :  { %6783 = vmatprep.subr.mxu0 %v8727_v8 }
 0x473   :  { %6784 = vmatpush3.msra.mxu0 %v8727_v8 }
 0x474   :  { %6785 = vmatprep.subr.mxu0 %v8732_v56 }
 0x475   :  { %6786 = vmatpush3.msra.mxu0 %v8732_v56 }
 0x476   :  { %6787 = vmatprep.subr.mxu0 %v8737_v59 }
 0x477   :  { %6788 = vmatpush3.msra.mxu0 %v8737_v59 }
 0x478   :  { %6790 = vmatmul.mubr.msk.f32.vlgmr.msra.gmra.mxu0 %vm752_vm1, %v8629_v18 }
 0x479   :  { %6792 = vmatprep.mubr.msk.f32.mxu0 %vm752_vm1, %v8636_v19 }
 0x47c   :  { %6793 = vmatmul.mubr.msk.f32.gmra.mxu0 %vm752_vm1, %v8643_v20 }
 0x47d   :  { %6795 = vmatprep.mubr.msk.f32.mxu0 %vm752_vm1, %v8650_v21 }
 0x480   :  { %6796 = vmatmul.mubr.msk.f32.gmra.mxu0 %vm752_vm1, %v8657_v22 }
 0x481   :  { %6798 = vmatprep.mubr.msk.f32.mxu0 %vm752_vm1, %v8664_v23 }
 0x484   :  { %6799 = vmatmul.mubr.msk.f32.gmra.mxu0 %vm752_vm1, %v8671_v24 }
 0x485   :  { %6801 = vmatprep.mubr.msk.f32.mxu0 %vm752_vm1, %v8678_v25 }
 0x488   :  { %6802 = vmatmul.mubr.msk.f32.gmra.mxu0 %vm752_vm1, %v8685_v26 }
 0x489   :  { %6804 = vmatprep.mubr.msk.f32.mxu0 %vm752_vm1, %v8692_v27 }
 0x48c   :  { %6805 = vmatmul.mubr.msk.f32.gmra.mxu0 %vm752_vm1, %v8699_v36 }
 0x48d   :  { %6841 = vmatprep.mubr.msk.f32.mxu0 %vm752_vm1, %v8706_v28 }
 0x538   :  { %v6791_v4 = vpop.f32.mrf.mxu0 }
 0x539   :  { %v1815_v55 = vadd.f32 %v6791_v4, %v431_v15 }
 0x53a   :  { %v1755_v32 = vpop.f32.mrf.mxu0 }
 0x53b   :  { %v6098_v6 = vmul.f32 -1.442695, %v1815_v55  ;;  %v1814_v30 = vadd.f32 %v1755_v32, %v425_v60 }
 0x53c   :  { %v6794_v3 = vpop.f32.mrf.mxu0 }
 0x53d   :  { %7254 = vpow2.f32 %v6098_v6  ;;  %v6097_v57 = vmul.f32 -1.442695, %v1814_v30  ;;  %v1817_v37 = vadd.f32 %v6794_v3, %v443_v1 }
 0x53e   :  { %v1765_v39 = vpop.f32.mrf.mxu0 }
 0x53f   :  { %7256 = vpow2.f32 %v6097_v57  ;;  %v6100_v2 = vmul.f32 -1.442695, %v1817_v37  ;;  %v1816_v7 = vadd.f32 %v1765_v39, %v437_v44 }
 0x540   :  { %v6797_v48 = vpop.f32.mrf.mxu0 }
 0x541   :  { %7258 = vpow2.f32 %v6100_v2  ;;  %v6099_v52 = vmul.f32 -1.442695, %v1816_v7  ;;  %v1843_v17 = vadd.f32 %v6797_v48, %v455_v11 }
 0x542   :  { %v1775_v45 = vpop.f32.mrf.mxu0 }
 0x543   :  { %7260 = vpow2.f32 %v6099_v52  ;;  %v6102_v51 = vmul.f32 -1.442695, %v1843_v17  ;;  %v1842_v43 = vadd.f32 %v1775_v45, %v449_v62  ;;  %v479_v62 = vadd.f32 1.0, %v10301_v31 }
 0x544   :  { %v6800_v35 = vpop.f32.mrf.mxu0 }
 0x545   :  { %v6101_v49 = vmul.f32 -1.442695, %v1842_v43  ;;  %v1845_v29 = vadd.f32 %v6800_v35, %v467_v10  ;;  %7262 = vpow2.f32 %v6102_v51  ;;  %v10302_v10 = vld [vmem:[#allocation23_spill] sm:$0xff] }
 0x546   :  { %v1785_v38 = vpop.f32.mrf.mxu0  ;;  %v473_v51 = vadd.f32 1.0, %v10302_v10 }
 0x547   :  { %v6104_v15 = vmul.f32 -1.442695, %v1845_v29  ;;  %v1844_v4 = vadd.f32 %v1785_v38, %v461_v53  ;;  %7264 = vpow2.f32 %v6101_v49  ;;  %v10303_v53 = vld [vmem:[#allocation29_spill] sm:$0xff] }
 0x548   :  { %v6803_v44 = vpop.f32.mrf.mxu0  ;;  %v491_v49 = vadd.f32 1.0, %v10303_v53 }
 0x549   :  { %v6103_v33 = vmul.f32 -1.442695, %v1844_v4  ;;  %7266 = vpow2.f32 %v6104_v15 }
 0x54a   :  { %v7255_v60 = vpop.eup %7254  ;;  %v1795_v12 = vpop.f32.mrf.mxu0 }
 0x54b   :  { %v1831_v55 = vadd.f32 1.0, %v7255_v60  ;;  %7268 = vpow2.f32 %v6103_v33  ;;  %v10304_v33 = vld [vmem:[#allocation27_spill] sm:$0xff] }
 0x54c   :  { %v7257_v32 = vpop.eup %7256  ;;  %v6806_v34 = vpop.f32.mrf.mxu0  ;;  %v485_v60 = vadd.f32 1.0, %v10304_v33  ;;  %v10307_v33 = vld [vmem:[#allocation14_spill] sm:$0xff] }
 0x54d   :  { %7270 = vrcp.f32 %v1831_v55  ;;  %v1830_v61 = vadd.f32 1.0, %v7257_v32 }
 0x54e   :  { %v7259_v1 = vpop.eup %7258  ;;  %v1805_v4 = vpop.f32.mrf.mxu0 }
 0x54f   :  { %7272 = vrcp.f32 %v1830_v61  ;;  %v1833_v6 = vadd.f32 1.0, %v7259_v1 }
 0x550   :  { %v7261_v30 = vpop.eup %7260 }
 0x551   :  { %7274 = vrcp.f32 %v1833_v6  ;;  %v1832_v3 = vadd.f32 1.0, %v7261_v30 }
 0x552   :  { %v7263_v0 = vpop.eup %7262 }
 0x553   :  { %7276 = vrcp.f32 %v1832_v3  ;;  %v1859_v39 = vadd.f32 1.0, %v7263_v0 }
 0x554   :  { %v7265_v57 = vpop.eup %7264 }
 0x555   :  { %v1858_v2 = vadd.f32 1.0, %v7265_v57  ;;  %7278 = vrcp.f32 %v1859_v39 }
 0x556   :  { %v7267_v37 = vpop.eup %7266 }
 0x557   :  { %v1861_v48 = vadd.f32 1.0, %v7267_v37  ;;  %7280 = vrcp.f32 %v1858_v2 }
 0x558   :  { %v7269_v11 = vpop.eup %7268 }
 0x559   :  { %v1860_v45 = vadd.f32 1.0, %v7269_v11  ;;  %7282 = vrcp.f32 %v1861_v48 }
 0x55a   :  { %v7271_v7 = vpop.eup %7270 }
 0x55b   :  { %v1871_v52 = vmul.f32 %v7271_v7, %v6803_v44 }
 0x55c   :  { %v7273_v17 = vpop.eup %7272 }
 0x55d   :  { %v1875_v43 = vadd.f32 %v1871_v52, %v479_v62  ;;  %v1870_v35 = vmul.f32 %v7273_v17, %v1795_v12 }
 0x55e   :  { %v7275_v40 = vpop.eup %7274 }
 0x55f   :  { %7284 = vtanh.f32 %v1875_v43  ;;  %v1874_v29 = vadd.f32 %v1870_v35, %v473_v51  ;;  %v1873_v38 = vmul.f32 %v7275_v40, %v6806_v34  ;;  %v10305_v40 = vld [vmem:[#allocation10_spill] sm:$0xff] }
 0x560   :  { %v7277_v15 = vpop.eup %7276  ;;  %7286 = vrcp.f32 %v1860_v45  ;;  %v433_v53 = vadd.f32 1.0, %v10305_v40 }
 0x561   :  { %7288 = vtanh.f32 %v1874_v29  ;;  %v1877_v55 = vadd.f32 %v1873_v38, %v491_v49  ;;  %v1872_v32 = vmul.f32 %v7277_v15, %v1805_v4  ;;  %v10306_v29 = vld [vmem:[#allocation8_spill] sm:$0xff] }
 0x562   :  { %v7279_v1 = vpop.eup %7278  ;;  %v427_v38 = vadd.f32 1.0, %v10306_v29 }
 0x563   :  { %7290 = vtanh.f32 %v1877_v55  ;;  %v1876_v61 = vadd.f32 %v1872_v32, %v485_v60  ;;  %v1883_v3 = vsub.f32 1.0, %v7279_v1  ;;  %v1891_v37 = vmul.f32 %v7279_v1, %v8732_v56  ;;  %v10308_v1 = vld [vmem:[#allocation12_spill] sm:$0xff] }
 0x564   :  { %v7281_v6 = vpop.eup %7280  ;;  %v445_v60 = vadd.f32 1.0, %v10307_v33 }
 0x565   :  { %7292 = vtanh.f32 %v1876_v61  ;;  %v1882_v39 = vsub.f32 1.0, %v7281_v6  ;;  %v1890_v48 = vmul.f32 %v7281_v6, %v8737_v59  ;;  %v439_v6 = vadd.f32 1.0, %v10308_v1 }
 0x566   :  { %v7283_v30 = vpop.eup %7282 }
 0x567   :  { %v1885_v11 = vsub.f32 1.0, %v7283_v30  ;;  %v1893_v52 = vmul.f32 %v7283_v30, %v8723_v50 }
 0x56c   :  { %v7285_v0 = vpop.eup %7284 }
 0x56d   :  { %v7287_v44 = vpop.eup %7286  ;;  %v1887_v57 = vmul.f32 %v7285_v0, %v1883_v3 }
 0x56e   :  { %v7289_v12 = vpop.eup %7288  ;;  %v1884_v17 = vsub.f32 1.0, %v7287_v44  ;;  %v1892_v43 = vmul.f32 %v7287_v44, %v8727_v8  ;;  %v10309_v44 = vld [vmem:[#allocation18_spill] sm:$0xff] }
 0x56f   :  { %v8779_v2 = vadd.f32 %v1891_v37, %v1887_v57  ;;  %v1886_v7 = vmul.f32 %v7289_v12, %v1882_v39  ;;  %v10310_v12 = vld [vmem:[#allocation16_spill] sm:$0xff] }
 0x570   :  { %v7291_v31 = vpop.eup %7290 }
 0x571   :  { %v1889_v62 = vmul.f32 %v7291_v31, %v1885_v11  ;;  %v8783_v45 = vadd.f32 %v1890_v48, %v1886_v7  ;;  %v451_v11 = vadd.f32 1.0, %v10310_v12 }
 0x572   :  { %v7293_v34 = vpop.eup %7292 }
 0x573   :  { %v8785_v10 = vadd.f32 %v1893_v52, %v1889_v62  ;;  %v1888_v51 = vmul.f32 %v7293_v34, %v1884_v17  ;;  %v10311_v62 = vld [vmem:[#allocation22_spill] sm:$0xff] }
 0x574   :  { %v469_v52 = vadd.f32 1.0, %v10311_v62 }
 0x575   :  { %6807 = vmatprep.subr.mxu1 %v8785_v10  ;;  %v8789_v35 = vadd.f32 %v1892_v43, %v1888_v51  ;;  %v10312_v51 = vld [vmem:[#allocation20_spill] sm:$0xff] }
 0x576   :  { %6808 = vmatpush3.msra.mxu1 %v8785_v10  ;;  %v463_v43 = vadd.f32 1.0, %v10312_v51 }
 0x577   :  { %6809 = vmatprep.subr.mxu1 %v8789_v35 }
 0x578   :  { %6810 = vmatpush3.msra.mxu1 %v8789_v35 }
 0x579   :  { %6811 = vmatprep.subr.mxu1 %v8779_v2 }
 0x57a   :  { %6812 = vmatpush3.msra.mxu1 %v8779_v2 }
 0x57b   :  { %6813 = vmatprep.subr.mxu1 %v8783_v45 }
 0x57c   :  { %6814 = vmatpush3.msra.mxu1 %v8783_v45 }
 0x57d   :  { %6816 = vmatmul.mubr.msk.f32.vlgmr.msra.gmra.mxu1 %vm752_vm1, %v8629_v18 }
 0x57e   :  { %6818 = vmatprep.mubr.msk.f32.mxu1 %vm752_vm1, %v8636_v19 }
 0x581   :  { %6819 = vmatmul.mubr.msk.f32.gmra.mxu1 %vm752_vm1, %v8643_v20 }
 0x582   :  { %6821 = vmatprep.mubr.msk.f32.mxu1 %vm752_vm1, %v8650_v21 }
 0x585   :  { %6822 = vmatmul.mubr.msk.f32.gmra.mxu1 %vm752_vm1, %v8657_v22 }
 0x586   :  { %6824 = vmatprep.mubr.msk.f32.mxu1 %vm752_vm1, %v8664_v23 }
 0x589   :  { %6825 = vmatmul.mubr.msk.f32.gmra.mxu1 %vm752_vm1, %v8671_v24 }
 0x58a   :  { %6827 = vmatprep.mubr.msk.f32.mxu1 %vm752_vm1, %v8678_v25 }
 0x58d   :  { %6828 = vmatmul.mubr.msk.f32.gmra.mxu1 %vm752_vm1, %v8685_v26 }
 0x58e   :  { %6830 = vmatprep.mubr.msk.f32.mxu1 %vm752_vm1, %v8692_v27 }
 0x591   :  { %6831 = vmatmul.mubr.msk.f32.gmra.mxu1 %vm752_vm1, %v8699_v36 }
 0x592   :  { %6867 = vmatprep.mubr.msk.f32.mxu1 %vm752_vm1, %v8706_v28  ;;  %v457_v28 = vadd.f32 1.0, %v10309_v44 }
 0x63d   :  { %v6817_v49 = vpop.f32.mrf.mxu1 }
 0x63e   :  { %v2040_v15 = vadd.f32 %v6817_v49, %v433_v53 }
 0x63f   :  { %v1980_v4 = vpop.f32.mrf.mxu1 }
 0x640   :  { %v6118_v55 = vmul.f32 -1.442695, %v2040_v15  ;;  %v2039_v32 = vadd.f32 %v1980_v4, %v427_v38 }
 0x641   :  { %v6820_v61 = vpop.f32.mrf.mxu1 }
 0x642   :  { %7294 = vpow2.f32 %v6118_v55  ;;  %v6117_v30 = vmul.f32 -1.442695, %v2039_v32  ;;  %v2042_v3 = vadd.f32 %v6820_v61, %v445_v60 }
 0x643   :  { %v1990_v0 = vpop.f32.mrf.mxu1 }
 0x644   :  { %7296 = vpow2.f32 %v6117_v30  ;;  %v6120_v57 = vmul.f32 -1.442695, %v2042_v3  ;;  %v2041_v37 = vadd.f32 %v1990_v0, %v439_v6 }
 0x645   :  { %v6823_v39 = vpop.f32.mrf.mxu1 }
 0x646   :  { %7298 = vpow2.f32 %v6120_v57  ;;  %v6119_v7 = vmul.f32 -1.442695, %v2041_v37  ;;  %v2068_v48 = vadd.f32 %v6823_v39, %v457_v28 }
 0x647   :  { %v2000_v31 = vpop.f32.mrf.mxu1 }
 0x648   :  { %7300 = vpow2.f32 %v6119_v7  ;;  %v2067_v17 = vadd.f32 %v2000_v31, %v451_v11  ;;  %v6122_v40 = vmul.f32 -1.442695, %v2068_v48  ;;  %v10313_v31 = vld [vmem:[#allocation26_spill] sm:$0xff] }
 0x649   :  { %v6826_v34 = vpop.f32.mrf.mxu1  ;;  %v481_v62 = vadd.f32 1.0, %v10313_v31 }
 0x64a   :  { %v2070_v53 = vadd.f32 %v6826_v34, %v469_v52  ;;  %v6121_v49 = vmul.f32 -1.442695, %v2067_v17  ;;  %7302 = vpow2.f32 %v6122_v40  ;;  %v10314_v40 = vld [vmem:[#allocation24_spill] sm:$0xff] }
 0x64b   :  { %v2010_v29 = vpop.f32.mrf.mxu1 }
 0x64c   :  { %v6124_v38 = vmul.f32 -1.442695, %v2070_v53  ;;  %v2069_v15 = vadd.f32 %v2010_v29, %v463_v43  ;;  %7304 = vpow2.f32 %v6121_v49  ;;  %v475_v53 = vadd.f32 1.0, %v10314_v40  ;;  %v10315_v29 = vld [vmem:[#allocation30_spill] sm:$0xff] }
 0x64d   :  { %v6829_v3 = vpop.f32.mrf.mxu1 }
 0x64e   :  { %v6123_v4 = vmul.f32 -1.442695, %v2069_v15  ;;  %7306 = vpow2.f32 %v6124_v38  ;;  %v493_v38 = vadd.f32 1.0, %v10315_v29 }
 0x64f   :  { %v7295_v33 = vpop.eup %7294  ;;  %v2020_v57 = vpop.f32.mrf.mxu1 }
 0x650   :  { %v2056_v60 = vadd.f32 1.0, %v7295_v33  ;;  %7308 = vpow2.f32 %v6123_v4 }
 0x651   :  { %v7297_v55 = vpop.eup %7296  ;;  %v6832_v17 = vpop.f32.mrf.mxu1 }
 0x652   :  { %7310 = vrcp.f32 %v2056_v60  ;;  %v2055_v32 = vadd.f32 1.0, %v7297_v55  ;;  %v10316_v55 = vld [vmem:[#allocation28_spill] sm:$0xff] }
 0x653   :  { %v7299_v61 = vpop.eup %7298  ;;  %v2030_v60 = vpop.f32.mrf.mxu1 }
 0x654   :  { %7312 = vrcp.f32 %v2055_v32  ;;  %v2058_v1 = vadd.f32 1.0, %v7299_v61  ;;  %v487_v32 = vadd.f32 1.0, %v10316_v55 }
 0x655   :  { %v7301_v6 = vpop.eup %7300 }
 0x656   :  { %7314 = vrcp.f32 %v2058_v1  ;;  %v2057_v30 = vadd.f32 1.0, %v7301_v6 }
 0x657   :  { %v7303_v0 = vpop.eup %7302 }
 0x658   :  { %7316 = vrcp.f32 %v2057_v30  ;;  %v2084_v12 = vadd.f32 1.0, %v7303_v0 }
 0x659   :  { %v7305_v44 = vpop.eup %7304 }
 0x65a   :  { %v2083_v52 = vadd.f32 1.0, %v7305_v44  ;;  %7318 = vrcp.f32 %v2084_v12 }
 0x65b   :  { %v7307_v28 = vpop.eup %7306 }
 0x65c   :  { %v2086_v11 = vadd.f32 1.0, %v7307_v28 }
 0x65d   :  { %v7309_v37 = vpop.eup %7308 }
 0x65e   :  { %v2085_v34 = vadd.f32 1.0, %v7309_v37  ;;  %7320 = vrcp.f32 %v2086_v11 }
 0x65f   :  { %v7311_v39 = vpop.eup %7310  ;;  %7322 = vrcp.f32 %v2083_v52 }
 0x660   :  { %v2096_v7 = vmul.f32 %v7311_v39, %v6829_v3  ;;  %7324 = vrcp.f32 %v2085_v34 }
 0x661   :  { %v7313_v48 = vpop.eup %7312 }
 0x662   :  { %v2095_v51 = vmul.f32 %v7313_v48, %v2020_v57  ;;  %v2100_v49 = vadd.f32 %v2096_v7, %v481_v62 }
 0x663   :  { %v7315_v43 = vpop.eup %7314 }
 0x664   :  { %v2098_v15 = vmul.f32 %v7315_v43, %v6832_v17  ;;  %v2099_v33 = vadd.f32 %v2095_v51, %v475_v53  ;;  %7326 = vtanh.f32 %v2100_v49 }
 0x665   :  { %v7317_v4 = vpop.eup %7316 }
 0x666   :  { %v2102_v61 = vadd.f32 %v2098_v15, %v493_v38  ;;  %v2097_v1 = vmul.f32 %v7317_v4, %v2030_v60  ;;  %v9097_v15 = vld [vmem:[%s10224_s4 + $0xb0] sm:$0xff]  ;;  %v9106_v4 = vld [vmem:[%s10224_s4 + $0xb8] sm:$0xff] }
 0x667   :  { %v7319_v30 = vpop.eup %7318  ;;  %10318 = vst [vmem:[#allocation32_spill] sm:$0xff] %v9106_v4 }
 0x668   :  { %7328 = vtanh.f32 %v2102_v61  ;;  %v2101_v6 = vadd.f32 %v2097_v1, %v487_v32  ;;  %v2108_v48 = vsub.f32 1.0, %v7319_v30  ;;  %v2116_v40 = vmul.f32 %v7319_v30, %v8779_v2  ;;  %v10320_v32 = vld [vmem:[#allocation35_spill] sm:$0xff]  ;;  %v10321_v30 = vld [vmem:[#allocation41_spill] sm:$0xff] }
 0x669   :  { %7330 = vtanh.f32 %v2099_v33  ;;  %v10319_v33 = vld [vmem:[#allocation37_spill] sm:$0xff]  ;;  %v562_v61 = vadd.f32 1.0, %v10320_v32 }
 0x66a   :  { %7332 = vtanh.f32 %v2101_v6  ;;  %v568_v60 = vadd.f32 1.0, %v10319_v33  ;;  %v10325_v33 = vld [vmem:[#allocation49_spill] sm:$0xff] }
 0x66b   :  { %v7321_v3 = vpop.eup %7320 }
 0x66c   :  { %v7323_v0 = vpop.eup %7322  ;;  %v2110_v57 = vsub.f32 1.0, %v7321_v3  ;;  %v2118_v11 = vmul.f32 %v7321_v3, %v8785_v10  ;;  %v580_v3 = vadd.f32 1.0, %v10321_v30 }
 0x66d   :  { %v7325_v44 = vpop.eup %7324  ;;  %v2107_v62 = vsub.f32 1.0, %v7323_v0  ;;  %v2115_v29 = vmul.f32 %v7323_v0, %v8783_v45 }
 0x66e   :  { %v2109_v7 = vsub.f32 1.0, %v7325_v44  ;;  %v2117_v34 = vmul.f32 %v7325_v44, %v8789_v35 }
 0x671   :  { %v7327_v28 = vpop.eup %7326 }
 0x672   :  { %v2112_v51 = vmul.f32 %v7327_v28, %v2108_v48 }
 0x674   :  { %v8844_v49 = vadd.f32 %v2116_v40, %v2112_v51 }
 0x675   :  { %v7329_v37 = vpop.eup %7328 }
 0x676   :  { %v7331_v39 = vpop.eup %7330  ;;  %v2114_v12 = vmul.f32 %v7329_v37, %v2110_v57  ;;  %v10322_v57 = vld [vmem:[#allocation39_spill] sm:$0xff] }
 0x677   :  { %v7333_v31 = vpop.eup %7332  ;;  %v2111_v53 = vmul.f32 %v7331_v39, %v2107_v62  ;;  %v574_v37 = vadd.f32 1.0, %v10322_v57 }
 0x678   :  { %v8835_v52 = vadd.f32 %v2118_v11, %v2114_v12  ;;  %v2113_v17 = vmul.f32 %v7333_v31, %v2109_v7  ;;  %v10323_v7 = vld [vmem:[#allocation45_spill] sm:$0xff] }
 0x679   :  { %v8849_v38 = vadd.f32 %v2115_v29, %v2111_v53  ;;  %v592_v48 = vadd.f32 1.0, %v10323_v7 }
 0x67a   :  { %6833 = vmatprep.subr.mxu0 %v8835_v52  ;;  %v8839_v43 = vadd.f32 %v2117_v34, %v2113_v17  ;;  %v10324_v34 = vld [vmem:[#allocation43_spill] sm:$0xff] }
 0x67b   :  { %6834 = vmatpush3.msra.mxu0 %v8835_v52  ;;  %v586_v51 = vadd.f32 1.0, %v10324_v34 }
 0x67c   :  { %6835 = vmatprep.subr.mxu0 %v8839_v43 }
 0x67d   :  { %6836 = vmatpush3.msra.mxu0 %v8839_v43 }
 0x67e   :  { %6837 = vmatprep.subr.mxu0 %v8844_v49 }
 0x67f   :  { %6838 = vmatpush3.msra.mxu0 %v8844_v49 }
 0x680   :  { %6839 = vmatprep.subr.mxu0 %v8849_v38 }
 0x681   :  { %6840 = vmatpush3.msra.mxu0 %v8849_v38 }
 0x682   :  { %6842 = vmatmul.mubr.msk.f32.vlgmr.msra.gmra.mxu0 %vm752_vm1, %v8629_v18  ;;  %2681 = vmatprep.subr.mxu0 %v8551_v63  ;;  %v8921_v63 = vld [vmem:[%s10223_s3 + $0x18] sm:$0xff] }
 0x683   :  { %2682 = vmatpush1.msra.mxu0 %v8406_v58  ;;  %6844 = vmatprep.mubr.msk.f32.mxu0 %vm752_vm1, %v8636_v19  ;;  %v8898_v58 = vld [vmem:[%s10223_s3 + $0x8] sm:$0xff]  ;;  %v8953_v18 = vld [vmem:[%s10223_s3 + $0x38] sm:$0xff]  ;;  %v8961_v19 = vld [vmem:[%s10223_s3 + $0x40] sm:$0xff] }
 0x684   :  { %2683 = vmatprep.subr.mxu0 %v8555_v16  ;;  %v8929_v16 = vld [vmem:[%s10223_s3 + $0x20] sm:$0xff] }
 0x685   :  { %2684 = vmatpush1.msra.mxu0 %v8409_v14  ;;  %v8910_v14 = vld [vmem:[%s10223_s3 + $0x10] sm:$0xff] }
 0x686   :  { %6845 = vmatmul.mubr.msk.f32.gmra.mxu0 %vm752_vm1, %v8643_v20  ;;  %2685 = vmatprep.subr.mxu0 %v8560_v47  ;;  %v8937_v47 = vld [vmem:[%s10223_s3 + $0x28] sm:$0xff] }
 0x687   :  { %2686 = vmatpush1.msra.mxu0 %v8402_v5  ;;  %6847 = vmatprep.mubr.msk.f32.mxu0 %vm752_vm1, %v8650_v21  ;;  %v10317_v5 = vmov 0.0   ;;  %v8969_v20 = vld [vmem:[%s10223_s3 + $0x48] sm:$0xff]  ;;  %v8977_v21 = vld [vmem:[%s10223_s3 + $0x50] sm:$0xff] }
 0x688   :  { %2687 = vmatprep.subr.mxu0 %v8565_v13  ;;  %v8945_v13 = vld [vmem:[%s10223_s3 + $0x30] sm:$0xff] }
 0x689   :  { %2688 = vmatpush1.msra.mxu0 %v8404_v41  ;;  %v8889_v41 = vld [vmem:[%s10223_s3] sm:$0xff] }
 0x68a   :  { %6848 = vmatmul.mubr.msk.f32.gmra.mxu0 %vm752_vm1, %v8657_v22  ;;  %2955 = vmatprep.subr.mxu0 %v8835_v52  ;;  %v8985_v22 = vld [vmem:[%s10223_s3 + $0x58] sm:$0xff] }
 0x68b   :  { %6850 = vmatprep.mubr.msk.f32.mxu0 %vm752_vm1, %v8664_v23  ;;  %v9027_v23 = vld [vmem:[%s10224_s4 + $0x60] sm:$0xff] }
 0x68e   :  { %6851 = vmatmul.mubr.msk.f32.gmra.mxu0 %vm752_vm1, %v8671_v24  ;;  %v9036_v24 = vld [vmem:[%s10224_s4 + $0x68] sm:$0xff] }
 0x68f   :  { %6853 = vmatprep.mubr.msk.f32.mxu0 %vm752_vm1, %v8678_v25  ;;  %v9041_v25 = vld [vmem:[%s10224_s4 + $0x70] sm:$0xff] }
 0x692   :  { %6854 = vmatmul.mubr.msk.f32.gmra.mxu0 %vm752_vm1, %v8685_v26  ;;  %v9050_v26 = vld [vmem:[%s10224_s4 + $0x78] sm:$0xff] }
 0x693   :  { %6856 = vmatprep.mubr.msk.f32.mxu0 %vm752_vm1, %v8692_v27  ;;  %v9055_v27 = vld [vmem:[%s10224_s4 + $0x80] sm:$0xff] }
 0x696   :  { %6857 = vmatmul.mubr.msk.f32.gmra.mxu0 %vm752_vm1, %v8699_v36  ;;  %v9064_v36 = vld [vmem:[%s10224_s4 + $0x88] sm:$0xff] }
 0x697   :  { %2721 = vmatprep.mubr.f32.mxu0 %v10317_v5 }
 0x69a   :  { %6165 = vmatmul.mubr.msk.f32.vlgmr.msra.gmra.mxu0 %vm752_vm1, %v8889_v41 }
 0x69b   :  { %2956 = vmatpush1.msra.mxu0 %v8785_v10  ;;  %2727 = vmatprep.mubr.f32.mxu0 %v10317_v5  ;;  %v9083_v10 = vld [vmem:[%s10224_s4 + $0xa0] sm:$0xff] }
 0x69c   :  { %2957 = vmatprep.subr.mxu0 %v8839_v43 }
 0x69d   :  { %2958 = vmatpush1.msra.mxu0 %v8789_v35  ;;  %v9092_v35 = vld [vmem:[%s10224_s4 + $0xa8] sm:$0xff] }
 0x69e   :  { %2959 = vmatprep.subr.mxu0 %v8844_v49  ;;  %6166 = vmatmul.mubr.msk.f32.gmra.mxu0 %vm752_vm1, %v8898_v58 }
 0x69f   :  { %2960 = vmatpush1.msra.mxu0 %v8779_v2  ;;  %2733 = vmatprep.mubr.f32.mxu0 %v10317_v5  ;;  %v9069_v2 = vld [vmem:[%s10224_s4 + $0x90] sm:$0xff] }
 0x6a0   :  { %2961 = vmatprep.subr.mxu0 %v8849_v38 }
 0x6a1   :  { %2962 = vmatpush1.msra.mxu0 %v8783_v45  ;;  %v9078_v45 = vld [vmem:[%s10224_s4 + $0x98] sm:$0xff] }
 0x6a2   :  { %6167 = vmatmul.mubr.msk.f32.gmra.mxu0 %vm752_vm1, %v8910_v14  ;;  %6885 = vmatprep.subr.mxu0 %v10317_v5 }
 0x6a3   :  { %2739 = vmatprep.mubr.f32.mxu0 %v10317_v5 }
 0x6a6   :  { %6168 = vmatmul.mubr.msk.f32.gmra.mxu0 %vm752_vm1, %v8921_v63 }
 0x6a7   :  { %2745 = vmatprep.mubr.f32.mxu0 %v10317_v5 }
 0x6aa   :  { %6169 = vmatmul.mubr.msk.f32.gmra.mxu0 %vm752_vm1, %v8929_v16 }
 0x6ab   :  { %2751 = vmatprep.mubr.f32.mxu0 %v10317_v5 }
 0x6ae   :  { %6170 = vmatmul.mubr.msk.f32.gmra.mxu0 %vm752_vm1, %v8937_v47 }
 0x6af   :  { %2757 = vmatprep.mubr.f32.mxu0 %v10317_v5 }
 0x6b2   :  { %6171 = vmatmul.mubr.msk.f32.gmra.mxu0 %vm752_vm1, %v8945_v13 }
 0x6b3   :  { %2763 = vmatprep.mubr.f32.mxu0 %v10317_v5 }
 0x6b6   :  { %6172 = vmatmul.mubr.msk.f32.gmra.mxu0 %vm752_vm1, %v8953_v18 }
 0x6b7   :  { %2769 = vmatprep.mubr.f32.mxu0 %v10317_v5 }
 0x6ba   :  { %6173 = vmatmul.mubr.msk.f32.gmra.mxu0 %vm752_vm1, %v8961_v19 }
 0x6bb   :  { %2775 = vmatprep.mubr.f32.mxu0 %v10317_v5 }
 0x6be   :  { %6174 = vmatmul.mubr.msk.f32.gmra.mxu0 %vm752_vm1, %v8969_v20 }
 0x6bf   :  { %2781 = vmatprep.mubr.f32.mxu0 %v10317_v5 }
 0x6c2   :  { %6175 = vmatmul.mubr.msk.f32.gmra.mxu0 %vm752_vm1, %v8977_v21 }
 0x6c3   :  { %2787 = vmatprep.mubr.f32.mxu0 %v10317_v5 }
 0x6c6   :  { %6176 = vmatmul.mubr.msk.f32.gmra.mxu0 %vm752_vm1, %v8985_v22 }
 0x6c7   :  { %2995 = vmatprep.mubr.f32.mxu0 %v10317_v5 }
 0x6ca   :  { %6189 = vmatmul.mubr.msk.f32.vlgmr.msra.gmra.mxu0 %vm752_vm1, %v8889_v41 }
 0x6cb   :  { %3001 = vmatprep.mubr.f32.mxu0 %v10317_v5  ;;  %6886 = vmatpush3.msra.mxu0 %v10317_v5 }
 0x6ce   :  { %6190 = vmatmul.mubr.msk.f32.gmra.mxu0 %vm752_vm1, %v8898_v58 }
 0x6cf   :  { %3007 = vmatprep.mubr.f32.mxu0 %v10317_v5 }
 0x6d2   :  { %6191 = vmatmul.mubr.msk.f32.gmra.mxu0 %vm752_vm1, %v8910_v14 }
 0x6d3   :  { %3013 = vmatprep.mubr.f32.mxu0 %v10317_v5 }
 0x6d6   :  { %6192 = vmatmul.mubr.msk.f32.gmra.mxu0 %vm752_vm1, %v8921_v63 }
 0x6d7   :  { %3019 = vmatprep.mubr.f32.mxu0 %v10317_v5 }
 0x6da   :  { %6193 = vmatmul.mubr.msk.f32.gmra.mxu0 %vm752_vm1, %v8929_v16 }
 0x6db   :  { %3025 = vmatprep.mubr.f32.mxu0 %v10317_v5 }
 0x6de   :  { %6194 = vmatmul.mubr.msk.f32.gmra.mxu0 %vm752_vm1, %v8937_v47 }
 0x6df   :  { %3031 = vmatprep.mubr.f32.mxu0 %v10317_v5 }
 0x6e2   :  { %6195 = vmatmul.mubr.msk.f32.gmra.mxu0 %vm752_vm1, %v8945_v13 }
 0x6e3   :  { %3037 = vmatprep.mubr.f32.mxu0 %v10317_v5 }
 0x6e6   :  { %6196 = vmatmul.mubr.msk.f32.gmra.mxu0 %vm752_vm1, %v8953_v18 }
 0x6e7   :  { %3043 = vmatprep.mubr.f32.mxu0 %v10317_v5 }
 0x6ea   :  { %6197 = vmatmul.mubr.msk.f32.gmra.mxu0 %vm752_vm1, %v8961_v19 }
 0x6eb   :  { %3049 = vmatprep.mubr.f32.mxu0 %v10317_v5 }
 0x6ee   :  { %6198 = vmatmul.mubr.msk.f32.gmra.mxu0 %vm752_vm1, %v8969_v20 }
 0x6ef   :  { %3055 = vmatprep.mubr.f32.mxu0 %v10317_v5 }
 0x6f2   :  { %6199 = vmatmul.mubr.msk.f32.gmra.mxu0 %vm752_vm1, %v8977_v21 }
 0x6f3   :  { %3061 = vmatprep.mubr.f32.mxu0 %v10317_v5 }
 0x6f6   :  { %6200 = vmatmul.mubr.msk.f32.gmra.mxu0 %vm752_vm1, %v8985_v22 }
 0x6f7   :  { %6887 = vmatprep.mubr.msk.f32.mxu0 %vm752_vm1, %v9027_v23 }
 0x6fa   :  { %6888 = vmatmul.mubr.msk.f32.vlgmr.msra.gmra.mxu0 %vm752_vm1, %v9036_v24 }
 0x6fb   :  { %6890 = vmatprep.mubr.msk.f32.mxu0 %vm752_vm1, %v9041_v25 }
 0x6fe   :  { %6891 = vmatmul.mubr.msk.f32.gmra.mxu0 %vm752_vm1, %v9050_v26 }
 0x6ff   :  { %6893 = vmatprep.mubr.msk.f32.mxu0 %vm752_vm1, %v9055_v27 }
 0x702   :  { %6894 = vmatmul.mubr.msk.f32.gmra.mxu0 %vm752_vm1, %v9064_v36 }
 0x703   :  { %6896 = vmatprep.mubr.msk.f32.mxu0 %vm752_vm1, %v9069_v2 }
 0x706   :  { %6897 = vmatmul.mubr.msk.f32.gmra.mxu0 %vm752_vm1, %v9078_v45 }
 0x707   :  { %6899 = vmatprep.mubr.msk.f32.mxu0 %vm752_vm1, %v9083_v10 }
 0x70a   :  { %6900 = vmatmul.mubr.msk.f32.gmra.mxu0 %vm752_vm1, %v9092_v35 }
 0x70b   :  { %6902 = vmatprep.mubr.msk.f32.mxu0 %vm752_vm1, %v9097_v15 }
 0x70e   :  { %6903 = vmatmul.mubr.msk.f32.gmra.mxu0 %vm752_vm1, %v9106_v4 }
 0x70f   :  { %6939 = vmatprep.mubr.msk.f32.mxu0 %vm752_vm1, %v9027_v23 }
 0x742   :  { %v6843_v55 = vpop.f32.mrf.mxu0 }
 0x743   :  { %v2265_v1 = vadd.f32 %v6843_v55, %v568_v60  ;;  %v604_v60 = vadd.f32 1.0, %v10325_v33 }
 0x744   :  { %v2205_v6 = vpop.f32.mrf.mxu0 }
 0x745   :  { %v6138_v0 = vmul.f32 -1.442695, %v2265_v1  ;;  %v2264_v44 = vadd.f32 %v2205_v6, %v562_v61  ;;  %v10326_v1 = vld [vmem:[#allocation47_spill] sm:$0xff] }
 0x746   :  { %v6846_v28 = vpop.f32.mrf.mxu0  ;;  %v598_v6 = vadd.f32 1.0, %v10326_v1 }
 0x747   :  { %7334 = vpow2.f32 %v6138_v0  ;;  %v6137_v39 = vmul.f32 -1.442695, %v2264_v44  ;;  %v2267_v12 = vadd.f32 %v6846_v28, %v580_v3 }
 0x748   :  { %v2215_v11 = vpop.f32.mrf.mxu0 }
 0x749   :  { %7336 = vpow2.f32 %v6137_v39  ;;  %v6140_v31 = vmul.f32 -1.442695, %v2267_v12  ;;  %v2266_v62 = vadd.f32 %v2215_v11, %v574_v37 }
 0x74a   :  { %v6849_v17 = vpop.f32.mrf.mxu0 }
 0x74b   :  { %7338 = vpow2.f32 %v6140_v31  ;;  %v6139_v40 = vmul.f32 -1.442695, %v2266_v62  ;;  %v2293_v53 = vadd.f32 %v6849_v17, %v592_v48 }
 0x74c   :  { %v2225_v29 = vpop.f32.mrf.mxu0 }
 0x74d   :  { %7340 = vpow2.f32 %v6139_v40  ;;  %v6142_v55 = vmul.f32 -1.442695, %v2293_v53  ;;  %v2292_v32 = vadd.f32 %v2225_v29, %v586_v51 }
 0x74e   :  { %v6852_v61 = vpop.f32.mrf.mxu0 }
 0x74f   :  { %v6141_v30 = vmul.f32 -1.442695, %v2292_v32  ;;  %v2295_v3 = vadd.f32 %v6852_v61, %v604_v60  ;;  %7342 = vpow2.f32 %v6142_v55 }
 0x750   :  { %v2235_v0 = vpop.f32.mrf.mxu0 }
 0x751   :  { %v6144_v44 = vmul.f32 -1.442695, %v2295_v3  ;;  %v2294_v28 = vadd.f32 %v2235_v0, %v598_v6  ;;  %7344 = vpow2.f32 %v6141_v30 }
 0x752   :  { %v6855_v57 = vpop.f32.mrf.mxu0 }
 0x753   :  { %v6143_v37 = vmul.f32 -1.442695, %v2294_v28  ;;  %7346 = vpow2.f32 %v6144_v44 }
 0x754   :  { %v7335_v39 = vpop.eup %7334  ;;  %v2245_v12 = vpop.f32.mrf.mxu0 }
 0x755   :  { %v2281_v11 = vadd.f32 1.0, %v7335_v39  ;;  %7348 = vpow2.f32 %v6143_v37  ;;  %v10330_v37 = vld [vmem:[#allocation53_spill] sm:$0xff] }
 0x756   :  { %v7337_v7 = vpop.eup %7336  ;;  %v6858_v48 = vpop.f32.mrf.mxu0  ;;  %v616_v39 = vadd.f32 1.0, %v10330_v37 }
 0x757   :  { %7350 = vrcp.f32 %v2281_v11  ;;  %v2280_v31 = vadd.f32 1.0, %v7337_v7 }
 0x758   :  { %v7339_v62 = vpop.eup %7338  ;;  %v2255_v17 = vpop.f32.mrf.mxu0 }
 0x759   :  { %7352 = vrcp.f32 %v2280_v31  ;;  %v2283_v34 = vadd.f32 1.0, %v7339_v62 }
 0x75a   :  { %v7341_v51 = vpop.eup %7340  ;;  %v9120_v40 = vpop.f32.mrf.mxu0 }
 0x75b   :  { %7354 = vrcp.f32 %v2283_v34  ;;  %v2282_v53 = vadd.f32 1.0, %v7341_v51  ;;  %v10331_v34 = vld [vmem:[#allocation51_spill] sm:$0xff] }
 0x75c   :  { %v9122_v29 = vpop.f32.mrf.mxu0  ;;  %v7343_v33 = vpop.eup %7342  ;;  %v610_v51 = vadd.f32 1.0, %v10331_v34 }
 0x75d   :  { %10327 = vst [vmem:[#allocation31_spill] sm:$0xff] %v9122_v29  ;;  %7356 = vrcp.f32 %v2282_v53  ;;  %v2309_v1 = vadd.f32 1.0, %v7343_v33 }
 0x75e   :  { %v9124_v60 = vpop.f32.mrf.mxu0  ;;  %v7345_v55 = vpop.eup %7344 }
 0x75f   :  { %v2308_v3 = vadd.f32 1.0, %v7345_v55  ;;  %7358 = vrcp.f32 %v2309_v1 }
 0x760   :  { %v9126_v32 = vpop.f32.mrf.mxu0  ;;  %v7347_v61 = vpop.eup %7346 }
 0x761   :  { %10328 = vst [vmem:[#allocation34_spill] sm:$0xff] %v9126_v32  ;;  %v2311_v44 = vadd.f32 1.0, %v7347_v61  ;;  %7360 = vrcp.f32 %v2308_v3  ;;  %v10333_v61 = vld [vmem:[#allocation57_spill] sm:$0xff] }
 0x762   :  { %v9128_v6 = vpop.f32.mrf.mxu0  ;;  %v7349_v30 = vpop.eup %7348  ;;  %v628_v32 = vadd.f32 1.0, %v10333_v61 }
 0x763   :  { %v2310_v31 = vadd.f32 1.0, %v7349_v30  ;;  %7362 = vrcp.f32 %v2311_v44  ;;  %v10334_v30 = vld [vmem:[#allocation55_spill] sm:$0xff] }
 0x764   :  { %v7351_v0 = vpop.eup %7350  ;;  %v9130_v28 = vpop.f32.mrf.mxu0 }
 0x765   :  { %10329 = vst [vmem:[#allocation33_spill] sm:$0xff] %v9130_v28  ;;  %v2321_v11 = vmul.f32 %v7351_v0, %v6855_v57  ;;  %v622_v0 = vadd.f32 1.0, %v10334_v30 }
 0x766   :  { %v7353_v7 = vpop.eup %7352  ;;  %v9133_v62 = vpop.f32.mrf.mxu0 }
 0x767   :  { %v2325_v53 = vadd.f32 %v2321_v11, %v616_v39  ;;  %v2320_v33 = vmul.f32 %v7353_v7, %v2245_v12 }
 0x768   :  { %v7355_v29 = vpop.eup %7354  ;;  %v9136_v55 = vpop.f32.mrf.mxu0 }
 0x769   :  { %10332 = vst [vmem:[#allocation9_spill] sm:$0xff] %v9136_v55  ;;  %7364 = vtanh.f32 %v2325_v53  ;;  %v2324_v28 = vadd.f32 %v2320_v33, %v610_v51  ;;  %v2323_v37 = vmul.f32 %v7355_v29, %v6858_v48 }
 0x76a   :  { %v7357_v1 = vpop.eup %7356  ;;  %7366 = vrcp.f32 %v2310_v31  ;;  %v9139_v57 = vpop.f32.mrf.mxu0 }
 0x76b   :  { %7368 = vtanh.f32 %v2324_v28  ;;  %v2327_v34 = vadd.f32 %v2323_v37, %v628_v32  ;;  %v2322_v3 = vmul.f32 %v7357_v1, %v2255_v17 }
 0x76c   :  { %v9142_v39 = vpop.f32.mrf.mxu0  ;;  %v7359_v7 = vpop.eup %7358 }
 0x76d   :  { %10335 = vst [vmem:[#allocation7_spill] sm:$0xff] %v9142_v39  ;;  %7370 = vtanh.f32 %v2327_v34  ;;  %v2326_v12 = vadd.f32 %v2322_v3, %v622_v0  ;;  %v2333_v53 = vsub.f32 1.0, %v7359_v7  ;;  %v2341_v61 = vmul.f32 %v7359_v7, %v8844_v49 }
 0x76e   :  { %v9144_v44 = vpop.f32.mrf.mxu0  ;;  %v7361_v29 = vpop.eup %7360 }
 0x76f   :  { %7372 = vtanh.f32 %v2326_v12  ;;  %v2332_v37 = vsub.f32 1.0, %v7361_v29  ;;  %v2340_v12 = vmul.f32 %v7361_v29, %v8849_v38 }
 0x770   :  { %v9146_v11 = vpop.f32.mrf.mxu0  ;;  %v7363_v51 = vpop.eup %7362 }
 0x771   :  { %10336 = vst [vmem:[#allocation13_spill] sm:$0xff] %v9146_v11  ;;  %v2335_v0 = vsub.f32 1.0, %v7363_v51  ;;  %v2343_v55 = vmul.f32 %v7363_v51, %v8835_v52 }
 0x772   :  { %v9148_v48 = vpop.f32.mrf.mxu0 }
 0x774   :  { %v9150_v31 = vpop.f32.mrf.mxu0 }
 0x775   :  { %10337 = vst [vmem:[#allocation11_spill] sm:$0xff] %v9150_v31 }
 0x776   :  { %v7365_v28 = vpop.eup %7364  ;;  %v9152_v32 = vpop.f32.mrf.mxu0 }
 0x777   :  { %v7367_v17 = vpop.eup %7366  ;;  %v2337_v33 = vmul.f32 %v7365_v28, %v2333_v53 }
 0x778   :  { %v7369_v1 = vpop.eup %7368  ;;  %v9155_v30 = vpop.f32.mrf.mxu0  ;;  %v2334_v4 = vsub.f32 1.0, %v7367_v17 }
 0x779   :  { %10338 = vst [vmem:[#allocation17_spill] sm:$0xff] %v9155_v30  ;;  %v9157_v34 = vadd.f32 %v2341_v61, %v2337_v33  ;;  %v2336_v3 = vmul.f32 %v7369_v1, %v2332_v37  ;;  %v2342_v33 = vmul.f32 %v7367_v17, %v8839_v43 }
 0x77a   :  { %v7371_v31 = vpop.eup %7370  ;;  %v9160_v39 = vpop.f32.mrf.mxu0 }
 0x77b   :  { %v2339_v11 = vmul.f32 %v7371_v31, %v2335_v0  ;;  %v9163_v53 = vadd.f32 %v2340_v12, %v2336_v3  ;;  %v7882_v0 = vld [vmem:[%s10224_s4 + $0x48] sm:$0xff]  ;;  %v7883_v3 = vld [vmem:[%s10224_s4 + $0x50] sm:$0xff] }
 0x77c   :  { %v7373_v49 = vpop.eup %7372  ;;  %v9165_v7 = vpop.f32.mrf.mxu0 }
 0x77d   :  { %v9167_v28 = vadd.f32 %v2343_v55, %v2339_v11  ;;  %v2338_v30 = vmul.f32 %v7373_v49, %v2334_v4  ;;  %v7874_v55 = vld [vmem:[%s10224_s4 + $0x8] sm:$0xff]  ;;  %v7875_v11 = vld [vmem:[%s10224_s4 + $0x10] sm:$0xff] }
 0x77e   :  { %v9170_v61 = vpop.f32.mrf.mxu0 }
 0x77f   :  { %6859 = vmatprep.subr.mxu1 %v9167_v28  ;;  %v9173_v38 = vadd.f32 %v2342_v33, %v2338_v30  ;;  %v7884_v33 = vld [vmem:[%s10224_s4 + $0x58] sm:$0xff] }
 0x780   :  { %6860 = vmatpush3.msra.mxu1 %v9167_v28  ;;  %v9176_v52 = vpop.f32.mrf.mxu0 }
 0x781   :  { %6861 = vmatprep.subr.mxu1 %v9173_v38 }
 0x782   :  { %6862 = vmatpush3.msra.mxu1 %v9173_v38  ;;  %v9180_v29 = vpop.f32.mrf.mxu0 }
 0x783   :  { %6863 = vmatprep.subr.mxu1 %v9157_v34 }
 0x784   :  { %6864 = vmatpush3.msra.mxu1 %v9157_v34  ;;  %v9184_v43 = vpop.f32.mrf.mxu0 }
 0x785   :  { %6865 = vmatprep.subr.mxu1 %v9163_v53 }
 0x786   :  { %6866 = vmatpush3.msra.mxu1 %v9163_v53  ;;  %v9188_v4 = vpop.f32.mrf.mxu0 }
 0x787   :  { %6868 = vmatmul.mubr.msk.f32.vlgmr.msra.gmra.mxu1 %vm752_vm1, %v7874_v55  ;;  %2818 = vmatprep.subr.mxu1 %v8723_v50  ;;  %v7876_v50 = vld [vmem:[%s10224_s4 + $0x18] sm:$0xff] }
 0x788   :  { %2819 = vmatpush1.msra.mxu1 %v8613_v9  ;;  %6870 = vmatprep.mubr.msk.f32.mxu1 %vm752_vm1, %v7875_v11  ;;  %v9200_v31 = vpop.f32.mrf.mxu0  ;;  %v7877_v9 = vld [vmem:[%s10224_s4 + $0x20] sm:$0xff] }
 0x789   :  { %2820 = vmatprep.subr.mxu1 %v8727_v8 }
 0x78a   :  { %2821 = vmatpush1.msra.mxu1 %v8617_v46  ;;  %v9204_v51 = vpop.f32.mrf.mxu0 }
 0x78b   :  { %6871 = vmatmul.mubr.msk.f32.gmra.mxu1 %vm752_vm1, %v7876_v50  ;;  %2822 = vmatprep.subr.mxu1 %v8732_v56  ;;  %v7878_v56 = vld [vmem:[%s10224_s4 + $0x28] sm:$0xff] }
 0x78c   :  { %2823 = vmatpush1.msra.mxu1 %v8607_v54  ;;  %6873 = vmatprep.mubr.msk.f32.mxu1 %vm752_vm1, %v7877_v9  ;;  %v9216_v8 = vpop.f32.mrf.mxu0  ;;  %v7879_v54 = vld [vmem:[%s10224_s4 + $0x30] sm:$0xff] }
 0x78d   :  { %10339 = vst [vmem:[#allocation15_spill] sm:$0xff] %v9216_v8  ;;  %2824 = vmatprep.subr.mxu1 %v8737_v59  ;;  %v7881_v59 = vld [vmem:[%s10224_s4 + $0x40] sm:$0xff] }
 0x78e   :  { %2825 = vmatpush1.msra.mxu1 %v8611_v42  ;;  %v9220_v46 = vpop.f32.mrf.mxu0  ;;  %v7880_v42 = vld [vmem:[%s10224_s4 + $0x38] sm:$0xff] }
 0x78f   :  { %6874 = vmatmul.mubr.msk.f32.gmra.mxu1 %vm752_vm1, %v7878_v56 }
 0x790   :  { %6876 = vmatprep.mubr.msk.f32.mxu1 %vm752_vm1, %v7879_v54  ;;  %v9230_v17 = vpop.f32.mrf.mxu0 }
 0x791   :  { %10340 = vst [vmem:[#allocation21_spill] sm:$0xff] %v9230_v17  ;;  %v10400_v17 = vld [vmem:[#allocation13_spill] sm:$0xff] }
 0x792   :  { %v9232_v37 = vpop.f32.mrf.mxu0 }
 0x793   :  { %6877 = vmatmul.mubr.msk.f32.gmra.mxu1 %vm752_vm1, %v7880_v42 }
 0x794   :  { %6879 = vmatprep.mubr.msk.f32.mxu1 %vm752_vm1, %v7881_v59  ;;  %v9242_v1 = vpop.f32.mrf.mxu0 }
 0x795   :  { %10341 = vst [vmem:[#allocation19_spill] sm:$0xff] %v9242_v1 }
 0x796   :  { %v9244_v30 = vpop.f32.mrf.mxu0 }
 0x797   :  { %6880 = vmatmul.mubr.msk.f32.gmra.mxu1 %vm752_vm1, %v7882_v0 }
 0x798   :  { %6882 = vmatprep.mubr.msk.f32.mxu1 %vm752_vm1, %v7883_v3  ;;  %v9254_v12 = vpop.f32.mrf.mxu0 }
 0x799   :  { %10342 = vst [vmem:[#allocation25_spill] sm:$0xff] %v9254_v12  ;;  %v10399_v12 = vld [vmem:[#allocation33_spill] sm:$0xff] }
 0x79a   :  { %v9256_v49 = vpop.f32.mrf.mxu0 }
 0x79b   :  { %6883 = vmatmul.mubr.msk.f32.gmra.mxu1 %vm752_vm1, %v7884_v33  ;;  %v2730_v33 = vadd.f32 1.0, %v9124_v60  ;;  %v2736_v60 = vadd.f32 1.0, %v9128_v6 }
 0x79c   :  { %v9262_v55 = vpop.f32.mrf.mxu0  ;;  %2858 = vmatprep.mubr.f32.mxu1 %v10317_v5 }
 0x79d   :  { %10343 = vst [vmem:[#allocation23_spill] sm:$0xff] %v9262_v55 }
 0x79e   :  { %v9265_v11 = vpop.f32.mrf.mxu0 }
 0x79f   :  { %6177 = vmatmul.mubr.msk.f32.vlgmr.msra.gmra.mxu1 %vm752_vm1, %v8889_v41 }
 0x7a0   :  { %v9269_v50 = vpop.f32.mrf.mxu0  ;;  %2864 = vmatprep.mubr.f32.mxu1 %v10317_v5 }
 0x7a1   :  { %10344 = vst [vmem:[#allocation29_spill] sm:$0xff] %v9269_v50 }
 0x7a2   :  { %v9272_v9 = vpop.f32.mrf.mxu0 }
 0x7a3   :  { %6178 = vmatmul.mubr.msk.f32.gmra.mxu1 %vm752_vm1, %v8898_v58 }
 0x7a4   :  { %v9276_v56 = vpop.f32.mrf.mxu0  ;;  %2870 = vmatprep.mubr.f32.mxu1 %v10317_v5 }
 0x7a5   :  { %10345 = vst [vmem:[#allocation27_spill] sm:$0xff] %v9276_v56 }
 0x7a6   :  { %v9279_v54 = vpop.f32.mrf.mxu0 }
 0x7a7   :  { %6179 = vmatmul.mubr.msk.f32.gmra.mxu1 %vm752_vm1, %v8910_v14 }
 0x7a8   :  { %v9283_v42 = vpop.f32.mrf.mxu0  ;;  %2876 = vmatprep.mubr.f32.mxu1 %v10317_v5 }
 0x7a9   :  { %10346 = vst [vmem:[#allocation10_spill] sm:$0xff] %v9283_v42 }
 0x7aa   :  { %v9286_v41 = vpop.f32.mrf.mxu0 }
 0x7ab   :  { %10347 = vst [vmem:[#allocation8_spill] sm:$0xff] %v9286_v41  ;;  %6180 = vmatmul.mubr.msk.f32.gmra.mxu1 %vm752_vm1, %v8921_v63 }
 0x7ac   :  { %v9290_v59 = vpop.f32.mrf.mxu0  ;;  %2882 = vmatprep.mubr.f32.mxu1 %v10317_v5 }
 0x7ad   :  { %10348 = vst [vmem:[#allocation14_spill] sm:$0xff] %v9290_v59  ;;  %v2724_v59 = vadd.f32 1.0, %v9120_v40 }
 0x7ae   :  { %v9293_v58 = vpop.f32.mrf.mxu0 }
 0x7af   :  { %10349 = vst [vmem:[#allocation12_spill] sm:$0xff] %v9293_v58  ;;  %6181 = vmatmul.mubr.msk.f32.gmra.mxu1 %vm752_vm1, %v8929_v16 }
 0x7b0   :  { %v9297_v0 = vpop.f32.mrf.mxu0  ;;  %2888 = vmatprep.mubr.f32.mxu1 %v10317_v5 }
 0x7b1   :  { %10350 = vst [vmem:[#allocation18_spill] sm:$0xff] %v9297_v0 }
 0x7b2   :  { %v9300_v14 = vpop.f32.mrf.mxu0 }
 0x7b3   :  { %10351 = vst [vmem:[#allocation16_spill] sm:$0xff] %v9300_v14  ;;  %6182 = vmatmul.mubr.msk.f32.gmra.mxu1 %vm752_vm1, %v8937_v47  ;;  %v2742_v47 = vadd.f32 1.0, %v9133_v62 }
 0x7b4   :  { %v9304_v3 = vpop.f32.mrf.mxu0  ;;  %2894 = vmatprep.mubr.f32.mxu1 %v10317_v5 }
 0x7b5   :  { %10352 = vst [vmem:[#allocation22_spill] sm:$0xff] %v9304_v3 }
 0x7b6   :  { %v9307_v63 = vpop.f32.mrf.mxu0 }
 0x7b7   :  { %10353 = vst [vmem:[#allocation20_spill] sm:$0xff] %v9307_v63  ;;  %6183 = vmatmul.mubr.msk.f32.gmra.mxu1 %vm752_vm1, %v8945_v13 }
 0x7b8   :  { %v9312_v16 = vpop.f32.mrf.mxu0  ;;  %2900 = vmatprep.mubr.f32.mxu1 %v10317_v5 }
 0x7b9   :  { %10354 = vst [vmem:[#allocation26_spill] sm:$0xff] %v9312_v16  ;;  %v2754_v16 = vadd.f32 1.0, %v9144_v44 }
 0x7ba   :  { %v6889_v0 = vpop.f32.mrf.mxu0 }
 0x7bb   :  { %v3488_v56 = vadd.f32 %v6889_v0, %v2730_v33  ;;  %6184 = vmatmul.mubr.msk.f32.gmra.mxu1 %vm752_vm1, %v8953_v18  ;;  %v2748_v18 = vadd.f32 1.0, %v9139_v57 }
 0x7bc   :  { %v3428_v3 = vpop.f32.mrf.mxu0  ;;  %2906 = vmatprep.mubr.f32.mxu1 %v10317_v5 }
 0x7bd   :  { %v6238_v42 = vmul.f32 -1.442695, %v3488_v56  ;;  %v3487_v13 = vadd.f32 %v3428_v3, %v2724_v59  ;;  %v2766_v56 = vadd.f32 1.0, %v9152_v32 }
 0x7be   :  { %v6892_v55 = vpop.f32.mrf.mxu0 }
 0x7bf   :  { %7374 = vpow2.f32 %v6238_v42  ;;  %v6237_v50 = vmul.f32 -1.442695, %v3487_v13  ;;  %v3490_v40 = vadd.f32 %v6892_v55, %v2742_v47  ;;  %6185 = vmatmul.mubr.msk.f32.gmra.mxu1 %vm752_vm1, %v8961_v19  ;;  %v2760_v19 = vadd.f32 1.0, %v9148_v48 }
 0x7c0   :  { %v3438_v62 = vpop.f32.mrf.mxu0  ;;  %2912 = vmatprep.mubr.f32.mxu1 %v10317_v5  ;;  %v10231_v48 = vmov 0  }
 0x7c1   :  { %7376 = vpow2.f32 %v6237_v50  ;;  %v6240_v0 = vmul.f32 -1.442695, %v3490_v40  ;;  %v3489_v33 = vadd.f32 %v3438_v62, %v2736_v60  ;;  %7092 = vset.pattern.permute.xlu0 %v10231_v48  ;;  %7093 = vset.pattern.permute.xlu1 %v10231_v48 }
 0x7c2   :  { %v6895_v6 = vpop.f32.mrf.mxu0 }
 0x7c3   :  { %7378 = vpow2.f32 %v6240_v0  ;;  %v6239_v59 = vmul.f32 -1.442695, %v3489_v33  ;;  %v3516_v44 = vadd.f32 %v6895_v6, %v2754_v16  ;;  %6186 = vmatmul.mubr.msk.f32.gmra.mxu1 %vm752_vm1, %v8969_v20 }
 0x7c4   :  { %v3448_v55 = vpop.f32.mrf.mxu0  ;;  %2918 = vmatprep.mubr.f32.mxu1 %v10317_v5 }
 0x7c5   :  { %7380 = vpow2.f32 %v6239_v59  ;;  %v6242_v42 = vmul.f32 -1.442695, %v3516_v44  ;;  %v3515_v57 = vadd.f32 %v3448_v55, %v2748_v18 }
 0x7c6   :  { %v6898_v50 = vpop.f32.mrf.mxu0 }
 0x7c7   :  { %7382 = vpow2.f32 %v6242_v42  ;;  %v6241_v3 = vmul.f32 -1.442695, %v3515_v57  ;;  %v3518_v47 = vadd.f32 %v6898_v50, %v2766_v56  ;;  %6187 = vmatmul.mubr.msk.f32.gmra.mxu1 %vm752_vm1, %v8977_v21  ;;  %v2778_v50 = vadd.f32 1.0, %v9170_v61 }
 0x7c8   :  { %v3458_v32 = vpop.f32.mrf.mxu0  ;;  %2924 = vmatprep.mubr.f32.mxu1 %v10317_v5  ;;  %v2784_v61 = vadd.f32 1.0, %v9180_v29 }
 0x7c9   :  { %7384 = vpow2.f32 %v6241_v3  ;;  %v6244_v20 = vmul.f32 -1.442695, %v3518_v47  ;;  %v3517_v16 = vadd.f32 %v3458_v32, %v2760_v19 }
 0x7ca   :  { %v6901_v59 = vpop.f32.mrf.mxu0 }
 0x7cb   :  { %7386 = vpow2.f32 %v6244_v20  ;;  %v6243_v60 = vmul.f32 -1.442695, %v3517_v16  ;;  %6188 = vmatmul.mubr.msk.f32.gmra.mxu1 %vm752_vm1, %v8985_v22  ;;  %v2772_v16 = vadd.f32 1.0, %v9160_v39 }
 0x7cc   :  { %v7375_v13 = vpop.eup %7374  ;;  %3132 = vmatprep.mubr.f32.mxu1 %v10317_v5  ;;  %v3468_v57 = vpop.f32.mrf.mxu0 }
 0x7cd   :  { %v3504_v21 = vadd.f32 1.0, %v7375_v13  ;;  %7388 = vpow2.f32 %v6243_v60 }
 0x7ce   :  { %v7377_v40 = vpop.eup %7376  ;;  %v6904_v20 = vpop.f32.mrf.mxu0 }
 0x7cf   :  { %7390 = vrcp.f32 %v3504_v21  ;;  %v3503_v62 = vadd.f32 1.0, %v7377_v40  ;;  %v2790_v21 = vadd.f32 1.0, %v9188_v4 }
 0x7d0   :  { %v7379_v18 = vpop.eup %7378 }
 0x7d1   :  { %7392 = vrcp.f32 %v3503_v62  ;;  %v3506_v0 = vadd.f32 1.0, %v7379_v18 }
 0x7d2   :  { %v7381_v33 = vpop.eup %7380 }
 0x7d3   :  { %7394 = vrcp.f32 %v3506_v0  ;;  %v3505_v6 = vadd.f32 1.0, %v7381_v33  ;;  %v3478_v0 = vpop.f32.mrf.mxu0 }
 0x7d4   :  { %v7383_v22 = vpop.eup %7382 }
 0x7d5   :  { %7396 = vrcp.f32 %v3505_v6  ;;  %v3532_v44 = vadd.f32 1.0, %v7383_v22 }
 0x7d6   :  { %v7385_v56 = vpop.eup %7384 }
 0x7d7   :  { %v3531_v19 = vadd.f32 1.0, %v7385_v56  ;;  %7398 = vrcp.f32 %v3532_v44 }
 0x7d8   :  { %v7387_v55 = vpop.eup %7386 }
 0x7d9   :  { %v3534_v3 = vadd.f32 1.0, %v7387_v55  ;;  %7400 = vrcp.f32 %v3531_v19 }
 0x7da   :  { %v7389_v42 = vpop.eup %7388 }
 0x7db   :  { %v3533_v32 = vadd.f32 1.0, %v7389_v42  ;;  %7402 = vrcp.f32 %v3534_v3 }
 0x7dc   :  { %v7391_v47 = vpop.eup %7390 }
 0x7dd   :  { %v3544_v60 = vmul.f32 %v7391_v47, %v6901_v59  ;;  %7404 = vrcp.f32 %v3533_v32 }
 0x7de   :  { %v7393_v13 = vpop.eup %7392 }
 0x7df   :  { %v3548_v40 = vadd.f32 %v3544_v60, %v2778_v50  ;;  %v3543_v62 = vmul.f32 %v7393_v13, %v3468_v57 }
 0x7e0   :  { %v7395_v18 = vpop.eup %7394 }
 0x7e1   :  { %7406 = vtanh.f32 %v3548_v40  ;;  %v3547_v33 = vadd.f32 %v3543_v62, %v2772_v16  ;;  %v3546_v6 = vmul.f32 %v7395_v18, %v6904_v20 }
 0x7e2   :  { %v7397_v22 = vpop.eup %7396 }
 0x7e3   :  { %7408 = vtanh.f32 %v3547_v33  ;;  %v3550_v56 = vadd.f32 %v3546_v6, %v2790_v21  ;;  %v3545_v39 = vmul.f32 %v7397_v22, %v3478_v0 }
 0x7e4   :  { %v7399_v44 = vpop.eup %7398 }
 0x7e5   :  { %7410 = vtanh.f32 %v3550_v56  ;;  %v3549_v59 = vadd.f32 %v3545_v39, %v2784_v61  ;;  %v3556_v55 = vsub.f32 1.0, %v7399_v44  ;;  %v3564_v57 = vmul.f32 0.0, %v7399_v44  ;;  %v10359_v56 = vld [vmem:[#allocation38_spill] sm:$0xff]  ;;  %v10360_v44 = vld [vmem:[#allocation36_spill] sm:$0xff] }
 0x7e6   :  { %v7401_v4 = vpop.eup %7400  ;;  %v570_v39 = vadd.f32 1.0, %v10359_v56 }
 0x7e7   :  { %7412 = vtanh.f32 %v3549_v59  ;;  %v3555_v50 = vsub.f32 1.0, %v7401_v4  ;;  %v3563_v32 = vmul.f32 0.0, %v7401_v4  ;;  %v564_v4 = vadd.f32 1.0, %v10360_v44 }
 0x7e8   :  { %v7403_v19 = vpop.eup %7402 }
 0x7e9   :  { %v3558_v47 = vsub.f32 1.0, %v7403_v19  ;;  %v3566_v20 = vmul.f32 0.0, %v7403_v19 }
 0x7ea   :  { %v7405_v42 = vpop.eup %7404 }
 0x7eb   :  { %v3557_v60 = vsub.f32 1.0, %v7405_v42  ;;  %v3565_v18 = vmul.f32 0.0, %v7405_v42 }
 0x7ee   :  { %v7407_v3 = vpop.eup %7406 }
 0x7ef   :  { %v3560_v29 = vmul.f32 %v7407_v3, %v3556_v55 }
 0x7f0   :  { %v7409_v16 = vpop.eup %7408 }
 0x7f1   :  { %v9343_v13 = vadd.f32 %v3564_v57, %v3560_v29  ;;  %v3559_v21 = vmul.f32 %v7409_v16, %v3555_v50  ;;  %v10361_v57 = vld [vmem:[#allocation42_spill] sm:$0xff]  ;;  %v10362_v29 = vld [vmem:[#allocation40_spill] sm:$0xff] }
 0x7f2   :  { %v7411_v40 = vpop.eup %7410  ;;  %v582_v50 = vadd.f32 1.0, %v10361_v57 }
 0x7f3   :  { %10355 = vst [vmem:[#allocation24_spill] sm:$0xff] %v9343_v13  ;;  %v3562_v62 = vmul.f32 %v7411_v40, %v3558_v47  ;;  %v9345_v0 = vadd.f32 %v3563_v32, %v3559_v21  ;;  %v576_v32 = vadd.f32 1.0, %v10362_v29  ;;  %v10363_v21 = vld [vmem:[#allocation46_spill] sm:$0xff] }
 0x7f4   :  { %v7413_v61 = vpop.eup %7412  ;;  %v594_v40 = vadd.f32 1.0, %v10363_v21 }
 0x7f5   :  { %10356 = vst [vmem:[#allocation30_spill] sm:$0xff] %v9345_v0  ;;  %v9347_v33 = vadd.f32 %v3566_v20, %v3562_v62  ;;  %v3561_v6 = vmul.f32 %v7413_v61, %v3557_v60 }
 0x7f7   :  { %10357 = vst [vmem:[#allocation28_spill] sm:$0xff] %v9347_v33  ;;  %v9349_v22 = vadd.f32 %v3565_v18, %v3561_v6  ;;  %v10364_v6 = vld [vmem:[#allocation44_spill] sm:$0xff] }
 0x7f8   :  { %v588_v56 = vadd.f32 1.0, %v10364_v6 }
 0x7f9   :  { %10358 = vst [vmem:[#allocation37_spill] sm:$0xff] %v9349_v22 }
 0x847   :  { %v6869_v59 = vpop.f32.mrf.mxu1 }
 0x848   :  { %v2490_v55 = vadd.f32 %v6869_v59, %v570_v39 }
 0x849   :  { %v2430_v19 = vpop.f32.mrf.mxu1 }
 0x84a   :  { %v6158_v3 = vmul.f32 -1.442695, %v2490_v55  ;;  %v2489_v47 = vadd.f32 %v2430_v19, %v564_v4  ;;  %v10365_v4 = vld [vmem:[#allocation50_spill] sm:$0xff] }
 0x84b   :  { %v6872_v42 = vpop.f32.mrf.mxu1  ;;  %v606_v55 = vadd.f32 1.0, %v10365_v4 }
 0x84c   :  { %7414 = vpow2.f32 %v6158_v3  ;;  %v6157_v16 = vmul.f32 -1.442695, %v2489_v47  ;;  %v2492_v20 = vadd.f32 %v6872_v42, %v582_v50  ;;  %v10366_v3 = vld [vmem:[#allocation48_spill] sm:$0xff] }
 0x84d   :  { %v2440_v60 = vpop.f32.mrf.mxu1  ;;  %v600_v50 = vadd.f32 1.0, %v10366_v3 }
 0x84e   :  { %7416 = vpow2.f32 %v6157_v16  ;;  %v6160_v62 = vmul.f32 -1.442695, %v2492_v20  ;;  %v2491_v18 = vadd.f32 %v2440_v60, %v576_v32 }
 0x84f   :  { %v6875_v61 = vpop.f32.mrf.mxu1 }
 0x850   :  { %7418 = vpow2.f32 %v6160_v62  ;;  %v6159_v39 = vmul.f32 -1.442695, %v2491_v18  ;;  %v2518_v59 = vadd.f32 %v6875_v61, %v594_v40 }
 0x851   :  { %v2450_v44 = vpop.f32.mrf.mxu1 }
 0x852   :  { %7420 = vpow2.f32 %v6159_v39  ;;  %v2517_v19 = vadd.f32 %v2450_v44, %v588_v56  ;;  %v6162_v47 = vmul.f32 -1.442695, %v2518_v59 }
 0x853   :  { %v6878_v57 = vpop.f32.mrf.mxu1 }
 0x854   :  { %v2520_v42 = vadd.f32 %v6878_v57, %v606_v55  ;;  %v6161_v29 = vmul.f32 -1.442695, %v2517_v19  ;;  %7422 = vpow2.f32 %v6162_v47 }
 0x855   :  { %v2460_v16 = vpop.f32.mrf.mxu1 }
 0x856   :  { %v6164_v20 = vmul.f32 -1.442695, %v2520_v42  ;;  %v2519_v32 = vadd.f32 %v2460_v16, %v600_v50  ;;  %7424 = vpow2.f32 %v6161_v29  ;;  %v10367_v16 = vld [vmem:[#allocation54_spill] sm:$0xff] }
 0x857   :  { %v6881_v59 = vpop.f32.mrf.mxu1 }
 0x858   :  { %v6163_v60 = vmul.f32 -1.442695, %v2519_v32  ;;  %7426 = vpow2.f32 %v6164_v20  ;;  %v618_v20 = vadd.f32 1.0, %v10367_v16 }
 0x859   :  { %v7415_v21 = vpop.eup %7414  ;;  %v2470_v19 = vpop.f32.mrf.mxu1 }
 0x85a   :  { %v2506_v62 = vadd.f32 1.0, %v7415_v21  ;;  %7428 = vpow2.f32 %v6163_v60 }
 0x85b   :  { %v7417_v40 = vpop.eup %7416  ;;  %v6884_v60 = vpop.f32.mrf.mxu1 }
 0x85c   :  { %7430 = vrcp.f32 %v2506_v62  ;;  %v2505_v18 = vadd.f32 1.0, %v7417_v40 }
 0x85d   :  { %v7419_v61 = vpop.eup %7418 }
 0x85e   :  { %7432 = vrcp.f32 %v2505_v18  ;;  %v2508_v6 = vadd.f32 1.0, %v7419_v61  ;;  %v10368_v18 = vld [vmem:[#allocation52_spill] sm:$0xff] }
 0x85f   :  { %v7421_v56 = vpop.eup %7420  ;;  %v612_v61 = vadd.f32 1.0, %v10368_v18 }
 0x860   :  { %7434 = vrcp.f32 %v2508_v6  ;;  %v2507_v39 = vadd.f32 1.0, %v7421_v56  ;;  %v10369_v56 = vld [vmem:[#allocation58_spill] sm:$0xff] }
 0x861   :  { %v7423_v44 = vpop.eup %7422 }
 0x862   :  { %7436 = vrcp.f32 %v2507_v39  ;;  %v2534_v50 = vadd.f32 1.0, %v7423_v44  ;;  %v630_v39 = vadd.f32 1.0, %v10369_v56 }
 0x863   :  { %v7425_v4 = vpop.eup %7424 }
 0x864   :  { %v2533_v32 = vadd.f32 1.0, %v7425_v4  ;;  %7438 = vrcp.f32 %v2534_v50 }
 0x865   :  { %v7427_v55 = vpop.eup %7426 }
 0x866   :  { %v2536_v47 = vadd.f32 1.0, %v7427_v55  ;;  %v10370_v55 = vld [vmem:[#allocation56_spill] sm:$0xff] }
 0x867   :  { %v7429_v57 = vpop.eup %7428 }
 0x868   :  { %v2535_v21 = vadd.f32 1.0, %v7429_v57  ;;  %7440 = vrcp.f32 %v2536_v47 }
 0x869   :  { %v7431_v3 = vpop.eup %7430  ;;  %7442 = vrcp.f32 %v2533_v32 }
 0x86a   :  { %v2546_v42 = vmul.f32 %v7431_v3, %v6881_v59  ;;  %v2480_v59 = vpop.f32.mrf.mxu1  ;;  %v624_v3 = vadd.f32 1.0, %v10370_v55  ;;  %7444 = vrcp.f32 %v2535_v21 }
 0x86b   :  { %v7433_v29 = vpop.eup %7432 }
 0x86c   :  { %v2545_v62 = vmul.f32 %v7433_v29, %v2470_v19  ;;  %v2550_v6 = vadd.f32 %v2546_v42, %v618_v20 }
 0x86d   :  { %v7435_v40 = vpop.eup %7434 }
 0x86e   :  { %v2548_v48 = vmul.f32 %v7435_v40, %v6884_v60  ;;  %v2549_v44 = vadd.f32 %v2545_v62, %v612_v61  ;;  %7446 = vtanh.f32 %v2550_v6 }
 0x86f   :  { %v7437_v1 = vpop.eup %7436 }
 0x870   :  { %v2552_v4 = vadd.f32 %v2548_v48, %v630_v39  ;;  %v2547_v16 = vmul.f32 %v7437_v1, %v2480_v59 }
 0x871   :  { %v7439_v57 = vpop.eup %7438 }
 0x872   :  { %7448 = vtanh.f32 %v2552_v4  ;;  %v2551_v19 = vadd.f32 %v2547_v16, %v624_v3  ;;  %v2558_v21 = vsub.f32 1.0, %v7439_v57  ;;  %v2566_v59 = vmul.f32 %v7439_v57, %v9157_v34  ;;  %v7890_v57 = vld [vmem:[%s10223_s3 + $0x28] sm:$0xff] }
 0x873   :  { %7450 = vtanh.f32 %v2549_v44 }
 0x874   :  { %7452 = vtanh.f32 %v2551_v19  ;;  %v7885_v19 = vld [vmem:[%s10223_s3] sm:$0xff] }
 0x875   :  { %v7441_v50 = vpop.eup %7440 }
 0x876   :  { %v7443_v42 = vpop.eup %7442  ;;  %v2560_v20 = vsub.f32 1.0, %v7441_v50  ;;  %v2568_v40 = vmul.f32 %v7441_v50, %v9167_v28  ;;  %v7891_v50 = vld [vmem:[%s10223_s3 + $0x30] sm:$0xff] }
 0x877   :  { %v7445_v29 = vpop.eup %7444  ;;  %v2557_v1 = vsub.f32 1.0, %v7443_v42  ;;  %v2565_v4 = vmul.f32 %v7443_v42, %v9163_v53  ;;  %v7892_v42 = vld [vmem:[%s10223_s3 + $0x38] sm:$0xff] }
 0x878   :  { %v2559_v18 = vsub.f32 1.0, %v7445_v29  ;;  %v2567_v56 = vmul.f32 %v7445_v29, %v9173_v38  ;;  %v7893_v29 = vld [vmem:[%s10223_s3 + $0x40] sm:$0xff] }
 0x87b   :  { %v7447_v47 = vpop.eup %7446 }
 0x87c   :  { %v2562_v39 = vmul.f32 %v7447_v47, %v2558_v21  ;;  %v7894_v47 = vld [vmem:[%s10223_s3 + $0x48] sm:$0xff] }
 0x87e   :  { %v2570_v3 = vadd.f32 %v2566_v59, %v2562_v39 }
 0x87f   :  { %v7449_v60 = vpop.eup %7448 }
 0x880   :  { %v7451_v32 = vpop.eup %7450  ;;  %v2564_v62 = vmul.f32 %v7449_v60, %v2560_v20  ;;  %v7895_v20 = vld [vmem:[%s10223_s3 + $0x50] sm:$0xff]  ;;  %v7896_v60 = vld [vmem:[%s10223_s3 + $0x58] sm:$0xff] }
 0x881   :  { %v7453_v48 = vpop.eup %7452  ;;  %v2561_v55 = vmul.f32 %v7451_v32, %v2557_v1 }
 0x882   :  { %v2572_v61 = vadd.f32 %v2568_v40, %v2564_v62  ;;  %v2563_v6 = vmul.f32 %v7453_v48, %v2559_v18 }
 0x883   :  { %v2569_v16 = vadd.f32 %v2565_v4, %v2561_v55 }
 0x884   :  { %3092 = vmatprep.subr.mxu1 %v2572_v61  ;;  %v2571_v44 = vadd.f32 %v2567_v56, %v2563_v6 }
 0x885   :  { %3093 = vmatpush1.msra.mxu1 %v9167_v28  ;;  %v7888_v28 = vld [vmem:[%s10223_s3 + $0x18] sm:$0xff] }
 0x886   :  { %3094 = vmatprep.subr.mxu1 %v2571_v44 }
 0x887   :  { %3095 = vmatpush1.msra.mxu1 %v9173_v38  ;;  %v7889_v38 = vld [vmem:[%s10223_s3 + $0x20] sm:$0xff] }
 0x888   :  { %3096 = vmatprep.subr.mxu1 %v2570_v3 }
 0x889   :  { %3097 = vmatpush1.msra.mxu1 %v9157_v34  ;;  %v7886_v34 = vld [vmem:[%s10223_s3 + $0x8] sm:$0xff] }
 0x88a   :  { %3098 = vmatprep.subr.mxu1 %v2569_v16 }
 0x88b   :  { %3099 = vmatpush1.msra.mxu1 %v9163_v53  ;;  %v7887_v53 = vld [vmem:[%s10223_s3 + $0x10] sm:$0xff] }
 0x88c   :  { %6201 = vmatmul.mubr.msk.f32.vlgmr.msra.gmra.mxu1 %vm752_vm1, %v7885_v19  ;;  %6905 = vmatprep.subr.mxu1 %v9347_v33 }
 0x88d   :  { %6906 = vmatpush3.msra.mxu1 %v9347_v33  ;;  %3138 = vmatprep.mubr.f32.mxu1 %v10317_v5 }
 0x88e   :  { %6907 = vmatprep.subr.mxu1 %v9349_v22 }
 0x88f   :  { %6908 = vmatpush3.msra.mxu1 %v9349_v22 }
 0x890   :  { %6202 = vmatmul.mubr.msk.f32.gmra.mxu1 %vm752_vm1, %v7886_v34  ;;  %6909 = vmatprep.subr.mxu1 %v9343_v13 }
 0x891   :  { %6910 = vmatpush3.msra.mxu1 %v9343_v13  ;;  %3144 = vmatprep.mubr.f32.mxu1 %v10317_v5 }
 0x892   :  { %6911 = vmatprep.subr.mxu1 %v9345_v0 }
 0x893   :  { %6912 = vmatpush3.msra.mxu1 %v9345_v0 }
 0x894   :  { %6203 = vmatmul.mubr.msk.f32.gmra.mxu1 %vm752_vm1, %v7887_v53 }
 0x895   :  { %3150 = vmatprep.mubr.f32.mxu1 %v10317_v5 }
 0x898   :  { %6204 = vmatmul.mubr.msk.f32.gmra.mxu1 %vm752_vm1, %v7888_v28 }
 0x899   :  { %3156 = vmatprep.mubr.f32.mxu1 %v10317_v5 }
 0x89c   :  { %6205 = vmatmul.mubr.msk.f32.gmra.mxu1 %vm752_vm1, %v7889_v38 }
 0x89d   :  { %3162 = vmatprep.mubr.f32.mxu1 %v10317_v5 }
 0x8a0   :  { %6206 = vmatmul.mubr.msk.f32.gmra.mxu1 %vm752_vm1, %v7890_v57 }
 0x8a1   :  { %3168 = vmatprep.mubr.f32.mxu1 %v10317_v5 }
 0x8a4   :  { %6207 = vmatmul.mubr.msk.f32.gmra.mxu1 %vm752_vm1, %v7891_v50 }
 0x8a5   :  { %3174 = vmatprep.mubr.f32.mxu1 %v10317_v5 }
 0x8a8   :  { %6208 = vmatmul.mubr.msk.f32.gmra.mxu1 %vm752_vm1, %v7892_v42 }
 0x8a9   :  { %3180 = vmatprep.mubr.f32.mxu1 %v10317_v5 }
 0x8ac   :  { %6209 = vmatmul.mubr.msk.f32.gmra.mxu1 %vm752_vm1, %v7893_v29 }
 0x8ad   :  { %3186 = vmatprep.mubr.f32.mxu1 %v10317_v5 }
 0x8b0   :  { %6210 = vmatmul.mubr.msk.f32.gmra.mxu1 %vm752_vm1, %v7894_v47 }
 0x8b1   :  { %3192 = vmatprep.mubr.f32.mxu1 %v10317_v5 }
 0x8b4   :  { %6211 = vmatmul.mubr.msk.f32.gmra.mxu1 %vm752_vm1, %v7895_v20 }
 0x8b5   :  { %3198 = vmatprep.mubr.f32.mxu1 %v10317_v5 }
 0x8b8   :  { %6212 = vmatmul.mubr.msk.f32.gmra.mxu1 %vm752_vm1, %v7896_v60 }
 0x8b9   :  { %6913 = vmatprep.mubr.msk.f32.mxu1 %vm752_vm1, %v9027_v23  ;;  %v10371_v23 = vld [vmem:[#allocation32_spill] sm:$0xff] }
 0x8bc   :  { %6914 = vmatmul.mubr.msk.f32.vlgmr.msra.gmra.mxu1 %vm752_vm1, %v9036_v24  ;;  %v9465_v24 = vld [vmem:[%s10224_s4 + $0x60] sm:$0xff] }
 0x8bd   :  { %6916 = vmatprep.mubr.msk.f32.mxu1 %vm752_vm1, %v9041_v25  ;;  %v9469_v25 = vpop.f32.mrf.mxu1 }
 0x8c0   :  { %6917 = vmatmul.mubr.msk.f32.gmra.mxu1 %vm752_vm1, %v9050_v26  ;;  %v9471_v26 = vpop.f32.mrf.mxu1 }
 0x8c1   :  { %6919 = vmatprep.mubr.msk.f32.mxu1 %vm752_vm1, %v9055_v27 }
 0x8c2   :  { %v9473_v27 = vpop.f32.mrf.mxu1 }
 0x8c4   :  { %6920 = vmatmul.mubr.msk.f32.gmra.mxu1 %vm752_vm1, %v9064_v36  ;;  %v9475_v36 = vpop.f32.mrf.mxu1 }
 0x8c5   :  { %6922 = vmatprep.mubr.msk.f32.mxu1 %vm752_vm1, %v9069_v2 }
 0x8c6   :  { %v9477_v2 = vpop.f32.mrf.mxu1 }
 0x8c8   :  { %6923 = vmatmul.mubr.msk.f32.gmra.mxu1 %vm752_vm1, %v9078_v45  ;;  %v9479_v45 = vpop.f32.mrf.mxu1 }
 0x8c9   :  { %6925 = vmatprep.mubr.msk.f32.mxu1 %vm752_vm1, %v9083_v10 }
 0x8ca   :  { %v9481_v10 = vpop.f32.mrf.mxu1 }
 0x8cc   :  { %6926 = vmatmul.mubr.msk.f32.gmra.mxu1 %vm752_vm1, %v9092_v35  ;;  %v9483_v35 = vpop.f32.mrf.mxu1 }
 0x8cd   :  { %6928 = vmatprep.mubr.msk.f32.mxu1 %vm752_vm1, %v9097_v15 }
 0x8ce   :  { %v9485_v15 = vpop.f32.mrf.mxu1 }
 0x8d0   :  { %6929 = vmatmul.mubr.msk.f32.gmra.mxu1 %vm752_vm1, %v10371_v23  ;;  %v9487_v32 = vpop.f32.mrf.mxu1 }
 0x8d1   :  { %6965 = vmatprep.mubr.msk.f32.mxu1 %vm752_vm1, %v9465_v24 }
 0x8d2   :  { %v9489_v62 = vpop.f32.mrf.mxu1 }
 0x8d4   :  { %v9491_v40 = vpop.f32.mrf.mxu1 }
 0x8d6   :  { %v9493_v18 = vpop.f32.mrf.mxu1 }
 0x8d8   :  { %v9495_v21 = vpop.f32.mrf.mxu1 }
 0x8da   :  { %v9497_v48 = vpop.f32.mrf.mxu1 }
 0x8dc   :  { %v9499_v1 = vpop.f32.mrf.mxu1 }
 0x8de   :  { %v9501_v61 = vpop.f32.mrf.mxu1 }
 0x8e0   :  { %v9503_v6 = vpop.f32.mrf.mxu1 }
 0x8e2   :  { %v9505_v56 = vpop.f32.mrf.mxu1 }
 0x8e4   :  { %v9507_v39 = vpop.f32.mrf.mxu1 }
 0x8e6   :  { %v9509_v44 = vpop.f32.mrf.mxu1 }
 0x8e8   :  { %v9511_v59 = vpop.f32.mrf.mxu1 }
 0x8ea   :  { %v9513_v55 = vpop.f32.mrf.mxu1 }
 0x8ec   :  { %v9515_v3 = vpop.f32.mrf.mxu1 }
 0x94c   :  { %v9517_v4 = vpop.f32.mrf.mxu1 }
 0x94d   :  { %10372 = vst [vmem:[#allocation35_spill] sm:$0xff] %v9517_v4 }
 0x94e   :  { %v9519_v16 = vpop.f32.mrf.mxu1 }
 0x94f   :  { %10373 = vst [vmem:[#allocation41_spill] sm:$0xff] %v9519_v16 }
 0x950   :  { %v9521_v19 = vpop.f32.mrf.mxu1 }
 0x951   :  { %10374 = vst [vmem:[#allocation39_spill] sm:$0xff] %v9521_v19 }
 0x952   :  { %v9523_v34 = vpop.f32.mrf.mxu1 }
 0x953   :  { %10375 = vst [vmem:[#allocation45_spill] sm:$0xff] %v9523_v34 }
 0x954   :  { %v9525_v53 = vpop.f32.mrf.mxu1 }
 0x955   :  { %10376 = vst [vmem:[#allocation43_spill] sm:$0xff] %v9525_v53 }
 0x956   :  { %v9527_v28 = vpop.f32.mrf.mxu1 }
 0x957   :  { %10377 = vst [vmem:[#allocation49_spill] sm:$0xff] %v9527_v28 }
 0x958   :  { %v9529_v38 = vpop.f32.mrf.mxu1 }
 0x959   :  { %10378 = vst [vmem:[#allocation47_spill] sm:$0xff] %v9529_v38 }
 0x95a   :  { %v9531_v57 = vpop.f32.mrf.mxu1 }
 0x95b   :  { %10379 = vst [vmem:[#allocation53_spill] sm:$0xff] %v9531_v57 }
 0x95c   :  { %v9533_v50 = vpop.f32.mrf.mxu1 }
 0x95d   :  { %10380 = vst [vmem:[#allocation51_spill] sm:$0xff] %v9533_v50 }
 0x95e   :  { %v9535_v42 = vpop.f32.mrf.mxu1 }
 0x95f   :  { %10381 = vst [vmem:[#allocation57_spill] sm:$0xff] %v9535_v42 }
 0x960   :  { %v9537_v29 = vpop.f32.mrf.mxu1 }
 0x961   :  { %10382 = vst [vmem:[#allocation55_spill] sm:$0xff] %v9537_v29 }
 0x962   :  { %v9539_v47 = vpop.f32.mrf.mxu1 }
 0x963   :  { %10383 = vst [vmem:[#allocation38_spill] sm:$0xff] %v9539_v47 }
 0x964   :  { %v9541_v20 = vpop.f32.mrf.mxu1 }
 0x965   :  { %10384 = vst [vmem:[#allocation36_spill] sm:$0xff] %v9541_v20 }
 0x966   :  { %v9543_v60 = vpop.f32.mrf.mxu1 }
 0x967   :  { %10385 = vst [vmem:[#allocation42_spill] sm:$0xff] %v9543_v60  ;;  %v10396_v60 = vld [vmem:[#allocation34_spill] sm:$0xff] }
 0x968   :  { %v9545_v23 = vpop.f32.mrf.mxu1 }
 0x969   :  { %10386 = vst [vmem:[#allocation40_spill] sm:$0xff] %v9545_v23  ;;  %v2732_v23 = vadd.f32 1.0, %v10396_v60 }
 0x96a   :  { %v9547_v16 = vpop.f32.mrf.mxu1 }
 0x96b   :  { %10387 = vst [vmem:[#allocation46_spill] sm:$0xff] %v9547_v16  ;;  %v10397_v16 = vld [vmem:[#allocation31_spill] sm:$0xff] }
 0x96c   :  { %v9549_v28 = vpop.f32.mrf.mxu1  ;;  %v2726_v38 = vadd.f32 1.0, %v10397_v16  ;;  %v10401_v16 = vld [vmem:[#allocation7_spill] sm:$0xff] }
 0x96d   :  { %10388 = vst [vmem:[#allocation44_spill] sm:$0xff] %v9549_v28 }
 0x96e   :  { %v9551_v34 = vpop.f32.mrf.mxu1 }
 0x96f   :  { %10389 = vst [vmem:[#allocation50_spill] sm:$0xff] %v9551_v34  ;;  %v10398_v34 = vld [vmem:[#allocation9_spill] sm:$0xff] }
 0x970   :  { %v9553_v57 = vpop.f32.mrf.mxu1  ;;  %v2744_v19 = vadd.f32 1.0, %v10398_v34 }
 0x971   :  { %10390 = vst [vmem:[#allocation48_spill] sm:$0xff] %v9553_v57 }
 0x972   :  { %v9555_v50 = vpop.f32.mrf.mxu1 }
 0x973   :  { %10391 = vst [vmem:[#allocation54_spill] sm:$0xff] %v9555_v50 }
 0x974   :  { %v9557_v42 = vpop.f32.mrf.mxu1 }
 0x975   :  { %10392 = vst [vmem:[#allocation52_spill] sm:$0xff] %v9557_v42  ;;  %v2738_v42 = vadd.f32 1.0, %v10399_v12 }
 0x976   :  { %v9559_v29 = vpop.f32.mrf.mxu1 }
 0x977   :  { %10393 = vst [vmem:[#allocation58_spill] sm:$0xff] %v9559_v29 }
 0x978   :  { %v9561_v47 = vpop.f32.mrf.mxu1 }
 0x979   :  { %10394 = vst [vmem:[#allocation56_spill] sm:$0xff] %v9561_v47 }
 0x97a   :  { %v9563_v20 = vpop.f32.mrf.mxu1 }
 0x97b   :  { %10395 = vst [vmem:[#allocation32_spill] sm:$0xff] %v9563_v20  ;;  %v2756_v20 = vadd.f32 1.0, %v10400_v17 }
 0x97c   :  { %v6915_v53 = vpop.f32.mrf.mxu1 }
 0x97d   :  { %v3713_v28 = vadd.f32 %v6915_v53, %v2732_v23  ;;  %v2750_v53 = vadd.f32 1.0, %v10401_v16 }
 0x97e   :  { %v3653_v4 = vpop.f32.mrf.mxu1 }
 0x97f   :  { %v6258_v57 = vmul.f32 -1.442695, %v3713_v28  ;;  %v3712_v5 = vadd.f32 %v3653_v4, %v2726_v38  ;;  %v10402_v4 = vld [vmem:[#allocation17_spill] sm:$0xff] }
 0x980   :  { %v6918_v50 = vpop.f32.mrf.mxu1  ;;  %v2768_v38 = vadd.f32 1.0, %v10402_v4 }
 0x981   :  { %7454 = vpow2.f32 %v6258_v57  ;;  %v6257_v29 = vmul.f32 -1.442695, %v3712_v5  ;;  %v3715_v8 = vadd.f32 %v6918_v50, %v2744_v19  ;;  %v10403_v19 = vld [vmem:[#allocation11_spill] sm:$0xff] }
 0x982   :  { %v3663_v47 = vpop.f32.mrf.mxu1  ;;  %v2762_v50 = vadd.f32 1.0, %v10403_v19 }
 0x983   :  { %7456 = vpow2.f32 %v6257_v29  ;;  %v6260_v60 = vmul.f32 -1.442695, %v3715_v8  ;;  %v3714_v14 = vadd.f32 %v3663_v47, %v2738_v42 }
 0x984   :  { %v6921_v63 = vpop.f32.mrf.mxu1 }
 0x985   :  { %7458 = vpow2.f32 %v6260_v60  ;;  %v6259_v23 = vmul.f32 -1.442695, %v3714_v14  ;;  %v3741_v34 = vadd.f32 %v6921_v63, %v2756_v20 }
 0x986   :  { %v3673_v28 = vpop.f32.mrf.mxu1 }
 0x987   :  { %7460 = vpow2.f32 %v6259_v23  ;;  %v6262_v12 = vmul.f32 -1.442695, %v3741_v34  ;;  %v3740_v57 = vadd.f32 %v3673_v28, %v2750_v53 }
 0x988   :  { %v6924_v5 = vpop.f32.mrf.mxu1 }
 0x989   :  { %v6261_v41 = vmul.f32 -1.442695, %v3740_v57  ;;  %v3743_v17 = vadd.f32 %v6924_v5, %v2768_v38  ;;  %7462 = vpow2.f32 %v6262_v12 }
 0x98a   :  { %v3683_v29 = vpop.f32.mrf.mxu1 }
 0x98b   :  { %v6264_v8 = vmul.f32 -1.442695, %v3743_v17  ;;  %v3742_v42 = vadd.f32 %v3683_v29, %v2762_v50  ;;  %7464 = vpow2.f32 %v6261_v41  ;;  %v2780_v29 = vadd.f32 1.0, %v9176_v52 }
 0x98c   :  { %v6927_v4 = vpop.f32.mrf.mxu1 }
 0x98d   :  { %v6263_v47 = vmul.f32 -1.442695, %v3742_v42  ;;  %7466 = vpow2.f32 %v6264_v8 }
 0x98e   :  { %v7455_v60 = vpop.eup %7454  ;;  %v3693_v57 = vpop.f32.mrf.mxu1 }
 0x98f   :  { %v3729_v14 = vadd.f32 1.0, %v7455_v60  ;;  %7468 = vpow2.f32 %v6263_v47 }
 0x990   :  { %v7457_v63 = vpop.eup %7456  ;;  %v6930_v60 = vpop.f32.mrf.mxu1 }
 0x991   :  { %7470 = vrcp.f32 %v3729_v14  ;;  %v3728_v20 = vadd.f32 1.0, %v7457_v63  ;;  %v2774_v14 = vadd.f32 1.0, %v9165_v7 }
 0x992   :  { %v7459_v16 = vpop.eup %7458  ;;  %v3703_v52 = vpop.f32.mrf.mxu1 }
 0x993   :  { %7472 = vrcp.f32 %v3728_v20  ;;  %v3731_v53 = vadd.f32 1.0, %v7459_v16 }
 0x994   :  { %v7461_v23 = vpop.eup %7460 }
 0x995   :  { %7474 = vrcp.f32 %v3731_v53  ;;  %v3730_v34 = vadd.f32 1.0, %v7461_v23  ;;  %v2792_v53 = vadd.f32 1.0, %v9200_v31 }
 0x996   :  { %v7463_v28 = vpop.eup %7462 }
 0x997   :  { %7476 = vrcp.f32 %v3730_v34  ;;  %v3757_v41 = vadd.f32 1.0, %v7463_v28 }
 0x998   :  { %v7465_v38 = vpop.eup %7464 }
 0x999   :  { %v3756_v19 = vadd.f32 1.0, %v7465_v38  ;;  %7478 = vrcp.f32 %v3757_v41 }
 0x99a   :  { %v7467_v12 = vpop.eup %7466 }
 0x99b   :  { %v3759_v17 = vadd.f32 1.0, %v7467_v12  ;;  %7480 = vrcp.f32 %v3756_v19 }
 0x99c   :  { %v7469_v5 = vpop.eup %7468 }
 0x99d   :  { %v3758_v47 = vadd.f32 1.0, %v7469_v5  ;;  %7482 = vrcp.f32 %v3759_v17 }
 0x99e   :  { %v7471_v50 = vpop.eup %7470 }
 0x99f   :  { %v3769_v8 = vmul.f32 %v7471_v50, %v6927_v4  ;;  %v2786_v4 = vadd.f32 1.0, %v9184_v43 }
 0x9a0   :  { %v7473_v42 = vpop.eup %7472 }
 0x9a1   :  { %v3773_v63 = vadd.f32 %v3769_v8, %v2780_v29  ;;  %v3768_v20 = vmul.f32 %v7473_v42, %v3693_v57 }
 0x9a2   :  { %v7475_v16 = vpop.eup %7474 }
 0x9a3   :  { %7484 = vtanh.f32 %v3773_v63  ;;  %v3772_v23 = vadd.f32 %v3768_v20, %v2774_v14  ;;  %v3771_v34 = vmul.f32 %v7475_v16, %v6930_v60 }
 0x9a4   :  { %v7477_v28 = vpop.eup %7476  ;;  %7486 = vrcp.f32 %v3758_v47 }
 0x9a5   :  { %7488 = vtanh.f32 %v3772_v23  ;;  %v3775_v38 = vadd.f32 %v3771_v34, %v2792_v53  ;;  %v3770_v12 = vmul.f32 %v7477_v28, %v3703_v52 }
 0x9a6   :  { %v7479_v41 = vpop.eup %7478 }
 0x9a7   :  { %7490 = vtanh.f32 %v3775_v38  ;;  %v3774_v7 = vadd.f32 %v3770_v12, %v2786_v4  ;;  %v3781_v19 = vsub.f32 1.0, %v7479_v41  ;;  %v3789_v29 = vmul.f32 %v7479_v41, %v9343_v13  ;;  %v9600_v12 = vld [vmem:[%s10224_s4 + $0x68] sm:$0xff]  ;;  %v9614_v41 = vld [vmem:[%s10224_s4 + $0x78] sm:$0xff] }
 0x9a8   :  { %v7481_v57 = vpop.eup %7480 }
 0x9a9   :  { %7492 = vtanh.f32 %v3774_v7  ;;  %v3780_v8 = vsub.f32 1.0, %v7481_v57  ;;  %v3788_v14 = vmul.f32 %v7481_v57, %v9345_v0  ;;  %v9607_v7 = vld [vmem:[%s10224_s4 + $0x70] sm:$0xff]  ;;  %v9621_v57 = vld [vmem:[%s10224_s4 + $0x80] sm:$0xff] }
 0x9aa   :  { %v7483_v5 = vpop.eup %7482 }
 0x9ab   :  { %v3783_v47 = vsub.f32 1.0, %v7483_v5  ;;  %v3791_v16 = vmul.f32 %v7483_v5, %v9347_v33  ;;  %v9628_v5 = vld [vmem:[%s10224_s4 + $0x88] sm:$0xff] }
 0x9b0   :  { %v7485_v50 = vpop.eup %7484 }
 0x9b1   :  { %v7487_v31 = vpop.eup %7486  ;;  %v3785_v17 = vmul.f32 %v7485_v50, %v3781_v19  ;;  %v9635_v19 = vld [vmem:[%s10224_s4 + $0x90] sm:$0xff]  ;;  %v9642_v50 = vld [vmem:[%s10224_s4 + $0x98] sm:$0xff] }
 0x9b2   :  { %v7489_v42 = vpop.eup %7488  ;;  %v3782_v53 = vsub.f32 1.0, %v7487_v31  ;;  %v3790_v4 = vmul.f32 %v7487_v31, %v9349_v22  ;;  %v9649_v31 = vld [vmem:[%s10224_s4 + $0xa0] sm:$0xff]  ;;  %v2891_v22 = vadd.f32 1.0, %v9489_v62 }
 0x9b3   :  { %v9578_v60 = vadd.f32 %v3789_v29, %v3785_v17  ;;  %v3784_v43 = vmul.f32 %v7489_v42, %v3780_v8  ;;  %v9656_v17 = vld [vmem:[%s10224_s4 + $0xa8] sm:$0xff]  ;;  %v9663_v29 = vld [vmem:[%s10224_s4 + $0xb0] sm:$0xff]  ;;  %v9670_v8 = vld [vmem:[%s10224_s4 + $0xb8] sm:$0xff]  ;;  %v2867_v42 = vadd.f32 1.0, %v9473_v27 }
 0x9b4   :  { %v7491_v63 = vpop.eup %7490 }
 0x9b5   :  { %v3787_v20 = vmul.f32 %v7491_v63, %v3783_v47  ;;  %v9582_v23 = vadd.f32 %v3788_v14, %v3784_v43  ;;  %v2861_v43 = vadd.f32 1.0, %v9469_v25  ;;  %v2885_v25 = vadd.f32 1.0, %v9485_v15 }
 0x9b6   :  { %v7493_v34 = vpop.eup %7492 }
 0x9b7   :  { %v9584_v28 = vadd.f32 %v3791_v16, %v3787_v20  ;;  %v3786_v52 = vmul.f32 %v7493_v34, %v3782_v53  ;;  %v2879_v20 = vadd.f32 1.0, %v9481_v10 }
 0x9b9   :  { %6931 = vmatprep.subr.mxu0 %v9584_v28  ;;  %v9588_v38 = vadd.f32 %v3790_v4, %v3786_v52  ;;  %v2873_v52 = vadd.f32 1.0, %v9477_v2 }
 0x9ba   :  { %6932 = vmatpush3.msra.mxu0 %v9584_v28 }
 0x9bb   :  { %6933 = vmatprep.subr.mxu0 %v9588_v38 }
 0x9bc   :  { %6934 = vmatpush3.msra.mxu0 %v9588_v38 }
 0x9bd   :  { %6935 = vmatprep.subr.mxu0 %v9578_v60 }
 0x9be   :  { %6936 = vmatpush3.msra.mxu0 %v9578_v60 }
 0x9bf   :  { %6937 = vmatprep.subr.mxu0 %v9582_v23 }
 0x9c0   :  { %6938 = vmatpush3.msra.mxu0 %v9582_v23 }
 0x9c1   :  { %6940 = vmatmul.mubr.msk.f32.vlgmr.msra.gmra.mxu0 %vm752_vm1, %v9600_v12 }
 0x9c2   :  { %6942 = vmatprep.mubr.msk.f32.mxu0 %vm752_vm1, %v9607_v7 }
 0x9c5   :  { %6943 = vmatmul.mubr.msk.f32.gmra.mxu0 %vm752_vm1, %v9614_v41 }
 0x9c6   :  { %6945 = vmatprep.mubr.msk.f32.mxu0 %vm752_vm1, %v9621_v57 }
 0x9c9   :  { %6946 = vmatmul.mubr.msk.f32.gmra.mxu0 %vm752_vm1, %v9628_v5 }
 0x9ca   :  { %6948 = vmatprep.mubr.msk.f32.mxu0 %vm752_vm1, %v9635_v19 }
 0x9cd   :  { %6949 = vmatmul.mubr.msk.f32.gmra.mxu0 %vm752_vm1, %v9642_v50 }
 0x9ce   :  { %6951 = vmatprep.mubr.msk.f32.mxu0 %vm752_vm1, %v9649_v31 }
 0x9d1   :  { %6952 = vmatmul.mubr.msk.f32.gmra.mxu0 %vm752_vm1, %v9656_v17 }
 0x9d2   :  { %6954 = vmatprep.mubr.msk.f32.mxu0 %vm752_vm1, %v9663_v29 }
 0x9d5   :  { %6955 = vmatmul.mubr.msk.f32.gmra.mxu0 %vm752_vm1, %v9670_v8 }
 0x9d6   :  { %6991 = vmatprep.mubr.msk.f32.mxu0 %vm752_vm1, %v9465_v24 }
 0xa81   :  { %v6941_v47 = vpop.f32.mrf.mxu0 }
 0xa82   :  { %v3938_v14 = vadd.f32 %v6941_v47, %v2867_v42 }
 0xa83   :  { %v3878_v63 = vpop.f32.mrf.mxu0 }
 0xa84   :  { %v6278_v16 = vmul.f32 -1.442695, %v3938_v14  ;;  %v3937_v53 = vadd.f32 %v3878_v63, %v2861_v43  ;;  %v2903_v43 = vadd.f32 1.0, %v9497_v48 }
 0xa85   :  { %v6944_v34 = vpop.f32.mrf.mxu0 }
 0xa86   :  { %7494 = vpow2.f32 %v6278_v16  ;;  %v6277_v4 = vmul.f32 -1.442695, %v3937_v53  ;;  %v3940_v0 = vadd.f32 %v6944_v34, %v2879_v20  ;;  %v2897_v20 = vadd.f32 1.0, %v9493_v18 }
 0xa87   :  { %v3888_v13 = vpop.f32.mrf.mxu0 }
 0xa88   :  { %7496 = vpow2.f32 %v6277_v4  ;;  %v6280_v27 = vmul.f32 -1.442695, %v3940_v0  ;;  %v3939_v33 = vadd.f32 %v3888_v13, %v2873_v52 }
 0xa89   :  { %v6947_v58 = vpop.f32.mrf.mxu0 }
 0xa8a   :  { %7498 = vpow2.f32 %v6280_v27  ;;  %v6279_v42 = vmul.f32 -1.442695, %v3939_v33  ;;  %v3966_v10 = vadd.f32 %v6947_v58, %v2891_v22 }
 0xa8b   :  { %v3898_v47 = vpop.f32.mrf.mxu0 }
 0xa8c   :  { %7500 = vpow2.f32 %v6279_v42  ;;  %v6282_v2 = vmul.f32 -1.442695, %v3966_v10  ;;  %v3965_v14 = vadd.f32 %v3898_v47, %v2885_v25 }
 0xa8d   :  { %v6950_v63 = vpop.f32.mrf.mxu0 }
 0xa8e   :  { %v6281_v16 = vmul.f32 -1.442695, %v3965_v14  ;;  %v3968_v62 = vadd.f32 %v6950_v63, %v2903_v43  ;;  %7502 = vpow2.f32 %v6282_v2 }
 0xa8f   :  { %v3908_v53 = vpop.f32.mrf.mxu0 }
 0xa90   :  { %v6284_v13 = vmul.f32 -1.442695, %v3968_v62  ;;  %v3967_v0 = vadd.f32 %v3908_v53, %v2897_v20  ;;  %7504 = vpow2.f32 %v6281_v16  ;;  %v2915_v16 = vadd.f32 1.0, %v9505_v56 }
 0xa91   :  { %v6953_v25 = vpop.f32.mrf.mxu0 }
 0xa92   :  { %v6283_v15 = vmul.f32 -1.442695, %v3967_v0  ;;  %7506 = vpow2.f32 %v6284_v13 }
 0xa93   :  { %v7495_v34 = vpop.eup %7494  ;;  %v3918_v43 = vpop.f32.mrf.mxu0 }
 0xa94   :  { %v3954_v58 = vadd.f32 1.0, %v7495_v34  ;;  %7508 = vpow2.f32 %v6283_v15  ;;  %v2909_v15 = vadd.f32 1.0, %v9501_v61 }
 0xa95   :  { %v7497_v33 = vpop.eup %7496  ;;  %v6956_v0 = vpop.f32.mrf.mxu0 }
 0xa96   :  { %7510 = vrcp.f32 %v3954_v58  ;;  %v3953_v22 = vadd.f32 1.0, %v7497_v33 }
 0xa97   :  { %v7499_v48 = vpop.eup %7498  ;;  %v3928_v56 = vpop.f32.mrf.mxu0 }
 0xa98   :  { %7512 = vrcp.f32 %v3953_v22  ;;  %v3956_v52 = vadd.f32 1.0, %v7499_v48  ;;  %v2927_v22 = vadd.f32 1.0, %v9513_v55 }
 0xa99   :  { %v7501_v4 = vpop.eup %7500 }
 0xa9a   :  { %7514 = vrcp.f32 %v3956_v52  ;;  %v3955_v18 = vadd.f32 1.0, %v7501_v4 }
 0xa9b   :  { %v7503_v27 = vpop.eup %7502 }
 0xa9c   :  { %7516 = vrcp.f32 %v3955_v18  ;;  %v3982_v47 = vadd.f32 1.0, %v7503_v27  ;;  %v2921_v18 = vadd.f32 1.0, %v9509_v44 }
 0xa9d   :  { %v7505_v42 = vpop.eup %7504 }
 0xa9e   :  { %v3981_v14 = vadd.f32 1.0, %v7505_v42  ;;  %7518 = vrcp.f32 %v3982_v47 }
 0xa9f   :  { %v7507_v10 = vpop.eup %7506 }
 0xaa0   :  { %v3984_v20 = vadd.f32 1.0, %v7507_v10  ;;  %7520 = vrcp.f32 %v3981_v14 }
 0xaa1   :  { %v7509_v2 = vpop.eup %7508 }
 0xaa2   :  { %v3983_v13 = vadd.f32 1.0, %v7509_v2  ;;  %7522 = vrcp.f32 %v3984_v20 }
 0xaa3   :  { %v7511_v63 = vpop.eup %7510 }
 0xaa4   :  { %v3994_v62 = vmul.f32 %v7511_v63, %v6953_v25 }
 0xaa5   :  { %v7513_v53 = vpop.eup %7512 }
 0xaa6   :  { %v3998_v34 = vadd.f32 %v3994_v62, %v2915_v16  ;;  %v3993_v58 = vmul.f32 %v7513_v53, %v3918_v43 }
 0xaa7   :  { %v7515_v33 = vpop.eup %7514 }
 0xaa8   :  { %7524 = vtanh.f32 %v3998_v34  ;;  %v3997_v48 = vadd.f32 %v3993_v58, %v2909_v15  ;;  %v3996_v52 = vmul.f32 %v7515_v33, %v6956_v0 }
 0xaa9   :  { %v7517_v4 = vpop.eup %7516  ;;  %7526 = vrcp.f32 %v3983_v13 }
 0xaaa   :  { %7528 = vtanh.f32 %v3997_v48  ;;  %v4000_v27 = vadd.f32 %v3996_v52, %v2927_v22  ;;  %v3995_v25 = vmul.f32 %v7517_v4, %v3928_v56 }
 0xaab   :  { %v7519_v42 = vpop.eup %7518 }
 0xaac   :  { %7530 = vtanh.f32 %v4000_v27  ;;  %v3999_v61 = vadd.f32 %v3995_v25, %v2921_v18  ;;  %v4006_v43 = vsub.f32 1.0, %v7519_v42  ;;  %v4014_v63 = vmul.f32 %v7519_v42, %v9578_v60 }
 0xaad   :  { %v7521_v10 = vpop.eup %7520  ;;  %v2869_v18 = vadd.f32 1.0, %v9475_v36  ;;  %v2863_v25 = vadd.f32 1.0, %v9471_v26  ;;  %v2887_v26 = vadd.f32 1.0, %v9487_v32 }
 0xaae   :  { %7532 = vtanh.f32 %v3999_v61  ;;  %v4005_v20 = vsub.f32 1.0, %v7521_v10  ;;  %v4013_v13 = vmul.f32 %v7521_v10, %v9582_v23  ;;  %v2881_v10 = vadd.f32 1.0, %v9483_v35 }
 0xaaf   :  { %v7523_v47 = vpop.eup %7522 }
 0xab0   :  { %v4008_v62 = vsub.f32 1.0, %v7523_v47  ;;  %v4016_v34 = vmul.f32 %v7523_v47, %v9584_v28 }
 0xab5   :  { %v7525_v2 = vpop.eup %7524 }
 0xab6   :  { %v7527_v55 = vpop.eup %7526  ;;  %v4010_v14 = vmul.f32 %v7525_v2, %v4006_v43 }
 0xab7   :  { %v7529_v16 = vpop.eup %7528  ;;  %v4007_v58 = vsub.f32 1.0, %v7527_v55  ;;  %v4015_v4 = vmul.f32 %v7527_v55, %v9588_v38  ;;  %v2875_v55 = vadd.f32 1.0, %v9479_v45 }
 0xab8   :  { %v9689_v53 = vadd.f32 %v4014_v63, %v4010_v14  ;;  %v4009_v44 = vmul.f32 %v7529_v16, %v4005_v20  ;;  %v2893_v16 = vadd.f32 1.0, %v9491_v40 }
 0xab9   :  { %v7531_v0 = vpop.eup %7530 }
 0xaba   :  { %v4012_v15 = vmul.f32 %v7531_v0, %v4008_v62  ;;  %v9693_v33 = vadd.f32 %v4013_v13, %v4009_v44 }
 0xabb   :  { %v7533_v22 = vpop.eup %7532 }
 0xabc   :  { %v9695_v48 = vadd.f32 %v4016_v34, %v4012_v15  ;;  %v4011_v52 = vmul.f32 %v7533_v22, %v4007_v58  ;;  %v2905_v15 = vadd.f32 1.0, %v9499_v1  ;;  %v2899_v22 = vadd.f32 1.0, %v9495_v21 }
 0xabe   :  { %6957 = vmatprep.subr.mxu1 %v9695_v48  ;;  %v9699_v56 = vadd.f32 %v4015_v4, %v4011_v52 }
 0xabf   :  { %6958 = vmatpush3.msra.mxu1 %v9695_v48 }
 0xac0   :  { %6959 = vmatprep.subr.mxu1 %v9699_v56 }
 0xac1   :  { %6960 = vmatpush3.msra.mxu1 %v9699_v56 }
 0xac2   :  { %6961 = vmatprep.subr.mxu1 %v9689_v53 }
 0xac3   :  { %6962 = vmatpush3.msra.mxu1 %v9689_v53 }
 0xac4   :  { %6963 = vmatprep.subr.mxu1 %v9693_v33 }
 0xac5   :  { %6964 = vmatpush3.msra.mxu1 %v9693_v33 }
 0xac6   :  { %6966 = vmatmul.mubr.msk.f32.vlgmr.msra.gmra.mxu1 %vm752_vm1, %v9600_v12 }
 0xac7   :  { %6968 = vmatprep.mubr.msk.f32.mxu1 %vm752_vm1, %v9607_v7 }
 0xaca   :  { %6969 = vmatmul.mubr.msk.f32.gmra.mxu1 %vm752_vm1, %v9614_v41 }
 0xacb   :  { %6971 = vmatprep.mubr.msk.f32.mxu1 %vm752_vm1, %v9621_v57 }
 0xace   :  { %6972 = vmatmul.mubr.msk.f32.gmra.mxu1 %vm752_vm1, %v9628_v5 }
 0xacf   :  { %6974 = vmatprep.mubr.msk.f32.mxu1 %vm752_vm1, %v9635_v19 }
 0xad2   :  { %6975 = vmatmul.mubr.msk.f32.gmra.mxu1 %vm752_vm1, %v9642_v50 }
 0xad3   :  { %6977 = vmatprep.mubr.msk.f32.mxu1 %vm752_vm1, %v9649_v31 }
 0xad6   :  { %6978 = vmatmul.mubr.msk.f32.gmra.mxu1 %vm752_vm1, %v9656_v17 }
 0xad7   :  { %6980 = vmatprep.mubr.msk.f32.mxu1 %vm752_vm1, %v9663_v29 }
 0xada   :  { %6981 = vmatmul.mubr.msk.f32.gmra.mxu1 %vm752_vm1, %v9670_v8 }
 0xadb   :  { %7017 = vmatprep.mubr.msk.f32.mxu1 %vm752_vm1, %v9465_v24 }
 0xb86   :  { %v6967_v27 = vpop.f32.mrf.mxu1 }
 0xb87   :  { %v4163_v61 = vadd.f32 %v6967_v27, %v2869_v18 }
 0xb88   :  { %v4103_v42 = vpop.f32.mrf.mxu1 }
 0xb89   :  { %v6298_v47 = vmul.f32 -1.442695, %v4163_v61  ;;  %v4162_v43 = vadd.f32 %v4103_v42, %v2863_v25 }
 0xb8a   :  { %v6970_v2 = vpop.f32.mrf.mxu1 }
 0xb8b   :  { %7534 = vpow2.f32 %v6298_v47  ;;  %v6297_v14 = vmul.f32 -1.442695, %v4162_v43  ;;  %v4165_v63 = vadd.f32 %v6970_v2, %v2881_v10 }
 0xb8c   :  { %v4113_v20 = vpop.f32.mrf.mxu1 }
 0xb8d   :  { %7536 = vpow2.f32 %v6297_v14  ;;  %v6300_v36 = vmul.f32 -1.442695, %v4165_v63  ;;  %v4164_v62 = vadd.f32 %v4113_v20, %v2875_v55 }
 0xb8e   :  { %v6973_v44 = vpop.f32.mrf.mxu1 }
 0xb8f   :  { %7538 = vpow2.f32 %v6300_v36  ;;  %v6299_v13 = vmul.f32 -1.442695, %v4164_v62  ;;  %v4191_v35 = vadd.f32 %v6973_v44, %v2893_v16 }
 0xb90   :  { %v4123_v0 = vpop.f32.mrf.mxu1 }
 0xb91   :  { %7540 = vpow2.f32 %v6299_v13  ;;  %v6302_v45 = vmul.f32 -1.442695, %v4191_v35  ;;  %v4190_v34 = vadd.f32 %v4123_v0, %v2887_v26  ;;  %v2917_v13 = vadd.f32 1.0, %v9507_v39 }
 0xb92   :  { %v6976_v58 = vpop.f32.mrf.mxu1 }
 0xb93   :  { %v6301_v52 = vmul.f32 -1.442695, %v4190_v34  ;;  %v4193_v40 = vadd.f32 %v6976_v58, %v2905_v15  ;;  %7542 = vpow2.f32 %v6302_v45  ;;  %v2911_v34 = vadd.f32 1.0, %v9503_v6 }
 0xb94   :  { %v4133_v4 = vpop.f32.mrf.mxu1 }
 0xb95   :  { %v6304_v18 = vmul.f32 -1.442695, %v4193_v40  ;;  %v4192_v27 = vadd.f32 %v4133_v4, %v2899_v22  ;;  %7544 = vpow2.f32 %v6301_v52  ;;  %v2929_v40 = vadd.f32 1.0, %v9515_v3 }
 0xb96   :  { %v6979_v55 = vpop.f32.mrf.mxu1 }
 0xb97   :  { %v6303_v32 = vmul.f32 -1.442695, %v4192_v27  ;;  %7546 = vpow2.f32 %v6304_v18 }
 0xb98   :  { %v7535_v25 = vpop.eup %7534  ;;  %v4143_v16 = vpop.f32.mrf.mxu1 }
 0xb99   :  { %v4179_v61 = vadd.f32 1.0, %v7535_v25  ;;  %7548 = vpow2.f32 %v6303_v32  ;;  %v2923_v32 = vadd.f32 1.0, %v9511_v59 }
 0xb9a   :  { %v7537_v42 = vpop.eup %7536  ;;  %v6982_v45 = vpop.f32.mrf.mxu1 }
 0xb9b   :  { %7550 = vrcp.f32 %v4179_v61  ;;  %v4178_v1 = vadd.f32 1.0, %v7537_v42 }
 0xb9c   :  { %v7539_v10 = vpop.eup %7538  ;;  %v4153_v39 = vpop.f32.mrf.mxu1 }
 0xb9d   :  { %7552 = vrcp.f32 %v4178_v1  ;;  %v4181_v47 = vadd.f32 1.0, %v7539_v10 }
 0xb9e   :  { %v7541_v43 = vpop.eup %7540 }
 0xb9f   :  { %7554 = vrcp.f32 %v4181_v47  ;;  %v4180_v21 = vadd.f32 1.0, %v7541_v43 }
 0xba0   :  { %v7543_v2 = vpop.eup %7542 }
 0xba1   :  { %7556 = vrcp.f32 %v4180_v21  ;;  %v4207_v20 = vadd.f32 1.0, %v7543_v2 }
 0xba2   :  { %v7545_v14 = vpop.eup %7544 }
 0xba3   :  { %v4206_v62 = vadd.f32 1.0, %v7545_v14  ;;  %7558 = vrcp.f32 %v4207_v20 }
 0xba4   :  { %v7547_v63 = vpop.eup %7546 }
 0xba5   :  { %v4209_v26 = vadd.f32 1.0, %v7547_v63  ;;  %7560 = vrcp.f32 %v4206_v62 }
 0xba6   :  { %v7549_v36 = vpop.eup %7548 }
 0xba7   :  { %v4208_v15 = vadd.f32 1.0, %v7549_v36  ;;  %7562 = vrcp.f32 %v4209_v26 }
 0xba8   :  { %v7551_v44 = vpop.eup %7550 }
 0xba9   :  { %v4219_v35 = vmul.f32 %v7551_v44, %v6979_v55 }
 0xbaa   :  { %v7553_v0 = vpop.eup %7552 }
 0xbab   :  { %v4223_v58 = vadd.f32 %v4219_v35, %v2917_v13  ;;  %v4218_v22 = vmul.f32 %v7553_v0, %v4143_v16 }
 0xbac   :  { %v7555_v52 = vpop.eup %7554 }
 0xbad   :  { %7564 = vtanh.f32 %v4223_v58  ;;  %v4222_v4 = vadd.f32 %v4218_v22, %v2911_v34  ;;  %v4221_v18 = vmul.f32 %v7555_v52, %v6982_v45  ;;  %v3004_v58 = vadd.f32 1.0, %v9220_v46 }
 0xbae   :  { %v7557_v27 = vpop.eup %7556  ;;  %7566 = vrcp.f32 %v4208_v15  ;;  %v2998_v52 = vadd.f32 1.0, %v9204_v51  ;;  %v3022_v51 = vadd.f32 1.0, %v9256_v49 }
 0xbaf   :  { %7568 = vtanh.f32 %v4222_v4  ;;  %v4225_v25 = vadd.f32 %v4221_v18, %v2929_v40  ;;  %v4220_v61 = vmul.f32 %v7557_v27, %v4153_v39  ;;  %v3016_v18 = vadd.f32 1.0, %v9244_v30 }
 0xbb0   :  { %v7559_v42 = vpop.eup %7558 }
 0xbb1   :  { %7570 = vtanh.f32 %v4225_v25  ;;  %v4224_v6 = vadd.f32 %v4220_v61, %v2923_v32  ;;  %v4231_v47 = vsub.f32 1.0, %v7559_v42  ;;  %v4239_v2 = vmul.f32 %v7559_v42, %v9689_v53 }
 0xbb2   :  { %v7561_v1 = vpop.eup %7560  ;;  %v3010_v25 = vadd.f32 1.0, %v9232_v37 }
 0xbb3   :  { %7572 = vtanh.f32 %v4224_v6  ;;  %v4230_v55 = vsub.f32 1.0, %v7561_v1  ;;  %v4238_v16 = vmul.f32 %v7561_v1, %v9693_v33 }
 0xbb4   :  { %v7563_v10 = vpop.eup %7562 }
 0xbb5   :  { %v4233_v63 = vsub.f32 1.0, %v7563_v10  ;;  %v4241_v44 = vmul.f32 %v7563_v10, %v9695_v48 }
 0xbba   :  { %v7565_v43 = vpop.eup %7564 }
 0xbbb   :  { %v7567_v3 = vpop.eup %7566  ;;  %v4235_v21 = vmul.f32 %v7565_v43, %v4231_v47 }
 0xbbc   :  { %v7569_v14 = vpop.eup %7568  ;;  %v4232_v26 = vsub.f32 1.0, %v7567_v3  ;;  %v4240_v45 = vmul.f32 %v7567_v3, %v9699_v56  ;;  %v3040_v3 = vadd.f32 1.0, %v9279_v54 }
 0xbbd   :  { %v9745_v20 = vadd.f32 %v4239_v2, %v4235_v21  ;;  %v4234_v59 = vmul.f32 %v7569_v14, %v4230_v55  ;;  %v3034_v55 = vadd.f32 1.0, %v9272_v9 }
 0xbbe   :  { %v7571_v36 = vpop.eup %7570 }
 0xbbf   :  { %v4237_v62 = vmul.f32 %v7571_v36, %v4233_v63  ;;  %v9749_v13 = vadd.f32 %v4238_v16, %v4234_v59 }
 0xbc0   :  { %v7573_v35 = vpop.eup %7572 }
 0xbc1   :  { %v9751_v0 = vadd.f32 %v4241_v44, %v4237_v62  ;;  %v4236_v15 = vmul.f32 %v7573_v35, %v4232_v26 }
 0xbc3   :  { %6983 = vmatprep.subr.mxu0 %v9751_v0  ;;  %v9755_v34 = vadd.f32 %v4240_v45, %v4236_v15 }
 0xbc4   :  { %6984 = vmatpush3.msra.mxu0 %v9751_v0 }
 0xbc5   :  { %6985 = vmatprep.subr.mxu0 %v9755_v34 }
 0xbc6   :  { %6986 = vmatpush3.msra.mxu0 %v9755_v34 }
 0xbc7   :  { %6987 = vmatprep.subr.mxu0 %v9745_v20 }
 0xbc8   :  { %6988 = vmatpush3.msra.mxu0 %v9745_v20 }
 0xbc9   :  { %6989 = vmatprep.subr.mxu0 %v9749_v13 }
 0xbca   :  { %6990 = vmatpush3.msra.mxu0 %v9749_v13 }
 0xbcb   :  { %6992 = vmatmul.mubr.msk.f32.vlgmr.msra.gmra.mxu0 %vm752_vm1, %v9600_v12 }
 0xbcc   :  { %6994 = vmatprep.mubr.msk.f32.mxu0 %vm752_vm1, %v9607_v7 }
 0xbcf   :  { %6995 = vmatmul.mubr.msk.f32.gmra.mxu0 %vm752_vm1, %v9614_v41 }
 0xbd0   :  { %6997 = vmatprep.mubr.msk.f32.mxu0 %vm752_vm1, %v9621_v57 }
 0xbd3   :  { %6998 = vmatmul.mubr.msk.f32.gmra.mxu0 %vm752_vm1, %v9628_v5 }
 0xbd4   :  { %7000 = vmatprep.mubr.msk.f32.mxu0 %vm752_vm1, %v9635_v19 }
 0xbd7   :  { %7001 = vmatmul.mubr.msk.f32.gmra.mxu0 %vm752_vm1, %v9642_v50 }
 0xbd8   :  { %7003 = vmatprep.mubr.msk.f32.mxu0 %vm752_vm1, %v9649_v31 }
 0xbdb   :  { %7004 = vmatmul.mubr.msk.f32.gmra.mxu0 %vm752_vm1, %v9656_v17 }
 0xbdc   :  { %7006 = vmatprep.mubr.msk.f32.mxu0 %vm752_vm1, %v9663_v29 }
 0xbdf   :  { %7007 = vmatmul.mubr.msk.f32.gmra.mxu0 %vm752_vm1, %v9670_v8 }
 0xbe0   :  { %7043 = vmatprep.mubr.msk.f32.mxu0 %vm752_vm1, %v9465_v24  ;;  %v3028_v24 = vadd.f32 1.0, %v9265_v11 }
 0xc8b   :  { %v6993_v22 = vpop.f32.mrf.mxu0 }
 0xc8c   :  { %v4388_v40 = vadd.f32 %v6993_v22, %v3004_v58 }
 0xc8d   :  { %v4328_v4 = vpop.f32.mrf.mxu0 }
 0xc8e   :  { %v6318_v27 = vmul.f32 -1.442695, %v4388_v40  ;;  %v4387_v39 = vadd.f32 %v4328_v4, %v2998_v52 }
 0xc8f   :  { %v6996_v32 = vpop.f32.mrf.mxu0 }
 0xc90   :  { %7574 = vpow2.f32 %v6318_v27  ;;  %v6317_v61 = vmul.f32 -1.442695, %v4387_v39  ;;  %v4390_v6 = vadd.f32 %v6996_v32, %v3016_v18 }
 0xc91   :  { %v4338_v42 = vpop.f32.mrf.mxu0 }
 0xc92   :  { %7576 = vpow2.f32 %v6317_v61  ;;  %v6320_v46 = vmul.f32 -1.442695, %v4390_v6  ;;  %v4389_v1 = vadd.f32 %v4338_v42, %v3010_v25  ;;  %v10404_v25 = vld [vmem:[#allocation12_spill] sm:$0xff] }
 0xc93   :  { %v6999_v10 = vpop.f32.mrf.mxu0  ;;  %v3052_v61 = vadd.f32 1.0, %v10404_v25 }
 0xc94   :  { %7578 = vpow2.f32 %v6320_v46  ;;  %v6319_v47 = vmul.f32 -1.442695, %v4389_v1  ;;  %v4416_v30 = vadd.f32 %v6999_v10, %v3028_v24  ;;  %v10405_v1 = vld [vmem:[#allocation8_spill] sm:$0xff] }
 0xc95   :  { %v4348_v43 = vpop.f32.mrf.mxu0  ;;  %v3046_v10 = vadd.f32 1.0, %v10405_v1 }
 0xc96   :  { %7580 = vpow2.f32 %v6319_v47  ;;  %v6322_v37 = vmul.f32 -1.442695, %v4416_v30  ;;  %v4415_v21 = vadd.f32 %v4348_v43, %v3022_v51  ;;  %v10406_v43 = vld [vmem:[#allocation20_spill] sm:$0xff] }
 0xc97   :  { %v7002_v2 = vpop.f32.mrf.mxu0 }
 0xc98   :  { %v6321_v14 = vmul.f32 -1.442695, %v4415_v21  ;;  %v4418_v11 = vadd.f32 %v7002_v2, %v3040_v3  ;;  %7582 = vpow2.f32 %v6322_v37  ;;  %v3064_v3 = vadd.f32 1.0, %v10406_v43 }
 0xc99   :  { %v4358_v63 = vpop.f32.mrf.mxu0 }
 0xc9a   :  { %v6324_v59 = vmul.f32 -1.442695, %v4418_v11  ;;  %v4417_v16 = vadd.f32 %v4358_v63, %v3034_v55  ;;  %7584 = vpow2.f32 %v6321_v14  ;;  %v10407_v14 = vld [vmem:[#allocation16_spill] sm:$0xff] }
 0xc9b   :  { %v7005_v58 = vpop.f32.mrf.mxu0  ;;  %v3058_v11 = vadd.f32 1.0, %v10407_v14  ;;  %v10413_v14 = vld [vmem:[#allocation23_spill] sm:$0xff] }
 0xc9c   :  { %v6323_v49 = vmul.f32 -1.442695, %v4417_v16  ;;  %7586 = vpow2.f32 %v6324_v59 }
 0xc9d   :  { %v7575_v36 = vpop.eup %7574  ;;  %v4368_v4 = vpop.f32.mrf.mxu0 }
 0xc9e   :  { %v4404_v62 = vadd.f32 1.0, %v7575_v36  ;;  %7588 = vpow2.f32 %v6323_v49 }
 0xc9f   :  { %v7577_v44 = vpop.eup %7576  ;;  %v7008_v46 = vpop.f32.mrf.mxu0 }
 0xca0   :  { %7590 = vrcp.f32 %v4404_v62  ;;  %v4403_v54 = vadd.f32 1.0, %v7577_v44 }
 0xca1   :  { %v7579_v26 = vpop.eup %7578  ;;  %v4378_v55 = vpop.f32.mrf.mxu0 }
 0xca2   :  { %7592 = vrcp.f32 %v4403_v54  ;;  %v4406_v35 = vadd.f32 1.0, %v7579_v26 }
 0xca3   :  { %v7581_v15 = vpop.eup %7580 }
 0xca4   :  { %7594 = vrcp.f32 %v4406_v35  ;;  %v4405_v9 = vadd.f32 1.0, %v7581_v15 }
 0xca5   :  { %v7583_v45 = vpop.eup %7582 }
 0xca6   :  { %7596 = vrcp.f32 %v4405_v9  ;;  %v4432_v40 = vadd.f32 1.0, %v7583_v45 }
 0xca7   :  { %v7585_v22 = vpop.eup %7584 }
 0xca8   :  { %v4431_v27 = vadd.f32 1.0, %v7585_v22  ;;  %7598 = vrcp.f32 %v4432_v40 }
 0xca9   :  { %v7587_v52 = vpop.eup %7586 }
 0xcaa   :  { %v4434_v32 = vadd.f32 1.0, %v7587_v52  ;;  %7600 = vrcp.f32 %v4431_v27 }
 0xcab   :  { %v7589_v18 = vpop.eup %7588 }
 0xcac   :  { %v4433_v24 = vadd.f32 1.0, %v7589_v18  ;;  %7602 = vrcp.f32 %v4434_v32 }
 0xcad   :  { %v7591_v39 = vpop.eup %7590 }
 0xcae   :  { %v4444_v6 = vmul.f32 %v7591_v39, %v7005_v58 }
 0xcaf   :  { %v7593_v42 = vpop.eup %7592 }
 0xcb0   :  { %v4448_v51 = vadd.f32 %v4444_v6, %v3052_v61  ;;  %v4443_v47 = vmul.f32 %v7593_v42, %v4368_v4 }
 0xcb1   :  { %v7595_v30 = vpop.eup %7594 }
 0xcb2   :  { %7604 = vtanh.f32 %v4448_v51  ;;  %v4447_v37 = vadd.f32 %v4443_v47, %v3046_v10  ;;  %v4446_v21 = vmul.f32 %v7595_v30, %v7008_v46  ;;  %v10411_v51 = vld [vmem:[#allocation19_spill] sm:$0xff] }
 0xcb3   :  { %v7597_v2 = vpop.eup %7596  ;;  %7606 = vrcp.f32 %v4433_v24 }
 0xcb4   :  { %7608 = vtanh.f32 %v4447_v37  ;;  %v4450_v63 = vadd.f32 %v4446_v21, %v3064_v3  ;;  %v4445_v59 = vmul.f32 %v7597_v2, %v4378_v55  ;;  %v10412_v3 = vld [vmem:[#allocation29_spill] sm:$0xff] }
 0xcb5   :  { %v7599_v49 = vpop.eup %7598  ;;  %v3030_v37 = vadd.f32 1.0, %v10412_v3 }
 0xcb6   :  { %7610 = vtanh.f32 %v4450_v63  ;;  %v4449_v16 = vadd.f32 %v4445_v59, %v3058_v11  ;;  %v4456_v44 = vsub.f32 1.0, %v7599_v49  ;;  %v4464_v15 = vmul.f32 %v7599_v49, %v9745_v20  ;;  %v10414_v49 = vld [vmem:[#allocation10_spill] sm:$0xff] }
 0xcb7   :  { %v7601_v36 = vpop.eup %7600  ;;  %v3024_v11 = vadd.f32 1.0, %v10413_v14 }
 0xcb8   :  { %7612 = vtanh.f32 %v4449_v16  ;;  %v4455_v9 = vsub.f32 1.0, %v7601_v36  ;;  %v4463_v40 = vmul.f32 %v7601_v36, %v9749_v13  ;;  %v3042_v36 = vadd.f32 1.0, %v10414_v49  ;;  %v10419_v49 = vld [vmem:[#allocation22_spill] sm:$0xff] }
 0xcb9   :  { %v7603_v62 = vpop.eup %7602 }
 0xcba   :  { %v4458_v58 = vsub.f32 1.0, %v7603_v62  ;;  %v4466_v27 = vmul.f32 %v7603_v62, %v9751_v0 }
 0xcbf   :  { %v7605_v54 = vpop.eup %7604 }
 0xcc0   :  { %v7607_v26 = vpop.eup %7606  ;;  %v4460_v35 = vmul.f32 %v7605_v54, %v4456_v44 }
 0xcc1   :  { %v7609_v45 = vpop.eup %7608  ;;  %v4457_v39 = vsub.f32 1.0, %v7607_v26  ;;  %v4465_v42 = vmul.f32 %v7607_v26, %v9755_v34  ;;  %v10415_v26 = vld [vmem:[#allocation27_spill] sm:$0xff] }
 0xcc2   :  { %v9801_v22 = vadd.f32 %v4464_v15, %v4460_v35  ;;  %v4459_v52 = vmul.f32 %v7609_v45, %v4455_v9  ;;  %v3036_v35 = vadd.f32 1.0, %v10415_v26 }
 0xcc3   :  { %v7611_v4 = vpop.eup %7610 }
 0xcc4   :  { %v4462_v18 = vmul.f32 %v7611_v4, %v4458_v58  ;;  %v9805_v32 = vadd.f32 %v4463_v40, %v4459_v52 }
 0xcc5   :  { %v7613_v25 = vpop.eup %7612 }
 0xcc6   :  { %v9807_v61 = vadd.f32 %v4466_v27, %v4462_v18  ;;  %v4461_v6 = vmul.f32 %v7613_v25, %v4457_v39 }
 0xcc8   :  { %7009 = vmatprep.subr.mxu1 %v9807_v61  ;;  %v9811_v24 = vadd.f32 %v4465_v42, %v4461_v6 }
 0xcc9   :  { %7010 = vmatpush3.msra.mxu1 %v9807_v61 }
 0xcca   :  { %7011 = vmatprep.subr.mxu1 %v9811_v24 }
 0xccb   :  { %7012 = vmatpush3.msra.mxu1 %v9811_v24 }
 0xccc   :  { %7013 = vmatprep.subr.mxu1 %v9801_v22 }
 0xccd   :  { %7014 = vmatpush3.msra.mxu1 %v9801_v22 }
 0xcce   :  { %7015 = vmatprep.subr.mxu1 %v9805_v32 }
 0xccf   :  { %7016 = vmatpush3.msra.mxu1 %v9805_v32 }
 0xcd0   :  { %7018 = vmatmul.mubr.msk.f32.vlgmr.msra.gmra.mxu1 %vm752_vm1, %v9600_v12  ;;  %v7909_v12 = vld [vmem:[%s10224_s4 + $0x60] sm:$0xff] }
 0xcd1   :  { %7020 = vmatprep.mubr.msk.f32.mxu1 %vm752_vm1, %v9607_v7  ;;  %v10408_v7 = vld [vmem:[#allocation21_spill] sm:$0xff] }
 0xcd4   :  { %7021 = vmatmul.mubr.msk.f32.gmra.mxu1 %vm752_vm1, %v9614_v41  ;;  %v3006_v41 = vadd.f32 1.0, %v10408_v7 }
 0xcd5   :  { %7023 = vmatprep.mubr.msk.f32.mxu1 %vm752_vm1, %v9621_v57 }
 0xcd8   :  { %7024 = vmatmul.mubr.msk.f32.gmra.mxu1 %vm752_vm1, %v9628_v5  ;;  %v10409_v5 = vld [vmem:[#allocation15_spill] sm:$0xff] }
 0xcd9   :  { %7026 = vmatprep.mubr.msk.f32.mxu1 %vm752_vm1, %v9635_v19  ;;  %v3000_v19 = vadd.f32 1.0, %v10409_v5 }
 0xcdc   :  { %7027 = vmatmul.mubr.msk.f32.gmra.mxu1 %vm752_vm1, %v9642_v50 }
 0xcdd   :  { %7029 = vmatprep.mubr.msk.f32.mxu1 %vm752_vm1, %v9649_v31 }
 0xce0   :  { %7030 = vmatmul.mubr.msk.f32.gmra.mxu1 %vm752_vm1, %v9656_v17  ;;  %v10410_v17 = vld [vmem:[#allocation25_spill] sm:$0xff] }
 0xce1   :  { %7032 = vmatprep.mubr.msk.f32.mxu1 %vm752_vm1, %v9663_v29  ;;  %v3018_v46 = vadd.f32 1.0, %v10410_v17 }
 0xce4   :  { %7033 = vmatmul.mubr.msk.f32.gmra.mxu1 %vm752_vm1, %v9670_v8  ;;  %v3012_v8 = vadd.f32 1.0, %v10411_v51 }
 0xce5   :  { %7069 = vmatprep.mubr.msk.f32.mxu1 %vm752_vm1, %v7909_v12 }
 0xd90   :  { %v7019_v57 = vpop.f32.mrf.mxu1 }
 0xd91   :  { %v4613_v50 = vadd.f32 %v7019_v57, %v3006_v41 }
 0xd92   :  { %v4553_v31 = vpop.f32.mrf.mxu1 }
 0xd93   :  { %v6338_v1 = vmul.f32 -1.442695, %v4613_v50  ;;  %v4612_v29 = vadd.f32 %v4553_v31, %v3000_v19 }
 0xd94   :  { %v7022_v10 = vpop.f32.mrf.mxu1 }
 0xd95   :  { %7614 = vpow2.f32 %v6338_v1  ;;  %v6337_v47 = vmul.f32 -1.442695, %v4612_v29  ;;  %v4615_v30 = vadd.f32 %v7022_v10, %v3018_v46  ;;  %v10416_v29 = vld [vmem:[#allocation18_spill] sm:$0xff] }
 0xd96   :  { %v4563_v43 = vpop.f32.mrf.mxu1  ;;  %v3054_v10 = vadd.f32 1.0, %v10416_v29 }
 0xd97   :  { %7616 = vpow2.f32 %v6337_v47  ;;  %v6340_v21 = vmul.f32 -1.442695, %v4615_v30  ;;  %v4614_v2 = vadd.f32 %v4563_v43, %v3012_v8  ;;  %v10417_v43 = vld [vmem:[#allocation14_spill] sm:$0xff] }
 0xd98   :  { %v7025_v55 = vpop.f32.mrf.mxu1  ;;  %v3048_v3 = vadd.f32 1.0, %v10417_v43 }
 0xd99   :  { %7618 = vpow2.f32 %v6340_v21  ;;  %v6339_v63 = vmul.f32 -1.442695, %v4614_v2  ;;  %v4641_v59 = vadd.f32 %v7025_v55, %v3030_v37  ;;  %v10418_v55 = vld [vmem:[#allocation26_spill] sm:$0xff] }
 0xd9a   :  { %v4573_v16 = vpop.f32.mrf.mxu1  ;;  %v3066_v14 = vadd.f32 1.0, %v10418_v55 }
 0xd9b   :  { %7620 = vpow2.f32 %v6339_v63  ;;  %v6342_v62 = vmul.f32 -1.442695, %v4641_v59  ;;  %v4640_v44 = vadd.f32 %v4573_v16, %v3024_v11 }
 0xd9c   :  { %v7028_v54 = vpop.f32.mrf.mxu1 }
 0xd9d   :  { %v6341_v15 = vmul.f32 -1.442695, %v4640_v44  ;;  %v4643_v9 = vadd.f32 %v7028_v54, %v3042_v36  ;;  %7622 = vpow2.f32 %v6342_v62  ;;  %v3060_v36 = vadd.f32 1.0, %v10419_v49  ;;  %v10423_v49 = vld [vmem:[#allocation24_spill] sm:$0xff] }
 0xd9e   :  { %v4583_v45 = vpop.f32.mrf.mxu1 }
 0xd9f   :  { %v6344_v58 = vmul.f32 -1.442695, %v4643_v9  ;;  %v4642_v52 = vadd.f32 %v4583_v45, %v3036_v35  ;;  %7624 = vpow2.f32 %v6341_v15 }
 0xda0   :  { %v7031_v41 = vpop.f32.mrf.mxu1 }
 0xda1   :  { %v6343_v40 = vmul.f32 -1.442695, %v4642_v52  ;;  %7626 = vpow2.f32 %v6344_v58  ;;  %v5185_v58 = vlaneseq }
 0xda2   :  { %v7615_v4 = vpop.eup %7614  ;;  %v4593_v50 = vpop.f32.mrf.mxu1 }
 0xda3   :  { %v4629_v18 = vadd.f32 1.0, %v7615_v4  ;;  %7628 = vpow2.f32 %v6343_v40 }
 0xda4   :  { %v7617_v27 = vpop.eup %7616  ;;  %v7034_v30 = vpop.f32.mrf.mxu1 }
 0xda5   :  { %7630 = vrcp.f32 %v4629_v18  ;;  %v4628_v39 = vadd.f32 1.0, %v7617_v27 }
 0xda6   :  { %v7619_v25 = vpop.eup %7618  ;;  %v4603_v16 = vpop.f32.mrf.mxu1 }
 0xda7   :  { %7632 = vrcp.f32 %v4628_v39  ;;  %v4631_v6 = vadd.f32 1.0, %v7619_v25 }
 0xda8   :  { %v7621_v42 = vpop.eup %7620 }
 0xda9   :  { %7634 = vrcp.f32 %v4631_v6  ;;  %v4630_v12 = vadd.f32 1.0, %v7621_v42 }
 0xdaa   :  { %v7623_v7 = vpop.eup %7622 }
 0xdab   :  { %7636 = vrcp.f32 %v4630_v12  ;;  %v4657_v19 = vadd.f32 1.0, %v7623_v7  ;;  %v5150_v12 = vld [vmem:[%s10221_s1] sm:$0xff] }
 0xdac   :  { %v7625_v57 = vpop.eup %7624  ;;  %vm5151_vm2 = vcmp.gt.s32.totalorder %v5150_v12, 0 }
 0xdad   :  { %v4656_v17 = vadd.f32 1.0, %v7625_v57  ;;  %7638 = vrcp.f32 %v4657_v19 }
 0xdae   :  { %v7627_v5 = vpop.eup %7626 }
 0xdaf   :  { %v4659_v1 = vadd.f32 1.0, %v7627_v5  ;;  %7640 = vrcp.f32 %v4656_v17 }
 0xdb0   :  { %v7629_v31 = vpop.eup %7628 }
 0xdb1   :  { %v4658_v47 = vadd.f32 1.0, %v7629_v31  ;;  %7642 = vrcp.f32 %v4659_v1 }
 0xdb2   :  { %v7631_v46 = vpop.eup %7630 }
 0xdb3   :  { %v4669_v51 = vmul.f32 %v7631_v46, %v7031_v41  ;;  %v9865_v41 = vshrl.u32 %v5185_v58, 7  ;;  %v9970_v58 = vld [vmem:[%s10224_s4 + $0xa8] sm:$0xff] }
 0xdb4   :  { %v7633_v8 = vpop.eup %7632 }
 0xdb5   :  { %v4673_v37 = vadd.f32 %v4669_v51, %v3054_v10  ;;  %v4668_v21 = vmul.f32 %v7633_v8, %v4593_v50  ;;  %v5191_v29 = vsub.s32 1, %v9865_v41  ;;  %v5187_v10 = vsub.s32 0, %v9865_v41 }
 0xdb6   :  { %v7635_v2 = vpop.eup %7634  ;;  %v10420_v8 = vmov 0  }
 0xdb7   :  { %7644 = vtanh.f32 %v4673_v37  ;;  %v4672_v11 = vadd.f32 %v4668_v21, %v3048_v3  ;;  %v4671_v63 = vmul.f32 %v7635_v2, %v7034_v30  ;;  %v5207_v3 = vsub.s32 5, %v9865_v41  ;;  %v9896_v21 = vld [vmem:[%s10224_s4 + $0x68] sm:$0xff] }
 0xdb8   :  { %v7637_v59 = vpop.eup %7636  ;;  %7646 = vrcp.f32 %v4658_v47  ;;  %v9879_v47 = vsel %vm5151_vm2, 1, %v10420_v8  ;;  %v10421_v2 = vld [vmem:[#allocation28_spill] sm:$0xff] }
 0xdb9   :  { %7648 = vtanh.f32 %v4672_v11  ;;  %v4675_v62 = vadd.f32 %v4671_v63, %v3066_v14  ;;  %v4670_v44 = vmul.f32 %v7637_v59, %v4603_v16  ;;  %v5192_v30 = vrot.slane %v9879_v47, %v5191_v29  ;;  %v10422_v11 = vld [vmem:[#allocation37_spill] sm:$0xff] }
 0xdba   :  { %v7639_v26 = vpop.eup %7638  ;;  %v5188_v43 = vrot.slane %v9879_v47, %v5187_v10  ;;  %v5208_v59 = vrot.slane %v9879_v47, %v5207_v3  ;;  %v10428_v10 = vld [vmem:[#allocation47_spill] sm:$0xff] }
 0xdbb   :  { %7650 = vtanh.f32 %v4675_v62  ;;  %v4674_v54 = vadd.f32 %v4670_v44, %v3060_v36  ;;  %v4681_v9 = vsub.f32 1.0, %v7639_v26  ;;  %v4689_v4 = vmul.f32 %v7639_v26, %v9801_v22  ;;  %v10424_v44 = vld [vmem:[#allocation30_spill] sm:$0xff]  ;;  %v10429_v3 = vld [vmem:[#allocation43_spill] sm:$0xff] }
 0xdbc   :  { %v7641_v35 = vpop.eup %7640  ;;  %vm5218_vm3 = vcmp.eq.s32.totalorder %v5192_v30, 1  ;;  %vm5217_vm4 = vcmp.eq.s32.totalorder %v5188_v43, 1  ;;  %vm5222_vm5 = vcmp.eq.s32.totalorder %v5208_v59, 1  ;;  %v3153_v8 = vadd.f32 1.0, %v10428_v10 }
 0xdbd   :  { %7652 = vtanh.f32 %v4674_v54  ;;  %v4680_v18 = vsub.f32 1.0, %v7641_v35  ;;  %v4688_v42 = vmul.f32 %v7641_v35, %v9805_v32  ;;  %v5250_v37 = vsel %vm5218_vm3, %v9584_v28, -1.0  ;;  %v9907_v28 = vld [vmem:[%s10224_s4 + $0x70] sm:$0xff] }
 0xdbe   :  { %v7643_v15 = vpop.eup %7642  ;;  %v5249_v55 = vsel %vm5217_vm4, %v10421_v2, -1.0  ;;  %v5242_v14 = vsel %vm5218_vm3, %v9588_v38, -1.0  ;;  %v5241_v63 = vsel %vm5217_vm4, %v10422_v11, -1.0  ;;  %v5234_v16 = vsel %vm5218_vm3, %v9578_v60, -1.0  ;;  %v9919_v38 = vld [vmem:[%s10224_s4 + $0x78] sm:$0xff]  ;;  %v9930_v60 = vld [vmem:[%s10224_s4 + $0x80] sm:$0xff] }
 0xdbf   :  { %v4683_v39 = vsub.f32 1.0, %v7643_v15  ;;  %v4691_v5 = vmul.f32 %v7643_v15, %v9807_v61  ;;  %v5233_v36 = vsel %vm5217_vm4, %v10423_v49, -1.0  ;;  %v5226_v62 = vsel %vm5218_vm3, %v9582_v23, -1.0  ;;  %v9941_v23 = vld [vmem:[%s10224_s4 + $0x88] sm:$0xff]  ;;  %v9948_v35 = vld [vmem:[%s10224_s4 + $0x90] sm:$0xff]  ;;  %v9955_v15 = vld [vmem:[%s10224_s4 + $0x98] sm:$0xff] }
 0xdc0   :  { %v5225_v54 = vsel %vm5217_vm4, %v10424_v44, -1.0  ;;  %v10431_v49 = vld [vmem:[#allocation51_spill] sm:$0xff] }
 0xdc4   :  { %v7645_v45 = vpop.eup %7644 }
 0xdc5   :  { %v7647_v52 = vpop.eup %7646  ;;  %v4685_v40 = vmul.f32 %v7645_v45, %v4681_v9  ;;  %v9962_v9 = vld [vmem:[%s10224_s4 + $0xa0] sm:$0xff]  ;;  %v5203_v45 = vsub.s32 4, %v9865_v41 }
 0xdc6   :  { %v7649_v27 = vpop.eup %7648  ;;  %v4682_v19 = vsub.f32 1.0, %v7647_v52  ;;  %v4690_v1 = vmul.f32 %v7647_v52, %v9811_v24  ;;  %v9977_v52 = vld [vmem:[%s10224_s4 + $0xb0] sm:$0xff] }
 0xdc7   :  { %v9859_v25 = vadd.f32 %v4689_v4, %v4685_v40  ;;  %v4684_v6 = vmul.f32 %v7649_v27, %v4680_v18  ;;  %v5204_v40 = vrot.slane %v9879_v47, %v5203_v45  ;;  %v9985_v4 = vld [vmem:[%s10224_s4 + $0xb8] sm:$0xff]  ;;  %v10425_v18 = vmov 0.0   ;;  %v9993_v27 = vld [vmem:[%s10225_s5] sm:$0xff] }
 0xdc8   :  { %v7651_v7 = vpop.eup %7650 }
 0xdc9   :  { %v4687_v57 = vmul.f32 %v7651_v7, %v4683_v39  ;;  %v9868_v50 = vadd.f32 %v4688_v42, %v4684_v6  ;;  %vm5221_vm6 = vcmp.eq.s32.totalorder %v5204_v40, 1  ;;  %v5238_v12 = vsel %vm5222_vm5, %v9859_v25, -1.0 }
 0xdca   :  { %v7653_v31 = vpop.eup %7652  ;;  %v5253_v39 = vsel %vm5221_vm6, %v9807_v61, -1.0  ;;  %v5245_v42 = vsel %vm5221_vm6, %v9811_v24, -1.0  ;;  %v5237_v7 = vsel %vm5221_vm6, %v9801_v22, -1.0 }
 0xdcb   :  { %v9870_v17 = vadd.f32 %v4691_v5, %v4687_v57  ;;  %v4686_v46 = vmul.f32 %v7653_v31, %v4682_v19  ;;  %v5230_v61 = vsel %vm5222_vm5, %v9868_v50, -1.0  ;;  %v5229_v57 = vsel %vm5221_vm6, %v9805_v32, -1.0  ;;  %v10426_v5 = vld [vmem:[#allocation39_spill] sm:$0xff] }
 0xdcc   :  { %v3141_v19 = vadd.f32 1.0, %v10426_v5  ;;  %v10430_v32 = vld [vmem:[#allocation55_spill] sm:$0xff] }
 0xdcd   :  { %7035 = vmatprep.subr.mxu0 %v9870_v17  ;;  %v9876_v51 = vadd.f32 %v4690_v1, %v4686_v46  ;;  %v5254_v26 = vsel %vm5222_vm5, %v9870_v17, -1.0  ;;  %v10427_v46 = vld [vmem:[#allocation35_spill] sm:$0xff]  ;;  %v3165_v11 = vadd.f32 1.0, %v10430_v32 }
 0xdce   :  { %7036 = vmatpush3.msra.mxu0 %v9870_v17  ;;  %v3135_v24 = vadd.f32 1.0, %v10427_v46 }
 0xdcf   :  { %7037 = vmatprep.subr.mxu0 %v9876_v51  ;;  %v5246_v6 = vsel %vm5222_vm5, %v9876_v51, -1.0 }
 0xdd0   :  { %7038 = vmatpush3.msra.mxu0 %v9876_v51 }
 0xdd1   :  { %7039 = vmatprep.subr.mxu0 %v9859_v25 }
 0xdd2   :  { %7040 = vmatpush3.msra.mxu0 %v9859_v25 }
 0xdd3   :  { %7041 = vmatprep.subr.mxu0 %v9868_v50 }
 0xdd4   :  { %7042 = vmatpush3.msra.mxu0 %v9868_v50 }
 0xdd5   :  { %7044 = vmatmul.mubr.msk.f32.vlgmr.msra.gmra.mxu0 %vm752_vm1, %v9896_v21  ;;  %5385 = vmatprep.subr.mxu0 %v5250_v37  ;;  %v3147_v37 = vadd.f32 1.0, %v10429_v3 }
 0xdd6   :  { %5386 = vmatpush1.msra.mxu0 %v5249_v55  ;;  %7046 = vmatprep.mubr.msk.f32.mxu0 %vm752_vm1, %v9907_v28 }
 0xdd7   :  { %5387 = vmatprep.subr.mxu0 %v5242_v14 }
 0xdd8   :  { %5388 = vmatpush1.msra.mxu0 %v5241_v63 }
 0xdd9   :  { %7047 = vmatmul.mubr.msk.f32.gmra.mxu0 %vm752_vm1, %v9919_v38  ;;  %5389 = vmatprep.subr.mxu0 %v5234_v16 }
 0xdda   :  { %5390 = vmatpush1.msra.mxu0 %v5233_v36  ;;  %7049 = vmatprep.mubr.msk.f32.mxu0 %vm752_vm1, %v9930_v60  ;;  %v3159_v36 = vadd.f32 1.0, %v10431_v49 }
 0xddb   :  { %5391 = vmatprep.subr.mxu0 %v5226_v62 }
 0xddc   :  { %5392 = vmatpush1.msra.mxu0 %v5225_v54 }
 0xddd   :  { %7050 = vmatmul.mubr.msk.f32.gmra.mxu0 %vm752_vm1, %v9941_v23  ;;  %5563 = vmatprep.subr.mxu0 %v5254_v26  ;;  %v10432_v26 = vld [vmem:[#allocation40_spill] sm:$0xff] }
 0xdde   :  { %7052 = vmatprep.mubr.msk.f32.mxu0 %vm752_vm1, %v9948_v35  ;;  %v3177_v45 = vadd.f32 1.0, %v10432_v26  ;;  %v10435_v26 = vld [vmem:[#allocation44_spill] sm:$0xff] }
 0xde1   :  { %7053 = vmatmul.mubr.msk.f32.gmra.mxu0 %vm752_vm1, %v9955_v15 }
 0xde2   :  { %7055 = vmatprep.mubr.msk.f32.mxu0 %vm752_vm1, %v9962_v9 }
 0xde5   :  { %7056 = vmatmul.mubr.msk.f32.gmra.mxu0 %vm752_vm1, %v9970_v58 }
 0xde6   :  { %7058 = vmatprep.mubr.msk.f32.mxu0 %vm752_vm1, %v9977_v52 }
 0xde9   :  { %7059 = vmatmul.mubr.msk.f32.gmra.mxu0 %vm752_vm1, %v9985_v4 }
 0xdea   :  { %5425 = vmatprep.mubr.f32.mxu0 %v10425_v18 }
 0xded   :  { %6385 = vmatmul.mubr.msk.f32.vlgmr.msra.gmra.mxu0 %vm752_vm1, %v9993_v27 }
 0xdee   :  { %5564 = vmatpush1.msra.mxu0 %v5253_v39  ;;  %5431 = vmatprep.mubr.f32.mxu0 %v10425_v18 }
 0xdef   :  { %5565 = vmatprep.subr.mxu0 %v5246_v6 }
 0xdf0   :  { %5566 = vmatpush1.msra.mxu0 %v5245_v42  ;;  %v10433_v42 = vld [vmem:[#allocation36_spill] sm:$0xff] }
 0xdf1   :  { %5567 = vmatprep.subr.mxu0 %v5238_v12  ;;  %v3171_v12 = vadd.f32 1.0, %v10433_v42  ;;  %v10436_v42 = vld [vmem:[#allocation56_spill] sm:$0xff] }
 0xdf2   :  { %5568 = vmatpush1.msra.mxu0 %v5237_v7 }
 0xdf3   :  { %5569 = vmatprep.subr.mxu0 %v5230_v61 }
 0xdf4   :  { %5570 = vmatpush1.msra.mxu0 %v5229_v57 }
 0xe95   :  { %v7045_v31 = vpop.f32.mrf.mxu0 }
 0xe96   :  { %v4838_v1 = vadd.f32 %v7045_v31, %v3141_v19 }
 0xe97   :  { %v4778_v29 = vpop.f32.mrf.mxu0 }
 0xe98   :  { %v6358_v30 = vmul.f32 -1.442695, %v4838_v1  ;;  %v4837_v43 = vadd.f32 %v4778_v29, %v3135_v24 }
 0xe99   :  { %v7048_v22 = vpop.f32.mrf.mxu0 }
 0xe9a   :  { %7654 = vpow2.f32 %v6358_v30  ;;  %v6357_v2 = vmul.f32 -1.442695, %v4837_v43  ;;  %v4840_v55 = vadd.f32 %v7048_v22, %v3153_v8 }
 0xe9b   :  { %v4788_v14 = vpop.f32.mrf.mxu0 }
 0xe9c   :  { %7656 = vpow2.f32 %v6357_v2  ;;  %v6360_v63 = vmul.f32 -1.442695, %v4840_v55  ;;  %v4839_v59 = vadd.f32 %v4788_v14, %v3147_v37 }
 0xe9d   :  { %v7051_v16 = vpop.f32.mrf.mxu0 }
 0xe9e   :  { %7658 = vpow2.f32 %v6360_v63  ;;  %v6359_v62 = vmul.f32 -1.442695, %v4839_v59  ;;  %v4866_v44 = vadd.f32 %v7051_v16, %v3165_v11  ;;  %v10434_v16 = vld [vmem:[#allocation48_spill] sm:$0xff] }
 0xe9f   :  { %v4798_v54 = vpop.f32.mrf.mxu0  ;;  %v3189_v49 = vadd.f32 1.0, %v10434_v16 }
 0xea0   :  { %7660 = vpow2.f32 %v6359_v62  ;;  %v6362_v40 = vmul.f32 -1.442695, %v4866_v44  ;;  %v4865_v39 = vadd.f32 %v4798_v54, %v3159_v36 }
 0xea1   :  { %v7054_v6 = vpop.f32.mrf.mxu0 }
 0xea2   :  { %v6361_v7 = vmul.f32 -1.442695, %v4865_v39  ;;  %v4868_v61 = vadd.f32 %v7054_v6, %v3177_v45  ;;  %7662 = vpow2.f32 %v6362_v40  ;;  %v3183_v45 = vadd.f32 1.0, %v10435_v26 }
 0xea3   :  { %v4808_v57 = vpop.f32.mrf.mxu0 }
 0xea4   :  { %v6364_v5 = vmul.f32 -1.442695, %v4868_v61  ;;  %v4867_v19 = vadd.f32 %v4808_v57, %v3171_v12  ;;  %7664 = vpow2.f32 %v6361_v7  ;;  %v3201_v12 = vadd.f32 1.0, %v10436_v42 }
 0xea5   :  { %v7057_v3 = vpop.f32.mrf.mxu0 }
 0xea6   :  { %v6363_v31 = vmul.f32 -1.442695, %v4867_v19  ;;  %7666 = vpow2.f32 %v6364_v5  ;;  %v10437_v19 = vld [vmem:[#allocation52_spill] sm:$0xff] }
 0xea7   :  { %v7655_v46 = vpop.eup %7654  ;;  %v4818_v14 = vpop.f32.mrf.mxu0 }
 0xea8   :  { %v4854_v24 = vadd.f32 1.0, %v7655_v46  ;;  %7668 = vpow2.f32 %v6363_v31  ;;  %v3195_v31 = vadd.f32 1.0, %v10437_v19  ;;  %v10441_v19 = vld [vmem:[#allocation49_spill] sm:$0xff] }
 0xea9   :  { %v7657_v1 = vpop.eup %7656  ;;  %v7060_v54 = vpop.f32.mrf.mxu0 }
 0xeaa   :  { %7670 = vrcp.f32 %v4854_v24  ;;  %v4853_v29 = vadd.f32 1.0, %v7657_v1 }
 0xeab   :  { %v7659_v10 = vpop.eup %7658  ;;  %v4828_v5 = vpop.f32.mrf.mxu0 }
 0xeac   :  { %7672 = vrcp.f32 %v4853_v29  ;;  %v4856_v8 = vadd.f32 1.0, %v7659_v10 }
 0xead   :  { %v7661_v30 = vpop.eup %7660 }
 0xeae   :  { %7674 = vrcp.f32 %v4856_v8  ;;  %v4855_v43 = vadd.f32 1.0, %v7661_v30 }
 0xeaf   :  { %v7663_v22 = vpop.eup %7662 }
 0xeb0   :  { %7676 = vrcp.f32 %v4855_v43  ;;  %v4882_v55 = vadd.f32 1.0, %v7663_v22 }
 0xeb1   :  { %v7665_v37 = vpop.eup %7664 }
 0xeb2   :  { %v4881_v11 = vadd.f32 1.0, %v7665_v37  ;;  %7678 = vrcp.f32 %v4882_v55 }
 0xeb3   :  { %v7667_v2 = vpop.eup %7666 }
 0xeb4   :  { %v4884_v59 = vadd.f32 1.0, %v7667_v2  ;;  %7680 = vrcp.f32 %v4881_v11 }
 0xeb5   :  { %v7669_v32 = vpop.eup %7668 }
 0xeb6   :  { %v4883_v44 = vadd.f32 1.0, %v7669_v32  ;;  %7682 = vrcp.f32 %v4884_v59 }
 0xeb7   :  { %v7671_v63 = vpop.eup %7670 }
 0xeb8   :  { %v4894_v36 = vmul.f32 %v7671_v63, %v7057_v3 }
 0xeb9   :  { %v7673_v62 = vpop.eup %7672 }
 0xeba   :  { %v4898_v40 = vadd.f32 %v4894_v36, %v3189_v49  ;;  %v4893_v39 = vmul.f32 %v7673_v62, %v4818_v14 }
 0xebb   :  { %v7675_v6 = vpop.eup %7674 }
 0xebc   :  { %7684 = vtanh.f32 %v4898_v40  ;;  %v4897_v7 = vadd.f32 %v4893_v39, %v3183_v45  ;;  %v4896_v61 = vmul.f32 %v7675_v6, %v7060_v54  ;;  %v5199_v45 = vsub.s32 3, %v9865_v41 }
 0xebd   :  { %v7677_v57 = vpop.eup %7676  ;;  %7686 = vrcp.f32 %v4883_v44  ;;  %v5195_v40 = vsub.s32 2, %v9865_v41 }
 0xebe   :  { %7688 = vtanh.f32 %v4897_v7  ;;  %v4900_v46 = vadd.f32 %v4896_v61, %v3201_v12  ;;  %v4895_v24 = vmul.f32 %v7677_v57, %v4828_v5 }
 0xebf   :  { %v7679_v29 = vpop.eup %7678  ;;  %v5196_v39 = vrot.slane %v9879_v47, %v5195_v40 }
 0xec0   :  { %7690 = vtanh.f32 %v4900_v46  ;;  %v4899_v1 = vadd.f32 %v4895_v24, %v3195_v31  ;;  %v4906_v30 = vsub.f32 1.0, %v7679_v29  ;;  %v4914_v37 = vmul.f32 %v7679_v29, %v9859_v25  ;;  %v10442_v29 = vld [vmem:[#allocation38_spill] sm:$0xff] }
 0xec1   :  { %v7681_v10 = vpop.eup %7680  ;;  %vm5219_vm8 = vcmp.eq.s32.totalorder %v5196_v39, 1  ;;  %v3149_v31 = vadd.f32 1.0, %v10441_v19 }
 0xec2   :  { %7692 = vtanh.f32 %v4899_v1  ;;  %v4905_v2 = vsub.f32 1.0, %v7681_v10  ;;  %v4913_v63 = vmul.f32 %v7681_v10, %v9868_v50  ;;  %v5251_v6 = vsel %vm5219_vm8, %v9695_v48, -1.0 }
 0xec3   :  { %v7683_v8 = vpop.eup %7682  ;;  %v5243_v12 = vsel %vm5219_vm8, %v9699_v56, -1.0  ;;  %v5235_v48 = vsel %vm5219_vm8, %v9689_v53, -1.0  ;;  %v5227_v56 = vsel %vm5219_vm8, %v9693_v33, -1.0  ;;  %v10089_v53 = vld [vmem:[%s10225_s5 + $0x8] sm:$0xff]  ;;  %v10100_v33 = vld [vmem:[%s10225_s5 + $0x10] sm:$0xff]  ;;  %v3167_v10 = vadd.f32 1.0, %v10442_v29 }
 0xec4   :  { %v4908_v14 = vsub.f32 1.0, %v7683_v8  ;;  %v4916_v49 = vmul.f32 %v7683_v8, %v9870_v17  ;;  %v5200_v17 = vrot.slane %v9879_v47, %v5199_v45  ;;  %6386 = vmatmul.mubr.msk.f32.gmra.mxu0 %vm752_vm1, %v10089_v53 }
 0xec5   :  { %5437 = vmatprep.mubr.f32.mxu0 %v10425_v18 }
 0xec6   :  { %vm5220_vm7 = vcmp.eq.s32.totalorder %v5200_v17, 1 }
 0xec7   :  { %v5244_v42 = vsel %vm5220_vm7, %v9755_v34, -1.0  ;;  %v5228_v34 = vsel %vm5220_vm7, %v9749_v13, -1.0  ;;  %v5325_v13 = vld [vmem:[%s10226_s6] sm:$0xff] }
 0xec8   :  { %6387 = vmatmul.mubr.msk.f32.gmra.mxu0 %vm752_vm1, %v10100_v33  ;;  %5331 = vperm.xlu0 %7092, %v5325_v13  }
 0xec9   :  { %v7685_v43 = vpop.eup %7684  ;;  %5443 = vmatprep.mubr.f32.mxu0 %v10425_v18 }
 0xeca   :  { %v7687_v22 = vpop.eup %7686  ;;  %v4910_v3 = vmul.f32 %v7685_v43, %v4906_v30 }
 0xecb   :  { %v7689_v55 = vpop.eup %7688  ;;  %v4907_v36 = vsub.f32 1.0, %v7687_v22  ;;  %v4915_v25 = vmul.f32 %v7687_v22, %v9876_v51  ;;  %v5252_v51 = vsel %vm5220_vm7, %v9751_v0, -1.0  ;;  %v5236_v0 = vsel %vm5220_vm7, %v9745_v20, -1.0  ;;  %v10111_v20 = vld [vmem:[%s10225_s5 + $0x18] sm:$0xff]  ;;  %v10443_v22 = vld [vmem:[#allocation57_spill] sm:$0xff] }
 0xecc   :  { %v10021_v32 = vadd.f32 %v4914_v37, %v4910_v3  ;;  %v4909_v11 = vmul.f32 %v7689_v55, %v4905_v2  ;;  %6388 = vmatmul.mubr.msk.f32.gmra.mxu0 %vm752_vm1, %v10111_v20  ;;  %v3161_v3 = vadd.f32 1.0, %v10443_v22  ;;  %v10449_v22 = vld [vmem:[#allocation58_spill] sm:$0xff] }
 0xecd   :  { %v7691_v59 = vpop.eup %7690  ;;  %5603 = vmatprep.mubr.f32.mxu0 %v10425_v18 }
 0xece   :  { %v4912_v16 = vmul.f32 %v7691_v59, %v4908_v14  ;;  %v10025_v62 = vadd.f32 %v4913_v63, %v4909_v11  ;;  %v10444_v14 = vld [vmem:[#allocation46_spill] sm:$0xff] }
 0xecf   :  { %v7693_v44 = vpop.eup %7692  ;;  %v3179_v11 = vadd.f32 1.0, %v10444_v14 }
 0xed0   :  { %v10027_v54 = vadd.f32 %v4916_v49, %v4912_v16  ;;  %v4911_v26 = vmul.f32 %v7693_v44, %v4907_v36  ;;  %6393 = vmatmul.mubr.msk.f32.vlgmr.msra.gmra.mxu0 %vm752_vm1, %v9993_v27  ;;  %v10445_v49 = vld [vmem:[#allocation42_spill] sm:$0xff] }
 0xed1   :  { %5609 = vmatprep.mubr.f32.mxu0 %v10425_v18  ;;  %v3173_v36 = vadd.f32 1.0, %v10445_v49  ;;  %v5215_v49 = vsub.s32 7, %v9865_v41 }
 0xed2   :  { %7061 = vmatprep.subr.mxu1 %v10027_v54  ;;  %v10033_v50 = vadd.f32 %v4915_v25, %v4911_v26 }
 0xed3   :  { %7062 = vmatpush3.msra.mxu1 %v10027_v54 }
 0xed4   :  { %7063 = vmatprep.subr.mxu1 %v10033_v50  ;;  %6394 = vmatmul.mubr.msk.f32.gmra.mxu0 %vm752_vm1, %v10089_v53 }
 0xed5   :  { %7064 = vmatpush3.msra.mxu1 %v10033_v50  ;;  %5615 = vmatprep.mubr.f32.mxu0 %v10425_v18 }
 0xed6   :  { %7065 = vmatprep.subr.mxu1 %v10021_v32 }
 0xed7   :  { %7066 = vmatpush3.msra.mxu1 %v10021_v32 }
 0xed8   :  { %7067 = vmatprep.subr.mxu1 %v10025_v62  ;;  %6395 = vmatmul.mubr.msk.f32.gmra.mxu0 %vm752_vm1, %v10100_v33 }
 0xed9   :  { %7068 = vmatpush3.msra.mxu1 %v10025_v62  ;;  %5621 = vmatprep.mubr.f32.mxu0 %v10425_v18 }
 0xeda   :  { %7070 = vmatmul.mubr.msk.f32.vlgmr.msra.gmra.mxu1 %vm752_vm1, %v9896_v21  ;;  %5474 = vmatprep.subr.mxu1 %v5252_v51  ;;  %v5327_v21 = vld [vmem:[%s10226_s6 + $0x10] sm:$0xff] }
 0xedb   :  { %5475 = vmatpush1.msra.mxu1 %v5251_v6  ;;  %7072 = vmatprep.mubr.msk.f32.mxu1 %vm752_vm1, %v9907_v28  ;;  %v5326_v28 = vld [vmem:[%s10226_s6 + $0x8] sm:$0xff] }
 0xedc   :  { %5476 = vmatprep.subr.mxu1 %v5244_v42  ;;  %6396 = vmatmul.mubr.msk.f32.gmra.mxu0 %vm752_vm1, %v10111_v20 }
 0xedd   :  { %5477 = vmatpush1.msra.mxu1 %v5243_v12  ;;  %5341 = vperm.xlu1 %7093, %v5327_v21  }
 0xede   :  { %7073 = vmatmul.mubr.msk.f32.gmra.mxu1 %vm752_vm1, %v9919_v38  ;;  %5478 = vmatprep.subr.mxu1 %v5236_v0  ;;  %v5328_v38 = vld [vmem:[%s10226_s6 + $0x18] sm:$0xff]  ;;  %s7945_s6 = smov [#allocation4]  }
 0xedf   :  { %5479 = vmatpush1.msra.mxu1 %v5235_v48  ;;  %7075 = vmatprep.mubr.msk.f32.mxu1 %vm752_vm1, %v9930_v60  ;;  %v10438_v60 = vld [vmem:[#allocation45_spill] sm:$0xff]  ;;  %s5946_s18 = sshll.u32 %s7945_s6, 4  ;;  %s5947_s18 = int_to_ptr.vmem [resolvable:$true] %s5946_s18 }
 0xee0   :  { %5480 = vmatprep.subr.mxu1 %v5228_v34  ;;  %5336 = vperm.xlu0 %7092, %v5326_v28   ;;  %s7921_s19 = scalar_lea.vmem %s5947_s18, 4096  ;;  %p7926_p1 = scmp.lt.s32.totalorder %s5947_s18, %s5947_s18 }
 0xee1   :  { %5481 = vmatpush1.msra.mxu1 %v5227_v56  ;;  %5346 = vperm.xlu1 %7093, %v5328_v38   ;;  %p7922_p0 = scmp.ne.s32.totalorder %s5947_s18, %s7921_s19  ;;  %p7927_p2 = scmp.lt.s32.totalorder %s7921_s19, %s7921_s19 }
 0xee2   :  { %7076 = vmatmul.mubr.msk.f32.gmra.mxu1 %vm752_vm1, %v9941_v23  ;;  %v3143_v23 = vadd.f32 1.0, %v10438_v60 }
 0xee3   :  { %7078 = vmatprep.mubr.msk.f32.mxu1 %vm752_vm1, %v9948_v35  ;;  %p7928_p3 = por %p7927_p2, %p7926_p1 }
 0xee5   :  { %p7929_p4 = pnand %p7928_p3, %p7922_p0 }
 0xee6   :  { %7079 = vmatmul.mubr.msk.f32.gmra.mxu1 %vm752_vm1, %v9955_v15  ;;  %v10439_v15 = vld [vmem:[#allocation41_spill] sm:$0xff] }
 0xee7   :  { %7081 = vmatprep.mubr.msk.f32.mxu1 %vm752_vm1, %v9962_v9  ;;  %v3137_v9 = vadd.f32 1.0, %v10439_v15 }
 0xeea   :  { %7082 = vmatmul.mubr.msk.f32.gmra.mxu1 %vm752_vm1, %v9970_v58 }
 0xeeb   :  { %7084 = vmatprep.mubr.msk.f32.mxu1 %vm752_vm1, %v9977_v52 }
 0xeee   :  { %7085 = vmatmul.mubr.msk.f32.gmra.mxu1 %vm752_vm1, %v9985_v4  ;;  %v10440_v4 = vld [vmem:[#allocation53_spill] sm:$0xff] }
 0xeef   :  { %5514 = vmatprep.mubr.f32.mxu1 %v10425_v18  ;;  %v3155_v7 = vadd.f32 1.0, %v10440_v4 }
 0xef2   :  { %6389 = vmatmul.mubr.msk.f32.vlgmr.msra.gmra.mxu1 %vm752_vm1, %v9993_v27 }
 0xef3   :  { %5520 = vmatprep.mubr.f32.mxu1 %v10425_v18 }
 0xef6   :  { %6390 = vmatmul.mubr.msk.f32.gmra.mxu1 %vm752_vm1, %v10089_v53 }
 0xef7   :  { %5526 = vmatprep.mubr.f32.mxu1 %v10425_v18 }
 0xefa   :  { %6391 = vmatmul.mubr.msk.f32.gmra.mxu1 %vm752_vm1, %v10100_v33 }
 0xefb   :  { %5532 = vmatprep.mubr.f32.mxu1 %v10425_v18 }
 0xefe   :  { %6392 = vmatmul.mubr.msk.f32.gmra.mxu1 %vm752_vm1, %v10111_v20 }
 0xeff   :  { %5692 = vmatprep.mubr.f32.mxu1 %v10425_v18 }
 0xf9a   :  { %v7071_v35 = vpop.f32.mrf.mxu1 }
 0xf9b   :  { %v5063_v58 = vadd.f32 %v7071_v35, %v3143_v23 }
 0xf9c   :  { %v5003_v52 = vpop.f32.mrf.mxu1 }
 0xf9d   :  { %v6378_v61 = vmul.f32 -1.442695, %v5063_v58  ;;  %v5062_v57 = vadd.f32 %v5003_v52, %v3137_v9  ;;  %v10446_v58 = vld [vmem:[#allocation54_spill] sm:$0xff] }
 0xf9e   :  { %v7074_v5 = vpop.f32.mrf.mxu1  ;;  %v3191_v52 = vadd.f32 1.0, %v10446_v58 }
 0xf9f   :  { %7694 = vpow2.f32 %v6378_v61  ;;  %v6377_v46 = vmul.f32 -1.442695, %v5062_v57  ;;  %v5065_v24 = vadd.f32 %v7074_v5, %v3155_v7  ;;  %v10447_v5 = vld [vmem:[#allocation50_spill] sm:$0xff] }
 0xfa0   :  { %v5013_v1 = vpop.f32.mrf.mxu1  ;;  %v3185_v19 = vadd.f32 1.0, %v10447_v5 }
 0xfa1   :  { %7696 = vpow2.f32 %v6377_v46  ;;  %v6380_v8 = vmul.f32 -1.442695, %v5065_v24  ;;  %v5064_v30 = vadd.f32 %v5013_v1, %v3149_v31  ;;  %v10448_v1 = vld [vmem:[#allocation32_spill] sm:$0xff] }
 0xfa2   :  { %v7077_v43 = vpop.f32.mrf.mxu1  ;;  %v3203_v29 = vadd.f32 1.0, %v10448_v1 }
 0xfa3   :  { %7698 = vpow2.f32 %v6380_v8  ;;  %v6379_v37 = vmul.f32 -1.442695, %v5064_v30  ;;  %v5091_v2 = vadd.f32 %v7077_v43, %v3167_v10 }
 0xfa4   :  { %v5023_v55 = vpop.f32.mrf.mxu1 }
 0xfa5   :  { %7700 = vpow2.f32 %v6379_v37  ;;  %v6382_v63 = vmul.f32 -1.442695, %v5091_v2  ;;  %v5090_v59 = vadd.f32 %v5023_v55, %v3161_v3  ;;  %v3197_v3 = vadd.f32 1.0, %v10449_v22 }
 0xfa6   :  { %v7080_v16 = vpop.f32.mrf.mxu1 }
 0xfa7   :  { %v6381_v44 = vmul.f32 -1.442695, %v5090_v59  ;;  %v5093_v26 = vadd.f32 %v7080_v16, %v3179_v11  ;;  %7702 = vpow2.f32 %v6382_v63 }
 0xfa8   :  { %v5033_v25 = vpop.f32.mrf.mxu1 }
 0xfa9   :  { %v6384_v45 = vmul.f32 -1.442695, %v5093_v26  ;;  %v5092_v40 = vadd.f32 %v5033_v25, %v3173_v36  ;;  %7704 = vpow2.f32 %v6381_v44  ;;  %v5211_v36 = vsub.s32 6, %v9865_v41 }
 0xfaa   :  { %v7083_v13 = vpop.f32.mrf.mxu1 }
 0xfab   :  { %v6383_v17 = vmul.f32 -1.442695, %v5092_v40  ;;  %7706 = vpow2.f32 %v6384_v45 }
 0xfac   :  { %v7695_v39 = vpop.eup %7694  ;;  %v5043_v60 = vpop.f32.mrf.mxu1 }
 0xfad   :  { %v5079_v51 = vadd.f32 1.0, %v7695_v39  ;;  %7708 = vpow2.f32 %v6383_v17 }
 0xfae   :  { %v7697_v6 = vpop.eup %7696  ;;  %v7086_v57 = vpop.f32.mrf.mxu1 }
 0xfaf   :  { %7710 = vrcp.f32 %v5079_v51  ;;  %v5078_v42 = vadd.f32 1.0, %v7697_v6 }
 0xfb0   :  { %v7699_v12 = vpop.eup %7698  ;;  %v5053_v43 = vpop.f32.mrf.mxu1 }
 0xfb1   :  { %7712 = vrcp.f32 %v5078_v42  ;;  %v5081_v0 = vadd.f32 1.0, %v7699_v12  ;;  %v5216_v12 = vrot.slane %v9879_v47, %v5215_v49 }
 0xfb2   :  { %v7701_v48 = vpop.eup %7700 }
 0xfb3   :  { %7714 = vrcp.f32 %v5081_v0  ;;  %v5080_v34 = vadd.f32 1.0, %v7701_v48  ;;  %v5212_v0 = vrot.slane %v9879_v47, %v5211_v36  ;;  %vm5224_vm9 = vcmp.eq.s32.totalorder %v5216_v12, 1 }
 0xfb4   :  { %v7703_v56 = vpop.eup %7702 }
 0xfb5   :  { %7716 = vrcp.f32 %v5080_v34  ;;  %v5107_v38 = vadd.f32 1.0, %v7703_v56  ;;  %vm5223_vm10 = vcmp.eq.s32.totalorder %v5212_v0, 1 }
 0xfb6   :  { %v7705_v21 = vpop.eup %7704  ;;  %v5247_v47 = vsel %vm5223_vm10, %v10033_v50, -1.0  ;;  %v5239_v58 = vsel %vm5223_vm10, %v10021_v32, -1.0 }
 0xfb7   :  { %v5106_v35 = vadd.f32 1.0, %v7705_v21  ;;  %7718 = vrcp.f32 %v5107_v38 }
 0xfb8   :  { %v7707_v28 = vpop.eup %7706 }
 0xfb9   :  { %v5109_v9 = vadd.f32 1.0, %v7707_v28  ;;  %7720 = vrcp.f32 %v5106_v35  ;;  %v5255_v35 = vsel %vm5223_vm10, %v10027_v54, -1.0 }
 0xfba   :  { %v7709_v23 = vpop.eup %7708 }
 0xfbb   :  { %v5108_v61 = vadd.f32 1.0, %v7709_v23  ;;  %7722 = vrcp.f32 %v5109_v9 }
 0xfbc   :  { %v7711_v15 = vpop.eup %7710 }
 0xfbd   :  { %v5119_v4 = vmul.f32 %v7711_v15, %v7083_v13 }
 0xfbe   :  { %v7713_v7 = vpop.eup %7712 }
 0xfbf   :  { %v5123_v31 = vadd.f32 %v5119_v4, %v3191_v52  ;;  %v5118_v46 = vmul.f32 %v7713_v7, %v5043_v60  ;;  %v5231_v4 = vsel %vm5223_vm10, %v10025_v62, -1.0 }
 0xfc0   :  { %v7715_v24 = vpop.eup %7714 }
 0xfc1   :  { %7724 = vtanh.f32 %v5123_v31  ;;  %v5122_v10 = vadd.f32 %v5118_v46, %v3185_v19  ;;  %v5121_v8 = vmul.f32 %v7715_v24, %v7086_v57 }
 0xfc2   :  { %v7717_v30 = vpop.eup %7716  ;;  %7726 = vrcp.f32 %v5108_v61  ;;  %v10174_v61 = vpop.permute.xlu0 %5331 }
 0xfc3   :  { %7728 = vtanh.f32 %v5122_v10  ;;  %v5125_v37 = vadd.f32 %v5121_v8, %v3203_v29  ;;  %v5120_v2 = vmul.f32 %v7717_v30, %v5053_v43 }
 0xfc4   :  { %v7719_v14 = vpop.eup %7718 }
 0xfc5   :  { %7730 = vtanh.f32 %v5125_v37  ;;  %v5124_v55 = vadd.f32 %v5120_v2, %v3197_v3  ;;  %v5131_v59 = vsub.f32 1.0, %v7719_v14  ;;  %v5139_v25 = vmul.f32 %v7719_v14, %v10021_v32  ;;  %v10185_v2 = vpop.permute.xlu1 %5341 }
 0xfc6   :  { %v7721_v11 = vpop.eup %7720  ;;  %v10183_v37 = vpop.permute.xlu0 %5336 }
 0xfc7   :  { %7732 = vtanh.f32 %v5124_v55  ;;  %v5130_v45 = vsub.f32 1.0, %v7721_v11  ;;  %v5138_v6 = vmul.f32 %v7721_v11, %v10025_v62 }
 0xfc8   :  { %v7723_v63 = vpop.eup %7722 }
 0xfc9   :  { %v5133_v17 = vsub.f32 1.0, %v7723_v63  ;;  %v5141_v34 = vmul.f32 %v7723_v63, %v10027_v54  ;;  %v5516_v54 = vpop.f32.mrf.mxu1 }
 0xfca   :  { %v5517_v57 = vadd.f32 %v5516_v54, %v10174_v61 }
 0xfcb   :  { %v5518_v7 = vpop.f32.mrf.mxu1 }
 0xfcc   :  { %v6403_v31 = vmul.f32 -1.442695, %v5517_v57 }
 0xfcd   :  { %v5522_v14 = vpop.f32.mrf.mxu1 }
 0xfce   :  { %v7725_v16 = vpop.eup %7724  ;;  %v5523_v63 = vadd.f32 %v5522_v14, %v10183_v37 }
 0xfcf   :  { %v7727_v44 = vpop.eup %7726  ;;  %v5135_v26 = vmul.f32 %v7725_v16, %v5131_v59  ;;  %v5524_v16 = vpop.f32.mrf.mxu1 }
 0xfd0   :  { %v7729_v40 = vpop.eup %7728  ;;  %v5132_v41 = vsub.f32 1.0, %v7727_v44  ;;  %v5140_v38 = vmul.f32 %v7727_v44, %v10033_v50  ;;  %v5427_v50 = vpop.f32.mrf.mxu0  ;;  %v5525_v36 = vadd.f32 %v5524_v16, %v10183_v37 }
 0xfd1   :  { %v5143_v39 = vadd.f32 %v5139_v25, %v5135_v26  ;;  %v5134_v51 = vmul.f32 %v7729_v40, %v5130_v45  ;;  %v6411_v26 = vmul.f32 -1.442695, %v5523_v63  ;;  %v5528_v45 = vpop.f32.mrf.mxu1 }
 0xfd2   :  { %v7731_v42 = vpop.eup %7730  ;;  %v5429_v32 = vpop.f32.mrf.mxu0  ;;  %v5529_v12 = vadd.f32 %v5528_v45, %v10185_v2 }
 0xfd3   :  { %v5137_v48 = vmul.f32 %v7731_v42, %v5133_v17  ;;  %v5142_v56 = vadd.f32 %v5138_v6, %v5134_v51  ;;  %v5240_v9 = vsel %vm5224_vm9, %v5143_v39, -1.0  ;;  %v5430_v62 = vadd.f32 %v5429_v32, %v10174_v61  ;;  %v10192_v51 = vpop.permute.xlu1 %5346  ;;  %v5530_v42 = vpop.f32.mrf.mxu1 }
 0xfd4   :  { %v7733_v13 = vpop.eup %7732  ;;  %v5433_v55 = vpop.f32.mrf.mxu0  ;;  %v6412_v17 = vmul.f32 -1.442695, %v5525_v36 }
 0xfd5   :  { %v5145_v21 = vadd.f32 %v5141_v34, %v5137_v48  ;;  %v5136_v28 = vmul.f32 %v7733_v13, %v5132_v41  ;;  %v5232_v52 = vsel %vm5224_vm9, %v5142_v56, -1.0  ;;  %v6402_v19 = vmul.f32 -1.442695, %v5430_v62  ;;  %v5534_v13 = vpop.f32.mrf.mxu1 }
 0xfd6   :  { %v5434_v11 = vadd.f32 %v5433_v55, %v10183_v37  ;;  %v5435_v59 = vpop.f32.mrf.mxu0  ;;  %v5531_v48 = vadd.f32 %v5530_v42, %v10185_v2  ;;  %v6419_v41 = vmul.f32 -1.442695, %v5529_v12 }
 0xfd7   :  { %v5256_v60 = vsel %vm5224_vm9, %v5145_v21, -1.0  ;;  %v5144_v23 = vadd.f32 %v5140_v38, %v5136_v28  ;;  %v5436_v49 = vadd.f32 %v5435_v59, %v10183_v37 }
 0xfd8   :  { %5652 = vmatprep.subr.mxu1 %v5256_v60  ;;  %v6409_v44 = vmul.f32 -1.442695, %v5434_v11  ;;  %v5439_v25 = vpop.f32.mrf.mxu0  ;;  %v6420_v28 = vmul.f32 -1.442695, %v5531_v48 }
 0xfd9   :  { %5653 = vmatpush1.msra.mxu1 %v5255_v35  ;;  %v5248_v15 = vsel %vm5224_vm9, %v5144_v23, -1.0  ;;  %v6410_v40 = vmul.f32 -1.442695, %v5436_v49  ;;  %v5440_v39 = vadd.f32 %v5439_v25, %v10185_v2  ;;  %v5536_v23 = vpop.f32.mrf.mxu1  ;;  %v5535_v35 = vadd.f32 %v5534_v13, %v10192_v51 }
 0xfda   :  { %5654 = vmatprep.subr.mxu1 %v5248_v15  ;;  %v5441_v6 = vpop.f32.mrf.mxu0 }
 0xfdb   :  { %5655 = vmatpush1.msra.mxu1 %v5247_v47  ;;  %v5442_v0 = vadd.f32 %v5441_v6, %v10185_v2  ;;  %v6417_v34 = vmul.f32 -1.442695, %v5440_v39  ;;  %v5537_v47 = vadd.f32 %v5536_v23, %v10192_v51 }
 0xfdc   :  { %5656 = vmatprep.subr.mxu1 %v5240_v9  ;;  %v5445_v56 = vpop.f32.mrf.mxu0 }
 0xfdd   :  { %5657 = vmatpush1.msra.mxu1 %v5239_v58  ;;  %v6418_v21 = vmul.f32 -1.442695, %v5442_v0  ;;  %v5446_v38 = vadd.f32 %v5445_v56, %v10192_v51  ;;  %v6427_v58 = vmul.f32 -1.442695, %v5535_v35  ;;  %v6428_v54 = vmul.f32 -1.442695, %v5537_v47 }
 0xfde   :  { %5658 = vmatprep.subr.mxu1 %v5232_v52  ;;  %v5447_v60 = vpop.f32.mrf.mxu0 }
 0xfdf   :  { %5659 = vmatpush1.msra.mxu1 %v5231_v4  ;;  %v5448_v15 = vadd.f32 %v5447_v60, %v10192_v51  ;;  %v6425_v9 = vmul.f32 -1.442695, %v5446_v38 }
 0xfe0   :  { %6397 = vmatmul.mubr.msk.f32.vlgmr.msra.gmra.mxu1 %vm752_vm1, %v9993_v27  ;;  %v5428_v27 = vadd.f32 %v5427_v50, %v10174_v61  ;;  %v5605_v52 = vpop.f32.mrf.mxu0 }
 0xfe1   :  { %5698 = vmatprep.mubr.f32.mxu1 %v10425_v18  ;;  %v6426_v4 = vmul.f32 -1.442695, %v5448_v15  ;;  %v5606_v50 = vadd.f32 %v5605_v52, %v10174_v61 }
 0xfe2   :  { %v6401_v5 = vmul.f32 -1.442695, %v5428_v27 }
 0xfe3   :  { %v6405_v32 = vmul.f32 -1.442695, %v5606_v50 }
 0xfe4   :  { %6398 = vmatmul.mubr.msk.f32.gmra.mxu1 %vm752_vm1, %v10089_v53  ;;  %v5519_v53 = vadd.f32 %v5518_v7, %v10174_v61  ;;  %7734 = vpow2.f32 %v6401_v5  ;;  %v5607_v7 = vpop.f32.mrf.mxu0 }
 0xfe5   :  { %5704 = vmatprep.mubr.f32.mxu1 %v10425_v18  ;;  %7736 = vpow2.f32 %v6402_v19  ;;  %v5608_v11 = vadd.f32 %v5607_v7, %v10174_v61 }
 0xfe6   :  { %7738 = vpow2.f32 %v6403_v31  ;;  %v5611_v27 = vpop.f32.mrf.mxu0 }
 0xfe7   :  { %v5612_v16 = vadd.f32 %v5611_v27, %v10183_v37  ;;  %v6406_v6 = vmul.f32 -1.442695, %v5608_v11 }
 0xfe8   :  { %6399 = vmatmul.mubr.msk.f32.gmra.mxu1 %vm752_vm1, %v10100_v33  ;;  %v6404_v33 = vmul.f32 -1.442695, %v5519_v53  ;;  %v5613_v57 = vpop.f32.mrf.mxu0 }
 0xfe9   :  { %5710 = vmatprep.mubr.f32.mxu1 %v10425_v18  ;;  %v6413_v0 = vmul.f32 -1.442695, %v5612_v16 }
 0xfea   :  { %7740 = vpow2.f32 %v6404_v33  ;;  %v5617_v33 = vpop.f32.mrf.mxu0 }
 0xfeb   :  { %v5618_v45 = vadd.f32 %v5617_v33, %v10185_v2 }
 0xfec   :  { %6400 = vmatmul.mubr.msk.f32.gmra.mxu1 %vm752_vm1, %v10111_v20 }
 0xfed   :  { %v6421_v56 = vmul.f32 -1.442695, %v5618_v45 }
 0xff1   :  { %v7735_v18 = vpop.eup %7734 }
 0xff2   :  { %v7737_v46 = vpop.eup %7736  ;;  %v5813_v24 = vadd.f32 1.0, %v7735_v18 }
 0xff3   :  { %v7739_v1 = vpop.eup %7738  ;;  %v5814_v29 = vadd.f32 1.0, %v7737_v46 }
 0xff4   :  { %v5815_v8 = vadd.f32 1.0, %v7739_v1  ;;  %7742 = vrcp.f32 %v5813_v24 }
 0xff5   :  { %7744 = vrcp.f32 %v5814_v29  ;;  %v5619_v29 = vpop.f32.mrf.mxu0 }
 0xff6   :  { %7746 = vrcp.f32 %v5815_v8  ;;  %v5620_v42 = vadd.f32 %v5619_v29, %v10185_v2 }
 0xff7   :  { %v7741_v10 = vpop.eup %7740 }
 0xff8   :  { %v5816_v30 = vadd.f32 1.0, %v7741_v10 }
 0xffa   :  { %7748 = vrcp.f32 %v5816_v30 }
 0xffb   :  { %7750 = vpow2.f32 %v6409_v44  ;;  %v5614_v44 = vadd.f32 %v5613_v57, %v10183_v37 }
 0xffc   :  { %7752 = vpow2.f32 %v6411_v26 }
 0xffd   :  { %7754 = vpow2.f32 %v6410_v40 }
 0xffe   :  { %7756 = vpow2.f32 %v6412_v17 }
 0xfff   :  { %7758 = vpow2.f32 %v6417_v34  ;;  %v6414_v34 = vmul.f32 -1.442695, %v5614_v44 }
0x1000   :  { %7760 = vpow2.f32 %v6419_v41 }
0x1001   :  { %v7743_v43 = vpop.eup %7742  ;;  %7762 = vpow2.f32 %v6418_v21  ;;  %v6422_v21 = vmul.f32 -1.442695, %v5620_v42 }
0x1002   :  { %v7745_v22 = vpop.eup %7744  ;;  %5909 = vst [vmem:[#allocation4] sm:$0xff] %v7743_v43  ;;  %7764 = vpow2.f32 %v6420_v28 }
0x1003   :  { %v7747_v20 = vpop.eup %7746  ;;  %5910 = vst [vmem:[#allocation4 + $0x8] sm:$0xff] %v7745_v22  ;;  %7766 = vpow2.f32 %v6425_v9 }
0x1004   :  { %5911 = vst [vmem:[#allocation4 + $0x10] sm:$0xff] %v7747_v20  ;;  %7768 = vpow2.f32 %v6427_v58 }
0x1005   :  { %7770 = vpow2.f32 %v6426_v4 }
0x1006   :  { %7772 = vpow2.f32 %v6428_v54 }
0x1007   :  { %v7749_v3 = vpop.eup %7748  ;;  %7774 = vpow2.f32 %v6405_v32 }
0x1008   :  { %5912 = vst [vmem:[#allocation4 + $0x18] sm:$0xff] %v7749_v3  ;;  %v7751_v62 = vpop.eup %7750  ;;  %v5623_v3 = vpop.f32.mrf.mxu0 }
0x1009   :  { %v7753_v53 = vpop.eup %7752  ;;  %v5821_v5 = vadd.f32 1.0, %v7751_v62  ;;  %v5624_v48 = vadd.f32 %v5623_v3, %v10192_v51 }
0x100a   :  { %v7755_v19 = vpop.eup %7754  ;;  %v5823_v31 = vadd.f32 1.0, %v7753_v53  ;;  %v5625_v40 = vpop.f32.mrf.mxu0 }
0x100b   :  { %v7757_v18 = vpop.eup %7756  ;;  %v5822_v46 = vadd.f32 1.0, %v7755_v19  ;;  %7776 = vrcp.f32 %v5821_v5  ;;  %v5626_v41 = vadd.f32 %v5625_v40, %v10192_v51  ;;  %v6429_v38 = vmul.f32 -1.442695, %v5624_v48 }
0x100c   :  { %v7759_v24 = vpop.eup %7758  ;;  %v5824_v1 = vadd.f32 1.0, %v7757_v18  ;;  %7778 = vrcp.f32 %v5823_v31 }
0x100d   :  { %v7761_v10 = vpop.eup %7760  ;;  %7780 = vrcp.f32 %v5822_v46  ;;  %v5829_v8 = vadd.f32 1.0, %v7759_v24  ;;  %v6430_v23 = vmul.f32 -1.442695, %v5626_v41 }
0x100e   :  { %v7763_v30 = vpop.eup %7762  ;;  %7782 = vrcp.f32 %v5824_v1  ;;  %v5831_v43 = vadd.f32 1.0, %v7761_v10 }
0x100f   :  { %v7765_v22 = vpop.eup %7764  ;;  %v5830_v20 = vadd.f32 1.0, %v7763_v30  ;;  %7784 = vrcp.f32 %v5829_v8 }
0x1010   :  { %v7767_v55 = vpop.eup %7766  ;;  %v5832_v14 = vadd.f32 1.0, %v7765_v22  ;;  %7786 = vrcp.f32 %v5831_v43 }
0x1011   :  { %v7769_v63 = vpop.eup %7768  ;;  %7788 = vrcp.f32 %v5830_v20  ;;  %v5837_v59 = vadd.f32 1.0, %v7767_v55 }
0x1012   :  { %v7771_v49 = vpop.eup %7770  ;;  %7790 = vrcp.f32 %v5832_v14  ;;  %v5839_v36 = vadd.f32 1.0, %v7769_v63 }
0x1013   :  { %v7773_v26 = vpop.eup %7772  ;;  %v5838_v25 = vadd.f32 1.0, %v7771_v49  ;;  %7792 = vrcp.f32 %v5837_v59 }
0x1014   :  { %v7775_v17 = vpop.eup %7774  ;;  %v5840_v39 = vadd.f32 1.0, %v7773_v26  ;;  %7794 = vrcp.f32 %v5839_v36 }
0x1015   :  { %7796 = vrcp.f32 %v5838_v25  ;;  %v5817_v12 = vadd.f32 1.0, %v7775_v17 }
0x1016   :  { %7798 = vrcp.f32 %v5840_v39 }
0x1017   :  { %7800 = vrcp.f32 %v5817_v12 }
0x1018   :  { %v7777_v13 = vpop.eup %7776  ;;  %7802 = vpow2.f32 %v6406_v6 }
0x1019   :  { %v7779_v28 = vpop.eup %7778  ;;  %5917 = vst [vmem:[#allocation4 + $0x40] sm:$0xff] %v7777_v13  ;;  %7804 = vpow2.f32 %v6413_v0 }
0x101a   :  { %v7781_v60 = vpop.eup %7780  ;;  %5919 = vst [vmem:[#allocation4 + $0x50] sm:$0xff] %v7779_v28  ;;  %7806 = vpow2.f32 %v6414_v34 }
0x101b   :  { %v7783_v35 = vpop.eup %7782  ;;  %5918 = vst [vmem:[#allocation4 + $0x48] sm:$0xff] %v7781_v60  ;;  %7808 = vpow2.f32 %v6421_v56 }
0x101c   :  { %v7785_v15 = vpop.eup %7784  ;;  %5920 = vst [vmem:[#allocation4 + $0x58] sm:$0xff] %v7783_v35  ;;  %7810 = vpow2.f32 %v6422_v21 }
0x101d   :  { %v7787_v47 = vpop.eup %7786  ;;  %5925 = vst [vmem:[#allocation4 + $0x80] sm:$0xff] %v7785_v15  ;;  %7812 = vpow2.f32 %v6429_v38 }
0x101e   :  { %v7789_v9 = vpop.eup %7788  ;;  %5927 = vst [vmem:[#allocation4 + $0x90] sm:$0xff] %v7787_v47  ;;  %7814 = vpow2.f32 %v6430_v23 }
0x101f   :  { %v7791_v58 = vpop.eup %7790  ;;  %5926 = vst [vmem:[#allocation4 + $0x88] sm:$0xff] %v7789_v9 }
0x1020   :  { %v7793_v52 = vpop.eup %7792  ;;  %5928 = vst [vmem:[#allocation4 + $0x98] sm:$0xff] %v7791_v58 }
0x1021   :  { %v7795_v4 = vpop.eup %7794  ;;  %5933 = vst [vmem:[#allocation4 + $0xc0] sm:$0xff] %v7793_v52 }
0x1022   :  { %v7797_v54 = vpop.eup %7796  ;;  %5935 = vst [vmem:[#allocation4 + $0xd0] sm:$0xff] %v7795_v4 }
0x1023   :  { %v7799_v50 = vpop.eup %7798  ;;  %5934 = vst [vmem:[#allocation4 + $0xc8] sm:$0xff] %v7797_v54 }
0x1024   :  { %v7801_v7 = vpop.eup %7800  ;;  %5936 = vst [vmem:[#allocation4 + $0xd8] sm:$0xff] %v7799_v50 }
0x1025   :  { %v7803_v32 = vpop.eup %7802  ;;  %5913 = vst [vmem:[#allocation4 + $0x20] sm:$0xff] %v7801_v7 }
0x1026   :  { %v7805_v27 = vpop.eup %7804  ;;  %v5818_v62 = vadd.f32 1.0, %v7803_v32 }
0x1027   :  { %v7807_v57 = vpop.eup %7806  ;;  %v5825_v53 = vadd.f32 1.0, %v7805_v27 }
0x1028   :  { %v7809_v5 = vpop.eup %7808  ;;  %7816 = vrcp.f32 %v5818_v62  ;;  %v5826_v19 = vadd.f32 1.0, %v7807_v57 }
0x1029   :  { %v7811_v31 = vpop.eup %7810  ;;  %7818 = vrcp.f32 %v5825_v53  ;;  %v5833_v33 = vadd.f32 1.0, %v7809_v5 }
0x102a   :  { %v7813_v18 = vpop.eup %7812  ;;  %7820 = vrcp.f32 %v5826_v19  ;;  %v5834_v46 = vadd.f32 1.0, %v7811_v31 }
0x102b   :  { %v7815_v24 = vpop.eup %7814  ;;  %7822 = vrcp.f32 %v5833_v33  ;;  %v5841_v1 = vadd.f32 1.0, %v7813_v18 }
0x102c   :  { %7824 = vrcp.f32 %v5834_v46  ;;  %v5842_v29 = vadd.f32 1.0, %v7815_v24 }
0x102d   :  { %7826 = vrcp.f32 %v5841_v1 }
0x102e   :  { %7828 = vrcp.f32 %v5842_v29 }
0x1035   :  { %v7817_v10 = vpop.eup %7816 }
0x1036   :  { %v7819_v8 = vpop.eup %7818  ;;  %5914 = vst [vmem:[#allocation4 + $0x28] sm:$0xff] %v7817_v10 }
0x1037   :  { %v7821_v30 = vpop.eup %7820  ;;  %5921 = vst [vmem:[#allocation4 + $0x60] sm:$0xff] %v7819_v8 }
0x1038   :  { %v7823_v43 = vpop.eup %7822  ;;  %5922 = vst [vmem:[#allocation4 + $0x68] sm:$0xff] %v7821_v30 }
0x1039   :  { %v7825_v22 = vpop.eup %7824  ;;  %5929 = vst [vmem:[#allocation4 + $0xa0] sm:$0xff] %v7823_v43 }
0x103a   :  { %v7827_v20 = vpop.eup %7826  ;;  %5930 = vst [vmem:[#allocation4 + $0xa8] sm:$0xff] %v7825_v22 }
0x103b   :  { %v7829_v3 = vpop.eup %7828  ;;  %5937 = vst [vmem:[#allocation4 + $0xe0] sm:$0xff] %v7827_v20 }
0x103c   :  { %5938 = vst [vmem:[#allocation4 + $0xe8] sm:$0xff] %v7829_v3 }
0x10a0   :  { %v5694_v55 = vpop.f32.mrf.mxu1 }
0x10a1   :  { %v5695_v14 = vadd.f32 %v5694_v55, %v10174_v61 }
0x10a2   :  { %v5696_v11 = vpop.f32.mrf.mxu1 }
0x10a3   :  { %v6407_v63 = vmul.f32 -1.442695, %v5695_v14  ;;  %v5697_v59 = vadd.f32 %v5696_v11, %v10174_v61 }
0x10a4   :  { %v5700_v16 = vpop.f32.mrf.mxu1 }
0x10a5   :  { %7830 = vpow2.f32 %v6407_v63  ;;  %v6408_v49 = vmul.f32 -1.442695, %v5697_v59  ;;  %v5701_v36 = vadd.f32 %v5700_v16, %v10183_v37 }
0x10a6   :  { %v5702_v44 = vpop.f32.mrf.mxu1 }
0x10a7   :  { %7832 = vpow2.f32 %v6408_v49  ;;  %v6415_v26 = vmul.f32 -1.442695, %v5701_v36  ;;  %v5703_v25 = vadd.f32 %v5702_v44, %v10183_v37 }
0x10a8   :  { %v5706_v45 = vpop.f32.mrf.mxu1 }
0x10a9   :  { %7834 = vpow2.f32 %v6415_v26  ;;  %v6416_v40 = vmul.f32 -1.442695, %v5703_v25  ;;  %v5707_v17 = vadd.f32 %v5706_v45, %v10185_v2 }
0x10aa   :  { %v5708_v39 = vpop.f32.mrf.mxu1 }
0x10ab   :  { %7836 = vpow2.f32 %v6416_v40  ;;  %v6423_v6 = vmul.f32 -1.442695, %v5707_v17  ;;  %v5709_v61 = vadd.f32 %v5708_v39, %v10185_v2 }
0x10ac   :  { %v5712_v42 = vpop.f32.mrf.mxu1 }
0x10ad   :  { %7838 = vpow2.f32 %v6423_v6  ;;  %v6424_v12 = vmul.f32 -1.442695, %v5709_v61  ;;  %v5713_v0 = vadd.f32 %v5712_v42, %v10192_v51 }
0x10ae   :  { %v5714_v48 = vpop.f32.mrf.mxu1 }
0x10af   :  { %7840 = vpow2.f32 %v6424_v12  ;;  %v6431_v34 = vmul.f32 -1.442695, %v5713_v0  ;;  %v5715_v37 = vadd.f32 %v5714_v48, %v10192_v51 }
0x10b1   :  { %7842 = vpow2.f32 %v6431_v34  ;;  %v6432_v41 = vmul.f32 -1.442695, %v5715_v37 }
0x10b2   :  { %v7831_v56 = vpop.eup %7830 }
0x10b3   :  { %v5819_v13 = vadd.f32 1.0, %v7831_v56  ;;  %7844 = vpow2.f32 %v6432_v41 }
0x10b4   :  { %v7833_v21 = vpop.eup %7832 }
0x10b5   :  { %7846 = vrcp.f32 %v5819_v13  ;;  %v5820_v28 = vadd.f32 1.0, %v7833_v21 }
0x10b6   :  { %v7835_v38 = vpop.eup %7834 }
0x10b7   :  { %7848 = vrcp.f32 %v5820_v28  ;;  %v5827_v2 = vadd.f32 1.0, %v7835_v38 }
0x10b8   :  { %v7837_v60 = vpop.eup %7836 }
0x10b9   :  { %7850 = vrcp.f32 %v5827_v2  ;;  %v5828_v23 = vadd.f32 1.0, %v7837_v60 }
0x10ba   :  { %v7839_v35 = vpop.eup %7838 }
0x10bb   :  { %7852 = vrcp.f32 %v5828_v23  ;;  %v5835_v15 = vadd.f32 1.0, %v7839_v35 }
0x10bc   :  { %v7841_v47 = vpop.eup %7840 }
0x10bd   :  { %7854 = vrcp.f32 %v5835_v15  ;;  %v5836_v51 = vadd.f32 1.0, %v7841_v47 }
0x10be   :  { %v7843_v9 = vpop.eup %7842 }
0x10bf   :  { %7856 = vrcp.f32 %v5836_v51  ;;  %v5843_v58 = vadd.f32 1.0, %v7843_v9 }
0x10c0   :  { %v7845_v52 = vpop.eup %7844 }
0x10c1   :  { %7858 = vrcp.f32 %v5843_v58  ;;  %v5844_v4 = vadd.f32 1.0, %v7845_v52 }
0x10c2   :  { %v7847_v54 = vpop.eup %7846 }
0x10c3   :  { %5915 = vst [vmem:[#allocation4 + $0x30] sm:$0xff] %v7847_v54  ;;  %7860 = vrcp.f32 %v5844_v4 }
0x10c4   :  { %v7849_v50 = vpop.eup %7848 }
0x10c5   :  { %5916 = vst [vmem:[#allocation4 + $0x38] sm:$0xff] %v7849_v50 }
0x10c6   :  { %v7851_v7 = vpop.eup %7850 }
0x10c7   :  { %5923 = vst [vmem:[#allocation4 + $0x70] sm:$0xff] %v7851_v7 }
0x10c8   :  { %v7853_v32 = vpop.eup %7852 }
0x10c9   :  { %5924 = vst [vmem:[#allocation4 + $0x78] sm:$0xff] %v7853_v32 }
0x10ca   :  { %v7855_v27 = vpop.eup %7854 }
0x10cb   :  { %5931 = vst [vmem:[#allocation4 + $0xb0] sm:$0xff] %v7855_v27 }
0x10cc   :  { %v7857_v62 = vpop.eup %7856 }
0x10cd   :  { %5932 = vst [vmem:[#allocation4 + $0xb8] sm:$0xff] %v7857_v62 }
0x10ce   :  { %v7859_v57 = vpop.eup %7858 }
0x10cf   :  { %5939 = vst [vmem:[#allocation4 + $0xf0] sm:$0xff] %v7859_v57 }
0x10d0   :  { %v7861_v53 = vpop.eup %7860 }
0x10d1   :  { %5940 = vst [vmem:[#allocation4 + $0xf8] sm:$0xff] %v7861_v53 }
0x10d2   :  { %7932 = shalt.err (!%p7929_p4)
}
0x10d3   :  { %s7946_s20 = smov 1024   ;;  %s7947_s21 = smov 64  }
0x10d4   :  { %5952 = dma.vmem_to_hbm [thread:$0]  %s5947_s18, 4096, %s10227_s7, [#allocation5], %s7946_s20, %s7946_s20, %s7947_s21  }
0x10d5   :  { %7941 = dma.done.wait [#allocation5], 4096  }
0x10d6   :  { %7942 = vsyncadd [#allocation5], 4294963200 }
0x10d7   :  { %5956 = vsyncpa [#allocation5], 1 }

</bundles_post_ra>
